<compile_context>
chip_gen: v6e
topology: v6e:2x2x1
jax: 0.10.0
libtpu: 0.0.40
codegen_flags: <defaults>
</compile_context>

<pallas_src>
import math

import jax
import jax.numpy as jnp
from jax.experimental import pallas as pl
from jax.experimental.pallas import tpu as pltpu


# --------------------------------------------------------------------------
# In-kernel helpers
# --------------------------------------------------------------------------

def _layernorm(x, g, b, eps):
    mu = jnp.mean(x, axis=-1, keepdims=True)
    var = jnp.mean(jnp.square(x - mu), axis=-1, keepdims=True)  # biased, as PyTorch LN
    return (x - mu) * jax.lax.rsqrt(var + eps) * g + b


def _gelu_tanh(x):
    # TODO(synk): PyTorch nn.GELU() defaults to the exact erf form; the tanh
    # approximation (|err| <= ~1e-3) is used so the transcendental runs on the EUP.
    c = math.sqrt(2.0 / math.pi)
    return 0.5 * x * (1.0 + jnp.tanh(c * (x + 0.044715 * x * x * x)))


# --------------------------------------------------------------------------
# Fully fused forward kernel: all layers + pooled head in one pallas_call
# --------------------------------------------------------------------------

def _make_fused_kernel(layer_cfgs, *, B, T, n_groups, rows_per_group, eps):
    BT = B * T

    def kernel(*refs):
        x_ref = refs[0]
        out_ref = refs[-1]
        params = refs[1:-1]
        idx = 0

        def nxt():
            nonlocal idx
            r = params[idx]
            idx += 1
            return r

        x = x_ref[...]                                           # (B*T, Cin0) f32

        for cfg in layer_cfgs:
            dim = cfg["dim"]
            H = cfg["heads"]
            hd = cfg["head_dim"]
            has_skip = cfg["has_skip"]

            ng_ref, nb_ref = nxt(), nxt()
            qkvw_ref, bias_ref = nxt(), nxt()
            projw_ref, projb_ref = nxt(), nxt()
            skipw_ref = nxt() if has_skip else None
            n1g_ref, n1b_ref = nxt(), nxt()
            fc1w_ref, fc1b_ref = nxt(), nxt()
            fc2w_ref, fc2b_ref = nxt(), nxt()

            # ---- attention branch: LN -> fused qkv over all B*T rows ----
            # (Layer 0 has Cin=3; the K=3 contraction is left on the MXU --
            #  negligible at this size.  TODO(synk): fold layer-0 LN+qkv into
            #  the JAX stem if C stays this small at scale.)
            xn = _layernorm(x, ng_ref[...], nb_ref[...], eps)
            qkv = jnp.dot(xn.astype(jnp.bfloat16), qkvw_ref[...],
                          preferred_element_type=jnp.float32)     # (B*T, 3*dim)

            proj = projb_ref[...]                                  # (1, dim), broadcasts
            for h in range(H):
                q = qkv[:, h * hd:(h + 1) * hd]
                k = qkv[:, dim + h * hd: dim + (h + 1) * hd]
                v = qkv[:, 2 * dim + h * hd: 2 * dim + (h + 1) * hd]
                q = q.reshape(B, T, hd).astype(jnp.bfloat16)
                k = k.reshape(B, T, hd).astype(jnp.bfloat16)
                v = v.reshape(B, T, hd).astype(jnp.bfloat16)
                # scale pre-folded into q columns of qkv_w and into the bias,
                # preserving the reference order (q@k^T + bias) * scale.
                s = jnp.einsum('bqd,bkd->bqk', q, k,
                               preferred_element_type=jnp.float32)  # (B, T, T) f32
                s = s + bias_ref[h]                                 # (T, T) bf16 -> f32
                s = s - jnp.max(s, axis=-1, keepdims=True)
                p = jnp.exp(s)
                p = p * pl.reciprocal(jnp.sum(p, axis=-1, keepdims=True),
                                      approx=True)
                o = jnp.einsum('bqk,bkd->bqd', p.astype(jnp.bfloat16), v,
                               preferred_element_type=jnp.float32)  # (B, T, hd)
                # Fold this head straight through its (hd, dim) proj slab:
                # replaces the former 16-lane concat with an MXU accumulate.
                proj = proj + jnp.dot(o.reshape(BT, hd).astype(jnp.bfloat16),
                                      projw_ref[h],
                                      preferred_element_type=jnp.float32)

            if has_skip:
                skip = jnp.dot(x.astype(jnp.bfloat16), skipw_ref[...],
                               preferred_element_type=jnp.float32)   # Linear, bias=False
            else:
                skip = x
            x1 = skip + proj                                         # residual #1

            # ---- MLP branch ----
            xn1 = _layernorm(x1, n1g_ref[...], n1b_ref[...], eps)
            h1 = jnp.dot(xn1.astype(jnp.bfloat16), fc1w_ref[...],
                         preferred_element_type=jnp.float32) + fc1b_ref[...]
            h1 = _gelu_tanh(h1)
            mlp = jnp.dot(h1.astype(jnp.bfloat16), fc2w_ref[...],
                          preferred_element_type=jnp.float32) + fc2b_ref[...]
            x = x1 + mlp                                             # residual #2

        # ---- head: mean over the (m, t) rows of each sample + final fc ----
        fcw_ref, fcb_ref = nxt(), nxt()
        dim_last = layer_cfgs[-1]["dim"]
        feat = jnp.mean(x.reshape(n_groups, rows_per_group, dim_last),
                        axis=1)                                       # (N, dim) f32
        out_ref[...] = (jnp.dot(feat, fcw_ref[...],
                                preferred_element_type=jnp.float32)
                        + fcb_ref[...])

    return kernel


def coupledformer_fused_call(x2, params, *, B, T, n_groups, rows_per_group):
    """x2: (B*T, Cin0) f32 -> logits (n_groups, num_class) f32, one pallas_call."""
    num_class = params["fc_w"].shape[1]

    layer_cfgs = []
    args = [x2]
    for lp in params["layers"]:
        dim = lp["proj_b"].shape[1]
        H = lp["bias_sum"].shape[0]
        has_skip = lp["skip_w"] is not None
        layer_cfgs.append({"dim": dim, "heads": H, "head_dim": dim // H,
                           "has_skip": has_skip})
        args += [lp["norm_g"], lp["norm_b"], lp["qkv_w"], lp["bias_sum"],
                 lp["proj_w"], lp["proj_b"]]
        if has_skip:
            args.append(lp["skip_w"])
        args += [lp["norm1_g"], lp["norm1_b"], lp["fc1_w"], lp["fc1_b"],
                 lp["fc2_w"], lp["fc2_b"]]
    args += [params["fc_w"], params["fc_b"]]

    kernel = _make_fused_kernel(layer_cfgs, B=B, T=T, n_groups=n_groups,
                                rows_per_group=rows_per_group, eps=1e-5)
    # No grid / no BlockSpecs: every operand is a whole-array VMEM block
    # (activations + all weights total a few hundred KB -- far under the VMEM
    # budget on v5e/v6e/v7x), so there is exactly one kernel dispatch and the
    # only HBM output is the (N, num_class) logits.
    return pl.pallas_call(
        kernel,
        out_shape=jax.ShapeDtypeStruct((n_groups, num_class), jnp.float32),
        compiler_params=pltpu.CompilerParams(
            vmem_limit_bytes=32 * 1024 * 1024),
    )(*args)


# --------------------------------------------------------------------------
# Model glue (stem rearranges in plain JAX)
# --------------------------------------------------------------------------

def coupledformer_forward(x, y, params):
    """x: (N, C, T, V, M) float32, y: labels (passed through)."""
    N, C, T, V, M = x.shape
    # 'n c t v m -> n (m v c) t'
    xb = jnp.transpose(x, (0, 4, 3, 1, 2)).reshape(N, M * V * C, T)
    # data_bn in eval mode (running_mean=0, running_var=1, weight=1, bias=0).
    # TODO(synk): PyTorch BatchNorm1d in train mode would use batch statistics.
    xb = xb * (1.0 / math.sqrt(1.0 + 1e-5))
    # 'n (m v c) t -> (n m) (t v) c'
    xb = xb.reshape(N, M, V, C, T)
    xb = jnp.transpose(xb, (0, 1, 4, 2, 3)).reshape(N * M, T * V, C)

    B, T_seq = N * M, T * V
    x2 = xb.reshape(B * T_seq, C)

    # '(n m) t c -> n m t c'; mean over t then m == mean over the M*T_seq
    # contiguous rows of each n (row order is (n, m, t)); done in-kernel.
    logits = coupledformer_fused_call(x2, params, B=B, T=T_seq,
                                      n_groups=N, rows_per_group=M * T_seq)
    return logits, y


# --------------------------------------------------------------------------
# Deterministic parameter initialization (synthetic, no checkpoint)
# --------------------------------------------------------------------------

def _normal(key, shape, std):
    return std * jax.random.normal(key, shape, dtype=jnp.float32)


def init_layer_params(key, dim_in, dim, num_heads, t_seq, ff_mult=4):
    ks = jax.random.split(key, 7)
    hidden = dim * ff_mult
    hd = dim // num_heads
    scale = float(hd) ** -0.5
    # TODO(synk): DynamicRelativePositionBias1D / HopRelativePositionBias are
    # undefined in the reference; modeled as learned (H, T, T) biases, summed
    # once at init (input-independent within a forward).  Pre-scaled by the
    # softmax scale and stored bf16 (VMEM footprint on v7x).
    bias_sum = (_normal(ks[0], (num_heads, t_seq, t_seq), 0.02)
                + _normal(ks[1], (num_heads, t_seq, t_seq), 0.02))
    bias_sum = (bias_sum * scale).astype(jnp.bfloat16)
    # Softmax scale folded into the q columns of qkv_w (in f32, before the
    # bf16 cast), so the kernel does no per-score multiply.
    qkv_w = _normal(ks[2], (dim_in, 3 * dim), 0.02)
    qkv_w = qkv_w.at[:, :dim].multiply(scale).astype(jnp.bfloat16)
    # proj weight stored head-major (H, hd, dim): each head's attention output
    # is folded straight into the proj result (no lane concat in the kernel).
    proj_w = _normal(ks[3], (dim, dim), 0.02).reshape(num_heads, hd, dim)
    return {
        "norm_g": jnp.ones((1, dim_in), jnp.float32),
        "norm_b": jnp.zeros((1, dim_in), jnp.float32),
        "norm1_g": jnp.ones((1, dim), jnp.float32),
        "norm1_b": jnp.zeros((1, dim), jnp.float32),
        # MXU operands pre-cast to bf16; accumulation stays f32.
        "qkv_w": qkv_w,
        "bias_sum": bias_sum,
        "proj_w": proj_w.astype(jnp.bfloat16),
        "proj_b": jnp.zeros((1, dim), jnp.float32),
        "fc1_w": _normal(ks[4], (dim, hidden), 0.02).astype(jnp.bfloat16),
        "fc1_b": jnp.zeros((1, hidden), jnp.float32),
        "fc2_w": _normal(ks[5], (hidden, dim), 0.02).astype(jnp.bfloat16),
        "fc2_b": jnp.zeros((1, dim), jnp.float32),
        "skip_w": (_normal(ks[6], (dim_in, dim), 0.02).astype(jnp.bfloat16)
                   if dim_in != dim else None),
    }


if __name__ == "__main__":
    # Small config consistent with the module's forward:
    #   num_point(V)=4, num_frames=8 -> T_seq=32, heads=2, head_dim=16 -> hidden=32
    N, C, T_frames, V, M = 2, 3, 8, 4, 2
    num_heads, head_dim = 2, 16
    hidden_dim = num_heads * head_dim          # 32
    num_layers = 2
    num_class = 10
    t_seq = T_frames * V                       # 32

    key = jax.random.PRNGKey(0)
    k_in, k_fc, *k_layers = jax.random.split(key, 2 + num_layers)

    layers = [init_layer_params(k_layers[0], C, hidden_dim, num_heads, t_seq)]
    for i in range(1, num_layers):
        layers.append(init_layer_params(k_layers[i], hidden_dim, hidden_dim,
                                        num_heads, t_seq))

    params = {
        "layers": layers,
        "fc_w": math.sqrt(2.0 / num_class)
        * jax.random.normal(k_fc, (hidden_dim, num_class), dtype=jnp.float32),
        "fc_b": jnp.zeros((1, num_class), jnp.float32),
    }

    x = jax.random.normal(k_in, (N, C, T_frames, V, M), dtype=jnp.float32)
    y = jnp.arange(N, dtype=jnp.int32)

    fwd = jax.jit(coupledformer_forward)
    logits, y_out = fwd(x, y, params)
    jax.block_until_ready(logits)
    assert logits.shape == (N, num_class)
    assert bool(jnp.all(jnp.isfinite(logits)))
    print("KERNEL_OK")
</pallas_src>

<mosaic_0001>
module attributes {stable_mosaic.version = 11 : i64} {
  func.func @kernel(%arg0: memref<128x3xf32, #tpu.memory_space<vmem>>, %arg1: memref<1x3xf32, #tpu.memory_space<vmem>>, %arg2: memref<1x3xf32, #tpu.memory_space<vmem>>, %arg3: memref<3x96xbf16, #tpu.memory_space<vmem>>, %arg4: memref<2x32x32xbf16, #tpu.memory_space<vmem>>, %arg5: memref<2x16x32xbf16, #tpu.memory_space<vmem>>, %arg6: memref<1x32xf32, #tpu.memory_space<vmem>>, %arg7: memref<3x32xbf16, #tpu.memory_space<vmem>>, %arg8: memref<1x32xf32, #tpu.memory_space<vmem>>, %arg9: memref<1x32xf32, #tpu.memory_space<vmem>>, %arg10: memref<32x128xbf16, #tpu.memory_space<vmem>>, %arg11: memref<1x128xf32, #tpu.memory_space<vmem>>, %arg12: memref<128x32xbf16, #tpu.memory_space<vmem>>, %arg13: memref<1x32xf32, #tpu.memory_space<vmem>>, %arg14: memref<1x32xf32, #tpu.memory_space<vmem>>, %arg15: memref<1x32xf32, #tpu.memory_space<vmem>>, %arg16: memref<32x96xbf16, #tpu.memory_space<vmem>>, %arg17: memref<2x32x32xbf16, #tpu.memory_space<vmem>>, %arg18: memref<2x16x32xbf16, #tpu.memory_space<vmem>>, %arg19: memref<1x32xf32, #tpu.memory_space<vmem>>, %arg20: memref<1x32xf32, #tpu.memory_space<vmem>>, %arg21: memref<1x32xf32, #tpu.memory_space<vmem>>, %arg22: memref<32x128xbf16, #tpu.memory_space<vmem>>, %arg23: memref<1x128xf32, #tpu.memory_space<vmem>>, %arg24: memref<128x32xbf16, #tpu.memory_space<vmem>>, %arg25: memref<1x32xf32, #tpu.memory_space<vmem>>, %arg26: memref<32x10xf32, #tpu.memory_space<vmem>>, %arg27: memref<1x10xf32, #tpu.memory_space<vmem>>, %arg28: memref<2x10xf32, #tpu.memory_space<vmem>>) attributes {dimension_semantics = [], scalar_prefetch = 0 : i64, scratch_operands = 0 : i64, tpu.core_type = #tpu.core_type<tc>} {
    %c0 = arith.constant 0 : index
    %c0_0 = arith.constant 0 : index
    %0 = vector.load %arg0[%c0, %c0_0] : memref<128x3xf32, #tpu.memory_space<vmem>>, vector<128x3xf32>
    %c0_1 = arith.constant 0 : index
    %c0_2 = arith.constant 0 : index
    %1 = vector.load %arg1[%c0_1, %c0_2] : memref<1x3xf32, #tpu.memory_space<vmem>>, vector<1x3xf32>
    %c0_3 = arith.constant 0 : index
    %c0_4 = arith.constant 0 : index
    %2 = vector.load %arg2[%c0_3, %c0_4] : memref<1x3xf32, #tpu.memory_space<vmem>>, vector<1x3xf32>
    %cst = arith.constant dense<0.000000e+00> : vector<128xf32>
    %3 = vector.multi_reduction <add>, %0, %cst [1] : vector<128x3xf32> to vector<128xf32>
    %4 = vector.shape_cast %3 : vector<128xf32> to vector<128x1xf32>
    %cst_5 = arith.constant 3.000000e+00 : f32
    %5 = vector.broadcast %cst_5 : f32 to vector<128x1xf32>
    %6 = arith.divf %4, %5 : vector<128x1xf32>
    %7 = vector.broadcast %6 : vector<128x1xf32> to vector<128x3xf32>
    %8 = arith.subf %0, %7 : vector<128x3xf32>
    %9 = arith.mulf %8, %8 : vector<128x3xf32>
    %cst_6 = arith.constant dense<0.000000e+00> : vector<128xf32>
    %10 = vector.multi_reduction <add>, %9, %cst_6 [1] : vector<128x3xf32> to vector<128xf32>
    %11 = vector.shape_cast %10 : vector<128xf32> to vector<128x1xf32>
    %cst_7 = arith.constant 3.000000e+00 : f32
    %12 = vector.broadcast %cst_7 : f32 to vector<128x1xf32>
    %13 = arith.divf %11, %12 : vector<128x1xf32>
    %14 = vector.broadcast %6 : vector<128x1xf32> to vector<128x3xf32>
    %15 = arith.subf %0, %14 : vector<128x3xf32>
    %cst_8 = arith.constant 9.99999974E-6 : f32
    %16 = vector.broadcast %cst_8 : f32 to vector<128x1xf32>
    %17 = arith.addf %13, %16 : vector<128x1xf32>
    %18 = math.rsqrt %17 : vector<128x1xf32>
    %19 = vector.broadcast %18 : vector<128x1xf32> to vector<128x3xf32>
    %20 = arith.mulf %15, %19 : vector<128x3xf32>
    %21 = vector.broadcast %1 : vector<1x3xf32> to vector<128x3xf32>
    %22 = arith.mulf %20, %21 : vector<128x3xf32>
    %23 = vector.broadcast %2 : vector<1x3xf32> to vector<128x3xf32>
    %24 = arith.addf %22, %23 : vector<128x3xf32>
    %25 = arith.truncf %24 : vector<128x3xf32> to vector<128x3xbf16>
    %c0_9 = arith.constant 0 : index
    %c0_10 = arith.constant 0 : index
    %26 = vector.load %arg3[%c0_9, %c0_10] : memref<3x96xbf16, #tpu.memory_space<vmem>>, vector<3x96xbf16>
    %cst_11 = arith.constant dense<0.000000e+00> : vector<128x96xf32>
    %27 = tpu.matmul %25, %26, %cst_11 {dimension_numbers = #tpu.dot_dimension_numbers<[1], [0], [0], [1], [0, 0, 1, 1], [], []>} : vector<128x3xbf16>, vector<3x96xbf16>, vector<128x96xf32> -> vector<128x96xf32>
    %c0_12 = arith.constant 0 : index
    %c0_13 = arith.constant 0 : index
    %28 = vector.load %arg6[%c0_12, %c0_13] : memref<1x32xf32, #tpu.memory_space<vmem>>, vector<1x32xf32>
    %29 = vector.extract_strided_slice %27 {offsets = [0, 0], sizes = [128, 16], strides = [1, 1]} : vector<128x96xf32> to vector<128x16xf32>
    %30 = vector.extract_strided_slice %27 {offsets = [0, 32], sizes = [128, 16], strides = [1, 1]} : vector<128x96xf32> to vector<128x16xf32>
    %31 = vector.extract_strided_slice %27 {offsets = [0, 64], sizes = [128, 16], strides = [1, 1]} : vector<128x96xf32> to vector<128x16xf32>
    %32 = vector.shape_cast %29 : vector<128x16xf32> to vector<4x32x16xf32>
    %33 = arith.truncf %32 : vector<4x32x16xf32> to vector<4x32x16xbf16>
    %34 = vector.shape_cast %30 : vector<128x16xf32> to vector<4x32x16xf32>
    %35 = arith.truncf %34 : vector<4x32x16xf32> to vector<4x32x16xbf16>
    %36 = vector.shape_cast %31 : vector<128x16xf32> to vector<4x32x16xf32>
    %37 = arith.truncf %36 : vector<4x32x16xf32> to vector<4x32x16xbf16>
    "tpu.trace_start"() <{level = 10 : i32, message = "bqd,bkd->bqk"}> : () -> ()
    %cst_14 = arith.constant dense<0.000000e+00> : vector<4x32x32xf32>
    %38 = tpu.matmul %33, %35, %cst_14 {dimension_numbers = #tpu.dot_dimension_numbers<[2], [2], [1], [1], [0, 0, 0, 1, 1, 1], [0], [0]>} : vector<4x32x16xbf16>, vector<4x32x16xbf16>, vector<4x32x32xf32> -> vector<4x32x32xf32>
    "tpu.trace_stop"() : () -> ()
    %c0_15 = arith.constant 0 : index
    %c0_16 = arith.constant 0 : index
    %c0_17 = arith.constant 0 : index
    %39 = vector.load %arg4[%c0_15, %c0_16, %c0_17] : memref<2x32x32xbf16, #tpu.memory_space<vmem>>, vector<1x32x32xbf16>
    %40 = vector.shape_cast %39 : vector<1x32x32xbf16> to vector<32x32xbf16>
    %41 = arith.extf %40 : vector<32x32xbf16> to vector<32x32xf32>
    %42 = vector.shape_cast %41 : vector<32x32xf32> to vector<1x32x32xf32>
    %43 = vector.broadcast %42 : vector<1x32x32xf32> to vector<4x32x32xf32>
    %44 = arith.addf %38, %43 : vector<4x32x32xf32>
    %cst_18 = arith.constant dense<0xFF800000> : vector<4x32xf32>
    %45 = vector.multi_reduction <maximumf>, %44, %cst_18 [2] : vector<4x32x32xf32> to vector<4x32xf32>
    %46 = vector.shape_cast %45 : vector<4x32xf32> to vector<4x32x1xf32>
    %47 = vector.broadcast %46 : vector<4x32x1xf32> to vector<4x32x32xf32>
    %48 = arith.subf %44, %47 : vector<4x32x32xf32>
    %49 = math.exp %48 : vector<4x32x32xf32>
    %cst_19 = arith.constant dense<0.000000e+00> : vector<4x32xf32>
    %50 = vector.multi_reduction <add>, %49, %cst_19 [2] : vector<4x32x32xf32> to vector<4x32xf32>
    %51 = vector.shape_cast %50 : vector<4x32xf32> to vector<4x32x1xf32>
    %52 = tpu.reciprocal %51 {approx = true} : vector<4x32x1xf32> -> vector<4x32x1xf32>
    %53 = vector.broadcast %52 : vector<4x32x1xf32> to vector<4x32x32xf32>
    %54 = arith.mulf %49, %53 : vector<4x32x32xf32>
    %55 = arith.truncf %54 : vector<4x32x32xf32> to vector<4x32x32xbf16>
    "tpu.trace_start"() <{level = 10 : i32, message = "bqk,bkd->bqd"}> : () -> ()
    %cst_20 = arith.constant dense<0.000000e+00> : vector<4x32x16xf32>
    %56 = tpu.matmul %55, %37, %cst_20 {dimension_numbers = #tpu.dot_dimension_numbers<[2], [1], [1], [2], [0, 0, 0, 1, 1, 2], [0], [0]>} : vector<4x32x32xbf16>, vector<4x32x16xbf16>, vector<4x32x16xf32> -> vector<4x32x16xf32>
    "tpu.trace_stop"() : () -> ()
    %57 = vector.shape_cast %56 : vector<4x32x16xf32> to vector<128x16xf32>
    %58 = arith.truncf %57 : vector<128x16xf32> to vector<128x16xbf16>
    %c0_21 = arith.constant 0 : index
    %c0_22 = arith.constant 0 : index
    %c0_23 = arith.constant 0 : index
    %59 = vector.load %arg5[%c0_21, %c0_22, %c0_23] : memref<2x16x32xbf16, #tpu.memory_space<vmem>>, vector<1x16x32xbf16>
    %60 = vector.shape_cast %59 : vector<1x16x32xbf16> to vector<16x32xbf16>
    %cst_24 = arith.constant dense<0.000000e+00> : vector<128x32xf32>
    %61 = tpu.matmul %58, %60, %cst_24 {dimension_numbers = #tpu.dot_dimension_numbers<[1], [0], [0], [1], [0, 0, 1, 1], [], []>} : vector<128x16xbf16>, vector<16x32xbf16>, vector<128x32xf32> -> vector<128x32xf32>
    %62 = vector.broadcast %28 : vector<1x32xf32> to vector<128x32xf32>
    %63 = arith.addf %62, %61 : vector<128x32xf32>
    %64 = vector.extract_strided_slice %27 {offsets = [0, 16], sizes = [128, 16], strides = [1, 1]} : vector<128x96xf32> to vector<128x16xf32>
    %65 = vector.extract_strided_slice %27 {offsets = [0, 48], sizes = [128, 16], strides = [1, 1]} : vector<128x96xf32> to vector<128x16xf32>
    %66 = vector.extract_strided_slice %27 {offsets = [0, 80], sizes = [128, 16], strides = [1, 1]} : vector<128x96xf32> to vector<128x16xf32>
    %67 = vector.shape_cast %64 : vector<128x16xf32> to vector<4x32x16xf32>
    %68 = arith.truncf %67 : vector<4x32x16xf32> to vector<4x32x16xbf16>
    %69 = vector.shape_cast %65 : vector<128x16xf32> to vector<4x32x16xf32>
    %70 = arith.truncf %69 : vector<4x32x16xf32> to vector<4x32x16xbf16>
    %71 = vector.shape_cast %66 : vector<128x16xf32> to vector<4x32x16xf32>
    %72 = arith.truncf %71 : vector<4x32x16xf32> to vector<4x32x16xbf16>
    "tpu.trace_start"() <{level = 10 : i32, message = "bqd,bkd->bqk"}> : () -> ()
    %cst_25 = arith.constant dense<0.000000e+00> : vector<4x32x32xf32>
    %73 = tpu.matmul %68, %70, %cst_25 {dimension_numbers = #tpu.dot_dimension_numbers<[2], [2], [1], [1], [0, 0, 0, 1, 1, 1], [0], [0]>} : vector<4x32x16xbf16>, vector<4x32x16xbf16>, vector<4x32x32xf32> -> vector<4x32x32xf32>
    "tpu.trace_stop"() : () -> ()
    %c1 = arith.constant 1 : index
    %c0_26 = arith.constant 0 : index
    %c0_27 = arith.constant 0 : index
    %74 = vector.load %arg4[%c1, %c0_26, %c0_27] : memref<2x32x32xbf16, #tpu.memory_space<vmem>>, vector<1x32x32xbf16>
    %75 = vector.shape_cast %74 : vector<1x32x32xbf16> to vector<32x32xbf16>
    %76 = arith.extf %75 : vector<32x32xbf16> to vector<32x32xf32>
    %77 = vector.shape_cast %76 : vector<32x32xf32> to vector<1x32x32xf32>
    %78 = vector.broadcast %77 : vector<1x32x32xf32> to vector<4x32x32xf32>
    %79 = arith.addf %73, %78 : vector<4x32x32xf32>
    %cst_28 = arith.constant dense<0xFF800000> : vector<4x32xf32>
    %80 = vector.multi_reduction <maximumf>, %79, %cst_28 [2] : vector<4x32x32xf32> to vector<4x32xf32>
    %81 = vector.shape_cast %80 : vector<4x32xf32> to vector<4x32x1xf32>
    %82 = vector.broadcast %81 : vector<4x32x1xf32> to vector<4x32x32xf32>
    %83 = arith.subf %79, %82 : vector<4x32x32xf32>
    %84 = math.exp %83 : vector<4x32x32xf32>
    %cst_29 = arith.constant dense<0.000000e+00> : vector<4x32xf32>
    %85 = vector.multi_reduction <add>, %84, %cst_29 [2] : vector<4x32x32xf32> to vector<4x32xf32>
    %86 = vector.shape_cast %85 : vector<4x32xf32> to vector<4x32x1xf32>
    %87 = tpu.reciprocal %86 {approx = true} : vector<4x32x1xf32> -> vector<4x32x1xf32>
    %88 = vector.broadcast %87 : vector<4x32x1xf32> to vector<4x32x32xf32>
    %89 = arith.mulf %84, %88 : vector<4x32x32xf32>
    %90 = arith.truncf %89 : vector<4x32x32xf32> to vector<4x32x32xbf16>
    "tpu.trace_start"() <{level = 10 : i32, message = "bqk,bkd->bqd"}> : () -> ()
    %cst_30 = arith.constant dense<0.000000e+00> : vector<4x32x16xf32>
    %91 = tpu.matmul %90, %72, %cst_30 {dimension_numbers = #tpu.dot_dimension_numbers<[2], [1], [1], [2], [0, 0, 0, 1, 1, 2], [0], [0]>} : vector<4x32x32xbf16>, vector<4x32x16xbf16>, vector<4x32x16xf32> -> vector<4x32x16xf32>
    "tpu.trace_stop"() : () -> ()
    %92 = vector.shape_cast %91 : vector<4x32x16xf32> to vector<128x16xf32>
    %93 = arith.truncf %92 : vector<128x16xf32> to vector<128x16xbf16>
    %c1_31 = arith.constant 1 : index
    %c0_32 = arith.constant 0 : index
    %c0_33 = arith.constant 0 : index
    %94 = vector.load %arg5[%c1_31, %c0_32, %c0_33] : memref<2x16x32xbf16, #tpu.memory_space<vmem>>, vector<1x16x32xbf16>
    %95 = vector.shape_cast %94 : vector<1x16x32xbf16> to vector<16x32xbf16>
    %cst_34 = arith.constant dense<0.000000e+00> : vector<128x32xf32>
    %96 = tpu.matmul %93, %95, %cst_34 {dimension_numbers = #tpu.dot_dimension_numbers<[1], [0], [0], [1], [0, 0, 1, 1], [], []>} : vector<128x16xbf16>, vector<16x32xbf16>, vector<128x32xf32> -> vector<128x32xf32>
    %97 = arith.addf %63, %96 : vector<128x32xf32>
    %98 = arith.truncf %0 : vector<128x3xf32> to vector<128x3xbf16>
    %c0_35 = arith.constant 0 : index
    %c0_36 = arith.constant 0 : index
    %99 = vector.load %arg7[%c0_35, %c0_36] : memref<3x32xbf16, #tpu.memory_space<vmem>>, vector<3x32xbf16>
    %cst_37 = arith.constant dense<0.000000e+00> : vector<128x32xf32>
    %100 = tpu.matmul %98, %99, %cst_37 {dimension_numbers = #tpu.dot_dimension_numbers<[1], [0], [0], [1], [0, 0, 1, 1], [], []>} : vector<128x3xbf16>, vector<3x32xbf16>, vector<128x32xf32> -> vector<128x32xf32>
    %101 = arith.addf %100, %97 : vector<128x32xf32>
    %c0_38 = arith.constant 0 : index
    %c0_39 = arith.constant 0 : index
    %102 = vector.load %arg8[%c0_38, %c0_39] : memref<1x32xf32, #tpu.memory_space<vmem>>, vector<1x32xf32>
    %c0_40 = arith.constant 0 : index
    %c0_41 = arith.constant 0 : index
    %103 = vector.load %arg9[%c0_40, %c0_41] : memref<1x32xf32, #tpu.memory_space<vmem>>, vector<1x32xf32>
    %cst_42 = arith.constant dense<0.000000e+00> : vector<128xf32>
    %104 = vector.multi_reduction <add>, %101, %cst_42 [1] : vector<128x32xf32> to vector<128xf32>
    %105 = vector.shape_cast %104 : vector<128xf32> to vector<128x1xf32>
    %cst_43 = arith.constant 3.200000e+01 : f32
    %106 = vector.broadcast %cst_43 : f32 to vector<128x1xf32>
    %107 = arith.divf %105, %106 : vector<128x1xf32>
    %108 = vector.broadcast %107 : vector<128x1xf32> to vector<128x32xf32>
    %109 = arith.subf %101, %108 : vector<128x32xf32>
    %110 = arith.mulf %109, %109 : vector<128x32xf32>
    %cst_44 = arith.constant dense<0.000000e+00> : vector<128xf32>
    %111 = vector.multi_reduction <add>, %110, %cst_44 [1] : vector<128x32xf32> to vector<128xf32>
    %112 = vector.shape_cast %111 : vector<128xf32> to vector<128x1xf32>
    %cst_45 = arith.constant 3.200000e+01 : f32
    %113 = vector.broadcast %cst_45 : f32 to vector<128x1xf32>
    %114 = arith.divf %112, %113 : vector<128x1xf32>
    %115 = vector.broadcast %107 : vector<128x1xf32> to vector<128x32xf32>
    %116 = arith.subf %101, %115 : vector<128x32xf32>
    %cst_46 = arith.constant 9.99999974E-6 : f32
    %117 = vector.broadcast %cst_46 : f32 to vector<128x1xf32>
    %118 = arith.addf %114, %117 : vector<128x1xf32>
    %119 = math.rsqrt %118 : vector<128x1xf32>
    %120 = vector.broadcast %119 : vector<128x1xf32> to vector<128x32xf32>
    %121 = arith.mulf %116, %120 : vector<128x32xf32>
    %122 = vector.broadcast %102 : vector<1x32xf32> to vector<128x32xf32>
    %123 = arith.mulf %121, %122 : vector<128x32xf32>
    %124 = vector.broadcast %103 : vector<1x32xf32> to vector<128x32xf32>
    %125 = arith.addf %123, %124 : vector<128x32xf32>
    %126 = arith.truncf %125 : vector<128x32xf32> to vector<128x32xbf16>
    %c0_47 = arith.constant 0 : index
    %c0_48 = arith.constant 0 : index
    %127 = vector.load %arg10[%c0_47, %c0_48] : memref<32x128xbf16, #tpu.memory_space<vmem>>, vector<32x128xbf16>
    %cst_49 = arith.constant dense<0.000000e+00> : vector<128x128xf32>
    %128 = tpu.matmul %126, %127, %cst_49 {dimension_numbers = #tpu.dot_dimension_numbers<[1], [0], [0], [1], [0, 0, 1, 1], [], []>} : vector<128x32xbf16>, vector<32x128xbf16>, vector<128x128xf32> -> vector<128x128xf32>
    %c0_50 = arith.constant 0 : index
    %c0_51 = arith.constant 0 : index
    %129 = vector.load %arg11[%c0_50, %c0_51] : memref<1x128xf32, #tpu.memory_space<vmem>>, vector<1x128xf32>
    %130 = vector.broadcast %129 : vector<1x128xf32> to vector<128x128xf32>
    %131 = arith.addf %128, %130 : vector<128x128xf32>
    %cst_52 = arith.constant 5.000000e-01 : f32
    %132 = vector.broadcast %cst_52 : f32 to vector<128x128xf32>
    %133 = arith.mulf %132, %131 : vector<128x128xf32>
    %cst_53 = arith.constant 4.471500e-02 : f32
    %134 = vector.broadcast %cst_53 : f32 to vector<128x128xf32>
    %135 = arith.mulf %134, %131 : vector<128x128xf32>
    %136 = arith.mulf %135, %131 : vector<128x128xf32>
    %137 = arith.mulf %136, %131 : vector<128x128xf32>
    %138 = arith.addf %131, %137 : vector<128x128xf32>
    %cst_54 = arith.constant 0.797884583 : f32
    %139 = vector.broadcast %cst_54 : f32 to vector<128x128xf32>
    %140 = arith.mulf %139, %138 : vector<128x128xf32>
    %141 = math.tanh %140 : vector<128x128xf32>
    %cst_55 = arith.constant 1.000000e+00 : f32
    %142 = vector.broadcast %cst_55 : f32 to vector<128x128xf32>
    %143 = arith.addf %142, %141 : vector<128x128xf32>
    %144 = arith.mulf %133, %143 : vector<128x128xf32>
    %145 = arith.truncf %144 : vector<128x128xf32> to vector<128x128xbf16>
    %c0_56 = arith.constant 0 : index
    %c0_57 = arith.constant 0 : index
    %146 = vector.load %arg12[%c0_56, %c0_57] : memref<128x32xbf16, #tpu.memory_space<vmem>>, vector<128x32xbf16>
    %cst_58 = arith.constant dense<0.000000e+00> : vector<128x32xf32>
    %147 = tpu.matmul %145, %146, %cst_58 {dimension_numbers = #tpu.dot_dimension_numbers<[1], [0], [0], [1], [0, 0, 1, 1], [], []>} : vector<128x128xbf16>, vector<128x32xbf16>, vector<128x32xf32> -> vector<128x32xf32>
    %c0_59 = arith.constant 0 : index
    %c0_60 = arith.constant 0 : index
    %148 = vector.load %arg13[%c0_59, %c0_60] : memref<1x32xf32, #tpu.memory_space<vmem>>, vector<1x32xf32>
    %149 = vector.broadcast %148 : vector<1x32xf32> to vector<128x32xf32>
    %150 = arith.addf %147, %149 : vector<128x32xf32>
    %151 = arith.addf %101, %150 : vector<128x32xf32>
    %c0_61 = arith.constant 0 : index
    %c0_62 = arith.constant 0 : index
    %152 = vector.load %arg14[%c0_61, %c0_62] : memref<1x32xf32, #tpu.memory_space<vmem>>, vector<1x32xf32>
    %c0_63 = arith.constant 0 : index
    %c0_64 = arith.constant 0 : index
    %153 = vector.load %arg15[%c0_63, %c0_64] : memref<1x32xf32, #tpu.memory_space<vmem>>, vector<1x32xf32>
    %cst_65 = arith.constant dense<0.000000e+00> : vector<128xf32>
    %154 = vector.multi_reduction <add>, %151, %cst_65 [1] : vector<128x32xf32> to vector<128xf32>
    %155 = vector.shape_cast %154 : vector<128xf32> to vector<128x1xf32>
    %cst_66 = arith.constant 3.200000e+01 : f32
    %156 = vector.broadcast %cst_66 : f32 to vector<128x1xf32>
    %157 = arith.divf %155, %156 : vector<128x1xf32>
    %158 = vector.broadcast %157 : vector<128x1xf32> to vector<128x32xf32>
    %159 = arith.subf %151, %158 : vector<128x32xf32>
    %160 = arith.mulf %159, %159 : vector<128x32xf32>
    %cst_67 = arith.constant dense<0.000000e+00> : vector<128xf32>
    %161 = vector.multi_reduction <add>, %160, %cst_67 [1] : vector<128x32xf32> to vector<128xf32>
    %162 = vector.shape_cast %161 : vector<128xf32> to vector<128x1xf32>
    %cst_68 = arith.constant 3.200000e+01 : f32
    %163 = vector.broadcast %cst_68 : f32 to vector<128x1xf32>
    %164 = arith.divf %162, %163 : vector<128x1xf32>
    %165 = vector.broadcast %157 : vector<128x1xf32> to vector<128x32xf32>
    %166 = arith.subf %151, %165 : vector<128x32xf32>
    %cst_69 = arith.constant 9.99999974E-6 : f32
    %167 = vector.broadcast %cst_69 : f32 to vector<128x1xf32>
    %168 = arith.addf %164, %167 : vector<128x1xf32>
    %169 = math.rsqrt %168 : vector<128x1xf32>
    %170 = vector.broadcast %169 : vector<128x1xf32> to vector<128x32xf32>
    %171 = arith.mulf %166, %170 : vector<128x32xf32>
    %172 = vector.broadcast %152 : vector<1x32xf32> to vector<128x32xf32>
    %173 = arith.mulf %171, %172 : vector<128x32xf32>
    %174 = vector.broadcast %153 : vector<1x32xf32> to vector<128x32xf32>
    %175 = arith.addf %173, %174 : vector<128x32xf32>
    %176 = arith.truncf %175 : vector<128x32xf32> to vector<128x32xbf16>
    %c0_70 = arith.constant 0 : index
    %c0_71 = arith.constant 0 : index
    %177 = vector.load %arg16[%c0_70, %c0_71] : memref<32x96xbf16, #tpu.memory_space<vmem>>, vector<32x96xbf16>
    %cst_72 = arith.constant dense<0.000000e+00> : vector<128x96xf32>
    %178 = tpu.matmul %176, %177, %cst_72 {dimension_numbers = #tpu.dot_dimension_numbers<[1], [0], [0], [1], [0, 0, 1, 1], [], []>} : vector<128x32xbf16>, vector<32x96xbf16>, vector<128x96xf32> -> vector<128x96xf32>
    %c0_73 = arith.constant 0 : index
    %c0_74 = arith.constant 0 : index
    %179 = vector.load %arg19[%c0_73, %c0_74] : memref<1x32xf32, #tpu.memory_space<vmem>>, vector<1x32xf32>
    %180 = vector.extract_strided_slice %178 {offsets = [0, 0], sizes = [128, 16], strides = [1, 1]} : vector<128x96xf32> to vector<128x16xf32>
    %181 = vector.extract_strided_slice %178 {offsets = [0, 32], sizes = [128, 16], strides = [1, 1]} : vector<128x96xf32> to vector<128x16xf32>
    %182 = vector.extract_strided_slice %178 {offsets = [0, 64], sizes = [128, 16], strides = [1, 1]} : vector<128x96xf32> to vector<128x16xf32>
    %183 = vector.shape_cast %180 : vector<128x16xf32> to vector<4x32x16xf32>
    %184 = arith.truncf %183 : vector<4x32x16xf32> to vector<4x32x16xbf16>
    %185 = vector.shape_cast %181 : vector<128x16xf32> to vector<4x32x16xf32>
    %186 = arith.truncf %185 : vector<4x32x16xf32> to vector<4x32x16xbf16>
    %187 = vector.shape_cast %182 : vector<128x16xf32> to vector<4x32x16xf32>
    %188 = arith.truncf %187 : vector<4x32x16xf32> to vector<4x32x16xbf16>
    "tpu.trace_start"() <{level = 10 : i32, message = "bqd,bkd->bqk"}> : () -> ()
    %cst_75 = arith.constant dense<0.000000e+00> : vector<4x32x32xf32>
    %189 = tpu.matmul %184, %186, %cst_75 {dimension_numbers = #tpu.dot_dimension_numbers<[2], [2], [1], [1], [0, 0, 0, 1, 1, 1], [0], [0]>} : vector<4x32x16xbf16>, vector<4x32x16xbf16>, vector<4x32x32xf32> -> vector<4x32x32xf32>
    "tpu.trace_stop"() : () -> ()
    %c0_76 = arith.constant 0 : index
    %c0_77 = arith.constant 0 : index
    %c0_78 = arith.constant 0 : index
    %190 = vector.load %arg17[%c0_76, %c0_77, %c0_78] : memref<2x32x32xbf16, #tpu.memory_space<vmem>>, vector<1x32x32xbf16>
    %191 = vector.shape_cast %190 : vector<1x32x32xbf16> to vector<32x32xbf16>
    %192 = arith.extf %191 : vector<32x32xbf16> to vector<32x32xf32>
    %193 = vector.shape_cast %192 : vector<32x32xf32> to vector<1x32x32xf32>
    %194 = vector.broadcast %193 : vector<1x32x32xf32> to vector<4x32x32xf32>
    %195 = arith.addf %189, %194 : vector<4x32x32xf32>
    %cst_79 = arith.constant dense<0xFF800000> : vector<4x32xf32>
    %196 = vector.multi_reduction <maximumf>, %195, %cst_79 [2] : vector<4x32x32xf32> to vector<4x32xf32>
    %197 = vector.shape_cast %196 : vector<4x32xf32> to vector<4x32x1xf32>
    %198 = vector.broadcast %197 : vector<4x32x1xf32> to vector<4x32x32xf32>
    %199 = arith.subf %195, %198 : vector<4x32x32xf32>
    %200 = math.exp %199 : vector<4x32x32xf32>
    %cst_80 = arith.constant dense<0.000000e+00> : vector<4x32xf32>
    %201 = vector.multi_reduction <add>, %200, %cst_80 [2] : vector<4x32x32xf32> to vector<4x32xf32>
    %202 = vector.shape_cast %201 : vector<4x32xf32> to vector<4x32x1xf32>
    %203 = tpu.reciprocal %202 {approx = true} : vector<4x32x1xf32> -> vector<4x32x1xf32>
    %204 = vector.broadcast %203 : vector<4x32x1xf32> to vector<4x32x32xf32>
    %205 = arith.mulf %200, %204 : vector<4x32x32xf32>
    %206 = arith.truncf %205 : vector<4x32x32xf32> to vector<4x32x32xbf16>
    "tpu.trace_start"() <{level = 10 : i32, message = "bqk,bkd->bqd"}> : () -> ()
    %cst_81 = arith.constant dense<0.000000e+00> : vector<4x32x16xf32>
    %207 = tpu.matmul %206, %188, %cst_81 {dimension_numbers = #tpu.dot_dimension_numbers<[2], [1], [1], [2], [0, 0, 0, 1, 1, 2], [0], [0]>} : vector<4x32x32xbf16>, vector<4x32x16xbf16>, vector<4x32x16xf32> -> vector<4x32x16xf32>
    "tpu.trace_stop"() : () -> ()
    %208 = vector.shape_cast %207 : vector<4x32x16xf32> to vector<128x16xf32>
    %209 = arith.truncf %208 : vector<128x16xf32> to vector<128x16xbf16>
    %c0_82 = arith.constant 0 : index
    %c0_83 = arith.constant 0 : index
    %c0_84 = arith.constant 0 : index
    %210 = vector.load %arg18[%c0_82, %c0_83, %c0_84] : memref<2x16x32xbf16, #tpu.memory_space<vmem>>, vector<1x16x32xbf16>
    %211 = vector.shape_cast %210 : vector<1x16x32xbf16> to vector<16x32xbf16>
    %cst_85 = arith.constant dense<0.000000e+00> : vector<128x32xf32>
    %212 = tpu.matmul %209, %211, %cst_85 {dimension_numbers = #tpu.dot_dimension_numbers<[1], [0], [0], [1], [0, 0, 1, 1], [], []>} : vector<128x16xbf16>, vector<16x32xbf16>, vector<128x32xf32> -> vector<128x32xf32>
    %213 = vector.broadcast %179 : vector<1x32xf32> to vector<128x32xf32>
    %214 = arith.addf %213, %212 : vector<128x32xf32>
    %215 = vector.extract_strided_slice %178 {offsets = [0, 16], sizes = [128, 16], strides = [1, 1]} : vector<128x96xf32> to vector<128x16xf32>
    %216 = vector.extract_strided_slice %178 {offsets = [0, 48], sizes = [128, 16], strides = [1, 1]} : vector<128x96xf32> to vector<128x16xf32>
    %217 = vector.extract_strided_slice %178 {offsets = [0, 80], sizes = [128, 16], strides = [1, 1]} : vector<128x96xf32> to vector<128x16xf32>
    %218 = vector.shape_cast %215 : vector<128x16xf32> to vector<4x32x16xf32>
    %219 = arith.truncf %218 : vector<4x32x16xf32> to vector<4x32x16xbf16>
    %220 = vector.shape_cast %216 : vector<128x16xf32> to vector<4x32x16xf32>
    %221 = arith.truncf %220 : vector<4x32x16xf32> to vector<4x32x16xbf16>
    %222 = vector.shape_cast %217 : vector<128x16xf32> to vector<4x32x16xf32>
    %223 = arith.truncf %222 : vector<4x32x16xf32> to vector<4x32x16xbf16>
    "tpu.trace_start"() <{level = 10 : i32, message = "bqd,bkd->bqk"}> : () -> ()
    %cst_86 = arith.constant dense<0.000000e+00> : vector<4x32x32xf32>
    %224 = tpu.matmul %219, %221, %cst_86 {dimension_numbers = #tpu.dot_dimension_numbers<[2], [2], [1], [1], [0, 0, 0, 1, 1, 1], [0], [0]>} : vector<4x32x16xbf16>, vector<4x32x16xbf16>, vector<4x32x32xf32> -> vector<4x32x32xf32>
    "tpu.trace_stop"() : () -> ()
    %c1_87 = arith.constant 1 : index
    %c0_88 = arith.constant 0 : index
    %c0_89 = arith.constant 0 : index
    %225 = vector.load %arg17[%c1_87, %c0_88, %c0_89] : memref<2x32x32xbf16, #tpu.memory_space<vmem>>, vector<1x32x32xbf16>
    %226 = vector.shape_cast %225 : vector<1x32x32xbf16> to vector<32x32xbf16>
    %227 = arith.extf %226 : vector<32x32xbf16> to vector<32x32xf32>
    %228 = vector.shape_cast %227 : vector<32x32xf32> to vector<1x32x32xf32>
    %229 = vector.broadcast %228 : vector<1x32x32xf32> to vector<4x32x32xf32>
    %230 = arith.addf %224, %229 : vector<4x32x32xf32>
    %cst_90 = arith.constant dense<0xFF800000> : vector<4x32xf32>
    %231 = vector.multi_reduction <maximumf>, %230, %cst_90 [2] : vector<4x32x32xf32> to vector<4x32xf32>
    %232 = vector.shape_cast %231 : vector<4x32xf32> to vector<4x32x1xf32>
    %233 = vector.broadcast %232 : vector<4x32x1xf32> to vector<4x32x32xf32>
    %234 = arith.subf %230, %233 : vector<4x32x32xf32>
    %235 = math.exp %234 : vector<4x32x32xf32>
    %cst_91 = arith.constant dense<0.000000e+00> : vector<4x32xf32>
    %236 = vector.multi_reduction <add>, %235, %cst_91 [2] : vector<4x32x32xf32> to vector<4x32xf32>
    %237 = vector.shape_cast %236 : vector<4x32xf32> to vector<4x32x1xf32>
    %238 = tpu.reciprocal %237 {approx = true} : vector<4x32x1xf32> -> vector<4x32x1xf32>
    %239 = vector.broadcast %238 : vector<4x32x1xf32> to vector<4x32x32xf32>
    %240 = arith.mulf %235, %239 : vector<4x32x32xf32>
    %241 = arith.truncf %240 : vector<4x32x32xf32> to vector<4x32x32xbf16>
    "tpu.trace_start"() <{level = 10 : i32, message = "bqk,bkd->bqd"}> : () -> ()
    %cst_92 = arith.constant dense<0.000000e+00> : vector<4x32x16xf32>
    %242 = tpu.matmul %241, %223, %cst_92 {dimension_numbers = #tpu.dot_dimension_numbers<[2], [1], [1], [2], [0, 0, 0, 1, 1, 2], [0], [0]>} : vector<4x32x32xbf16>, vector<4x32x16xbf16>, vector<4x32x16xf32> -> vector<4x32x16xf32>
    "tpu.trace_stop"() : () -> ()
    %243 = vector.shape_cast %242 : vector<4x32x16xf32> to vector<128x16xf32>
    %244 = arith.truncf %243 : vector<128x16xf32> to vector<128x16xbf16>
    %c1_93 = arith.constant 1 : index
    %c0_94 = arith.constant 0 : index
    %c0_95 = arith.constant 0 : index
    %245 = vector.load %arg18[%c1_93, %c0_94, %c0_95] : memref<2x16x32xbf16, #tpu.memory_space<vmem>>, vector<1x16x32xbf16>
    %246 = vector.shape_cast %245 : vector<1x16x32xbf16> to vector<16x32xbf16>
    %cst_96 = arith.constant dense<0.000000e+00> : vector<128x32xf32>
    %247 = tpu.matmul %244, %246, %cst_96 {dimension_numbers = #tpu.dot_dimension_numbers<[1], [0], [0], [1], [0, 0, 1, 1], [], []>} : vector<128x16xbf16>, vector<16x32xbf16>, vector<128x32xf32> -> vector<128x32xf32>
    %248 = arith.addf %214, %247 : vector<128x32xf32>
    %249 = arith.addf %151, %248 : vector<128x32xf32>
    %c0_97 = arith.constant 0 : index
    %c0_98 = arith.constant 0 : index
    %250 = vector.load %arg20[%c0_97, %c0_98] : memref<1x32xf32, #tpu.memory_space<vmem>>, vector<1x32xf32>
    %c0_99 = arith.constant 0 : index
    %c0_100 = arith.constant 0 : index
    %251 = vector.load %arg21[%c0_99, %c0_100] : memref<1x32xf32, #tpu.memory_space<vmem>>, vector<1x32xf32>
    %cst_101 = arith.constant dense<0.000000e+00> : vector<128xf32>
    %252 = vector.multi_reduction <add>, %249, %cst_101 [1] : vector<128x32xf32> to vector<128xf32>
    %253 = vector.shape_cast %252 : vector<128xf32> to vector<128x1xf32>
    %cst_102 = arith.constant 3.200000e+01 : f32
    %254 = vector.broadcast %cst_102 : f32 to vector<128x1xf32>
    %255 = arith.divf %253, %254 : vector<128x1xf32>
    %256 = vector.broadcast %255 : vector<128x1xf32> to vector<128x32xf32>
    %257 = arith.subf %249, %256 : vector<128x32xf32>
    %258 = arith.mulf %257, %257 : vector<128x32xf32>
    %cst_103 = arith.constant dense<0.000000e+00> : vector<128xf32>
    %259 = vector.multi_reduction <add>, %258, %cst_103 [1] : vector<128x32xf32> to vector<128xf32>
    %260 = vector.shape_cast %259 : vector<128xf32> to vector<128x1xf32>
    %cst_104 = arith.constant 3.200000e+01 : f32
    %261 = vector.broadcast %cst_104 : f32 to vector<128x1xf32>
    %262 = arith.divf %260, %261 : vector<128x1xf32>
    %263 = vector.broadcast %255 : vector<128x1xf32> to vector<128x32xf32>
    %264 = arith.subf %249, %263 : vector<128x32xf32>
    %cst_105 = arith.constant 9.99999974E-6 : f32
    %265 = vector.broadcast %cst_105 : f32 to vector<128x1xf32>
    %266 = arith.addf %262, %265 : vector<128x1xf32>
    %267 = math.rsqrt %266 : vector<128x1xf32>
    %268 = vector.broadcast %267 : vector<128x1xf32> to vector<128x32xf32>
    %269 = arith.mulf %264, %268 : vector<128x32xf32>
    %270 = vector.broadcast %250 : vector<1x32xf32> to vector<128x32xf32>
    %271 = arith.mulf %269, %270 : vector<128x32xf32>
    %272 = vector.broadcast %251 : vector<1x32xf32> to vector<128x32xf32>
    %273 = arith.addf %271, %272 : vector<128x32xf32>
    %274 = arith.truncf %273 : vector<128x32xf32> to vector<128x32xbf16>
    %c0_106 = arith.constant 0 : index
    %c0_107 = arith.constant 0 : index
    %275 = vector.load %arg22[%c0_106, %c0_107] : memref<32x128xbf16, #tpu.memory_space<vmem>>, vector<32x128xbf16>
    %cst_108 = arith.constant dense<0.000000e+00> : vector<128x128xf32>
    %276 = tpu.matmul %274, %275, %cst_108 {dimension_numbers = #tpu.dot_dimension_numbers<[1], [0], [0], [1], [0, 0, 1, 1], [], []>} : vector<128x32xbf16>, vector<32x128xbf16>, vector<128x128xf32> -> vector<128x128xf32>
    %c0_109 = arith.constant 0 : index
    %c0_110 = arith.constant 0 : index
    %277 = vector.load %arg23[%c0_109, %c0_110] : memref<1x128xf32, #tpu.memory_space<vmem>>, vector<1x128xf32>
    %278 = vector.broadcast %277 : vector<1x128xf32> to vector<128x128xf32>
    %279 = arith.addf %276, %278 : vector<128x128xf32>
    %cst_111 = arith.constant 5.000000e-01 : f32
    %280 = vector.broadcast %cst_111 : f32 to vector<128x128xf32>
    %281 = arith.mulf %280, %279 : vector<128x128xf32>
    %cst_112 = arith.constant 4.471500e-02 : f32
    %282 = vector.broadcast %cst_112 : f32 to vector<128x128xf32>
    %283 = arith.mulf %282, %279 : vector<128x128xf32>
    %284 = arith.mulf %283, %279 : vector<128x128xf32>
    %285 = arith.mulf %284, %279 : vector<128x128xf32>
    %286 = arith.addf %279, %285 : vector<128x128xf32>
    %cst_113 = arith.constant 0.797884583 : f32
    %287 = vector.broadcast %cst_113 : f32 to vector<128x128xf32>
    %288 = arith.mulf %287, %286 : vector<128x128xf32>
    %289 = math.tanh %288 : vector<128x128xf32>
    %cst_114 = arith.constant 1.000000e+00 : f32
    %290 = vector.broadcast %cst_114 : f32 to vector<128x128xf32>
    %291 = arith.addf %290, %289 : vector<128x128xf32>
    %292 = arith.mulf %281, %291 : vector<128x128xf32>
    %293 = arith.truncf %292 : vector<128x128xf32> to vector<128x128xbf16>
    %c0_115 = arith.constant 0 : index
    %c0_116 = arith.constant 0 : index
    %294 = vector.load %arg24[%c0_115, %c0_116] : memref<128x32xbf16, #tpu.memory_space<vmem>>, vector<128x32xbf16>
    %cst_117 = arith.constant dense<0.000000e+00> : vector<128x32xf32>
    %295 = tpu.matmul %293, %294, %cst_117 {dimension_numbers = #tpu.dot_dimension_numbers<[1], [0], [0], [1], [0, 0, 1, 1], [], []>} : vector<128x128xbf16>, vector<128x32xbf16>, vector<128x32xf32> -> vector<128x32xf32>
    %c0_118 = arith.constant 0 : index
    %c0_119 = arith.constant 0 : index
    %296 = vector.load %arg25[%c0_118, %c0_119] : memref<1x32xf32, #tpu.memory_space<vmem>>, vector<1x32xf32>
    %297 = vector.broadcast %296 : vector<1x32xf32> to vector<128x32xf32>
    %298 = arith.addf %295, %297 : vector<128x32xf32>
    %299 = arith.addf %249, %298 : vector<128x32xf32>
    %300 = vector.shape_cast %299 : vector<128x32xf32> to vector<2x64x32xf32>
    %cst_120 = arith.constant dense<0.000000e+00> : vector<2x32xf32>
    %301 = vector.multi_reduction <add>, %300, %cst_120 [1] : vector<2x64x32xf32> to vector<2x32xf32>
    %cst_121 = arith.constant 6.400000e+01 : f32
    %302 = vector.broadcast %cst_121 : f32 to vector<2x32xf32>
    %303 = arith.divf %301, %302 : vector<2x32xf32>
    %c0_122 = arith.constant 0 : index
    %c0_123 = arith.constant 0 : index
    %304 = vector.load %arg26[%c0_122, %c0_123] : memref<32x10xf32, #tpu.memory_space<vmem>>, vector<32x10xf32>
    %cst_124 = arith.constant dense<0.000000e+00> : vector<2x10xf32>
    %305 = tpu.matmul %303, %304, %cst_124 {dimension_numbers = #tpu.dot_dimension_numbers<[1], [0], [0], [1], [0, 0, 1, 1], [], []>} : vector<2x32xf32>, vector<32x10xf32>, vector<2x10xf32> -> vector<2x10xf32>
    %c0_125 = arith.constant 0 : index
    %c0_126 = arith.constant 0 : index
    %306 = vector.load %arg27[%c0_125, %c0_126] : memref<1x10xf32, #tpu.memory_space<vmem>>, vector<1x10xf32>
    %307 = vector.broadcast %306 : vector<1x10xf32> to vector<2x10xf32>
    %308 = arith.addf %305, %307 : vector<2x10xf32>
    %c0_127 = arith.constant 0 : index
    %c0_128 = arith.constant 0 : index
    %309 = vector.load %arg28[%c0_127, %c0_128] : memref<2x10xf32, #tpu.memory_space<vmem>>, vector<2x10xf32>
    tpu.vector_store %arg28[%c0_127, %c0_128], %308 {strides = array<i32>} : memref<2x10xf32, #tpu.memory_space<vmem>>, vector<2x10xf32>,
    return
  }
}

</mosaic_0001>

<bundles_post_ra>
// kernel: coupledformer_forward.1
= control target key start
LH: loop header
LB: loop body
LE: loop exit
PB: predicated region body
PF: predicated region fallthrough
CT: control target
= control target key end

     0   :  { %s10400_s0 = inlined_call_operand.vmem [shape: f32[128,3], index: 0, kind: input, shape index: {}]   ;;  %s10401_s1 = inlined_call_operand.vmem [shape: f32[1,3], index: 1, kind: input, shape index: {}]   ;;  %s10402_s2 = inlined_call_operand.vmem [shape: f32[1,3], index: 2, kind: input, shape index: {}]   ;;  %s10403_s3 = inlined_call_operand.vmem [shape: bf16[3,96], index: 3, kind: input, shape index: {}]   ;;  %s10404_s4 = inlined_call_operand.vmem [shape: bf16[2,32,32], index: 4, kind: input, shape index: {}]   ;;  %s10405_s5 = inlined_call_operand.vmem [shape: bf16[2,16,32], index: 5, kind: input, shape index: {}]   ;;  %s10406_s6 = inlined_call_operand.vmem [shape: f32[1,32], index: 6, kind: input, shape index: {}]   ;;  %s10407_s7 = inlined_call_operand.vmem [shape: bf16[3,32], index: 7, kind: input, shape index: {}]   ;;  %s10408_s8 = inlined_call_operand.vmem [shape: f32[1,32], index: 8, kind: input, shape index: {}]   ;;  %s10409_s9 = inlined_call_operand.vmem [shape: f32[1,32], index: 9, kind: input, shape index: {}]   ;;  %s10410_s10 = inlined_call_operand.vmem [shape: bf16[32,128], index: 10, kind: input, shape index: {}]   ;;  %s10411_s11 = inlined_call_operand.vmem [shape: f32[1,128], index: 11, kind: input, shape index: {}]   ;;  %s10412_s12 = inlined_call_operand.vmem [shape: bf16[128,32], index: 12, kind: input, shape index: {}]   ;;  %s10413_s13 = inlined_call_operand.vmem [shape: f32[1,32], index: 13, kind: input, shape index: {}]   ;;  %s10414_s14 = inlined_call_operand.vmem [shape: f32[1,32], index: 14, kind: input, shape index: {}]   ;;  %s10415_s15 = inlined_call_operand.vmem [shape: f32[1,32], index: 15, kind: input, shape index: {}]   ;;  %s10416_s16 = inlined_call_operand.vmem [shape: bf16[32,96], index: 16, kind: input, shape index: {}]   ;;  %s10417_s17 = inlined_call_operand.vmem [shape: bf16[2,32,32], index: 17, kind: input, shape index: {}]   ;;  %s10418_s18 = inlined_call_operand.vmem [shape: bf16[2,16,32], index: 18, kind: input, shape index: {}]   ;;  %s10419_s19 = inlined_call_operand.vmem [shape: f32[1,32], index: 19, kind: input, shape index: {}]   ;;  %s10420_s20 = inlined_call_operand.vmem [shape: f32[1,32], index: 20, kind: input, shape index: {}]   ;;  %s10421_s21 = inlined_call_operand.vmem [shape: f32[1,32], index: 21, kind: input, shape index: {}]   ;;  %s10422_s22 = inlined_call_operand.vmem [shape: bf16[32,128], index: 22, kind: input, shape index: {}]   ;;  %s10423_s23 = inlined_call_operand.vmem [shape: f32[1,128], index: 23, kind: input, shape index: {}]   ;;  %s10424_s24 = inlined_call_operand.vmem [shape: bf16[128,32], index: 24, kind: input, shape index: {}]   ;;  %s10425_s25 = inlined_call_operand.vmem [shape: f32[1,32], index: 25, kind: input, shape index: {}]   ;;  %s10426_s26 = inlined_call_operand.vmem [shape: f32[32,10], index: 26, kind: input, shape index: {}]   ;;  %s10427_s27 = inlined_call_operand.vmem [shape: f32[1,10], index: 27, kind: input, shape index: {}]   ;;  %s10428_s28 = inlined_call_operand.hbm [shape: f32[2,10], index: 28, kind: output, shape index: {}]  }
   0x1   :  { %10440 = sst [smem:[#allocation11_spill]] %s10400_s0 }
   0x2   :  { %10441 = sst [smem:[#allocation12_spill]] %s10401_s1 }
   0x3   :  { %10442 = sst [smem:[#allocation13_spill]] %s10402_s2 }
   0x4   :  { %10443 = sst [smem:[#allocation14_spill]] %s10403_s3 }
   0x5   :  { %10444 = sst [smem:[#allocation15_spill]] %s10404_s4 }
   0x6   :  { %10445 = sst [smem:[#allocation16_spill]] %s10405_s5 }
   0x7   :  { %10446 = sst [smem:[#allocation17_spill]] %s10406_s6 }
   0x8   :  { %10447 = sst [smem:[#allocation18_spill]] %s10407_s7 }
   0x9   :  { %10448 = sst [smem:[#allocation19_spill]] %s10408_s8 }
   0xa   :  { %10449 = sst [smem:[#allocation20_spill]] %s10409_s9 }
   0xb   :  { %10450 = sst [smem:[#allocation21_spill]] %s10410_s10 }
   0xc   :  { %10451 = sst [smem:[#allocation22_spill]] %s10411_s11 }
   0xd   :  { %10452 = sst [smem:[#allocation23_spill]] %s10412_s12 }
   0xe   :  { %s10453_s9 = sld [smem:[#allocation11_spill]]  ;;  %vm109_vm0 = vcmask 23552  }
  0x14   :  { %v91_v0 = vld [vmem:[%s10453_s9] sm:$0xff]  ;;  %v93_v1 = vld [vmem:[%s10453_s9 + $0x10] sm:$0xff]  ;;  %v92_v2 = vld [vmem:[%s10453_s9 + $0x8] sm:$0xff] }
  0x15   :  { %v110_v3 = vsel %vm109_vm0, %v91_v0, 0.0  ;;  %v116_v4 = vsel %vm109_vm0, %v93_v1, 0.0  ;;  %v94_v5 = vld [vmem:[%s10453_s9 + $0x18] sm:$0xff]  ;;  %v7863_v6 = vld [vmem:[%s10453_s9 + $0x20] sm:$0xff]  ;;  %v7868_v7 = vld [vmem:[%s10453_s9 + $0x28] sm:$0xff]  ;;  %v113_v11 = vsel %vm109_vm0, %v92_v2, 0.0 }
  0x16   :  { %111 = vadd.xlane.f32.xlu0 %v110_v3  ;;  %117 = vadd.xlane.f32.xlu1 %v116_v4  ;;  %v7873_v8 = vld [vmem:[%s10453_s9 + $0x30] sm:$0xff]  ;;  %v7878_v9 = vld [vmem:[%s10453_s9 + $0x38] sm:$0xff]  ;;  %v7883_v10 = vld [vmem:[%s10453_s9 + $0x40] sm:$0xff]  ;;  %v119_v12 = vsel %vm109_vm0, %v94_v5, 0.0  ;;  %v122_v16 = vsel %vm109_vm0, %v7863_v6, 0.0  ;;  %v125_v17 = vsel %vm109_vm0, %v7868_v7, 0.0 }
  0x17   :  { %v7890_v13 = vld [vmem:[%s10453_s9 + $0x48] sm:$0xff]  ;;  %v7895_v14 = vld [vmem:[%s10453_s9 + $0x50] sm:$0xff]  ;;  %v7900_v15 = vld [vmem:[%s10453_s9 + $0x58] sm:$0xff]  ;;  %v128_v18 = vsel %vm109_vm0, %v7873_v8, 0.0  ;;  %v131_v19 = vsel %vm109_vm0, %v7878_v9, 0.0  ;;  %v134_v20 = vsel %vm109_vm0, %v7883_v10, 0.0 }
  0x18   :  { %v137_v21 = vsel %vm109_vm0, %v7890_v13, 0.0  ;;  %v140_v22 = vsel %vm109_vm0, %v7895_v14, 0.0  ;;  %v143_v23 = vsel %vm109_vm0, %v7900_v15, 0.0  ;;  %v7921_v24 = vld [vmem:[%s10453_s9 + $0x60] sm:$0xff]  ;;  %v7926_v25 = vld [vmem:[%s10453_s9 + $0x68] sm:$0xff] }
  0x19   :  { %v146_v26 = vsel %vm109_vm0, %v7921_v24, 0.0  ;;  %v149_v27 = vsel %vm109_vm0, %v7926_v25, 0.0 }
  0x1a   :  { %114 = vadd.xlane.f32.xlu0 %v113_v11  ;;  %120 = vadd.xlane.f32.xlu1 %v119_v12 }
  0x1e   :  { %123 = vadd.xlane.f32.xlu0 %v122_v16  ;;  %126 = vadd.xlane.f32.xlu1 %v125_v17 }
  0x22   :  { %129 = vadd.xlane.f32.xlu0 %v128_v18  ;;  %132 = vadd.xlane.f32.xlu1 %v131_v19 }
  0x26   :  { %135 = vadd.xlane.f32.xlu0 %v134_v20  ;;  %138 = vadd.xlane.f32.xlu1 %v137_v21 }
  0x2a   :  { %141 = vadd.xlane.f32.xlu0 %v140_v22  ;;  %144 = vadd.xlane.f32.xlu1 %v143_v23 }
  0x2b   :  { %33 = vsyncpa [#allocation3], 0  ;;  %v7935_v28 = vld [vmem:[%s10453_s9 + $0x70] sm:$0xff]  ;;  %v7940_v29 = vld [vmem:[%s10453_s9 + $0x78] sm:$0xff]  ;;  %vm396_vm1 = vcmask 1040384   ;;  %vm397_vm2 = vcmask 1041408  }
  0x2c   :  { %v152_v30 = vsel %vm109_vm0, %v7935_v28, 0.0  ;;  %v155_v31 = vsel %vm109_vm0, %v7940_v29, 0.0  ;;  %s10454_s0 = sld [smem:[#allocation14_spill]]  ;;  %vm523_vm3 = vcmask 130048   ;;  %s7693_s4 = smov 96   ;;  %vm786_vm4 = vcmask 261120  }
  0x2d   :  { %s10455_s2 = sld [smem:[#allocation12_spill]]  ;;  %s7694_s8 = smov 64   ;;  %vm7699_vm5 = vmmov 0   ;;  %vm6071_vm6 = vcmask 1041409   ;;  %vm6145_vm7 = vcmask 74752  }
  0x2e   :  { %147 = vadd.xlane.f32.xlu0 %v146_v26  ;;  %150 = vadd.xlane.f32.xlu1 %v149_v27  ;;  %s10456_s1 = sld [smem:[#allocation13_spill]]  ;;  %s7696_s11 = smov 112  }
  0x2f   :  { %s10457_s3 = sld [smem:[#allocation15_spill]]  ;;  %s7697_s29 = smov 48  }
  0x30   :  { %s10458_s12 = sld [smem:[#allocation16_spill]] }
  0x31   :  { %s10463_s7 = sld [smem:[#allocation20_spill]] }
  0x32   :  { %153 = vadd.xlane.f32.xlu0 %v152_v30  ;;  %156 = vadd.xlane.f32.xlu1 %v155_v31  ;;  %s10464_s5 = sld [smem:[#allocation23_spill]] }
  0x9f   :  { %v112_v32 = vpop.xlane.xlu0 %111  ;;  %v118_v33 = vpop.xlane.xlu1 %117 }
  0xa0   :  { %v159_v34 = vmul.f32 0.33333334, %v112_v32  ;;  %v161_v35 = vmul.f32 0.33333334, %v118_v33 }
  0xa2   :  { %v7946_v36 = vsub.f32 %v91_v0, %v159_v34  ;;  %v7948_v37 = vsub.f32 %v93_v1, %v161_v35 }
  0xa3   :  { %v115_v38 = vpop.xlane.xlu0 %114  ;;  %v121_v39 = vpop.xlane.xlu1 %120 }
  0xa4   :  { %v160_v40 = vmul.f32 0.33333334, %v115_v38  ;;  %v162_v41 = vmul.f32 0.33333334, %v121_v39  ;;  %v191_v42 = vmul.f32 %v7946_v36, %v7946_v36  ;;  %v193_v43 = vmul.f32 %v7948_v37, %v7948_v37 }
  0xa6   :  { %v7954_v44 = vsub.f32 %v92_v2, %v160_v40  ;;  %v7956_v45 = vsub.f32 %v94_v5, %v162_v41  ;;  %v207_v46 = vsel %vm109_vm0, %v191_v42, 0.0  ;;  %v213_v49 = vsel %vm109_vm0, %v193_v43, 0.0 }
  0xa7   :  { %208 = vadd.xlane.f32.xlu0 %v207_v46  ;;  %v124_v47 = vpop.xlane.xlu0 %123  ;;  %v127_v48 = vpop.xlane.xlu1 %126 }
  0xa8   :  { %v163_v50 = vmul.f32 0.33333334, %v124_v47  ;;  %v164_v51 = vmul.f32 0.33333334, %v127_v48  ;;  %v192_v52 = vmul.f32 %v7954_v44, %v7954_v44  ;;  %v194_v53 = vmul.f32 %v7956_v45, %v7956_v45 }
  0xaa   :  { %v7965_v54 = vsub.f32 %v7863_v6, %v163_v50  ;;  %v7968_v55 = vsub.f32 %v7868_v7, %v164_v51  ;;  %v210_v56 = vsel %vm109_vm0, %v192_v52, 0.0  ;;  %v216_v59 = vsel %vm109_vm0, %v194_v53, 0.0 }
  0xab   :  { %214 = vadd.xlane.f32.xlu0 %v213_v49  ;;  %211 = vadd.xlane.f32.xlu1 %v210_v56  ;;  %v130_v57 = vpop.xlane.xlu0 %129  ;;  %v133_v58 = vpop.xlane.xlu1 %132  ;;  %v371_v56 = vld [vmem:[%s10454_s0] sm:$0x3]  ;;  %s7695_s0 = smov 80  }
  0xac   :  { %v165_v60 = vmul.f32 0.33333334, %v130_v57  ;;  %v166_v61 = vmul.f32 0.33333334, %v133_v58  ;;  %v195_v62 = vmul.f32 %v7965_v54, %v7965_v54  ;;  %v196_v63 = vmul.f32 %v7968_v55, %v7968_v55 }
  0xae   :  { %v7977_v0 = vsub.f32 %v7873_v8, %v165_v60  ;;  %v7980_v1 = vsub.f32 %v7878_v9, %v166_v61  ;;  %v219_v2 = vsel %vm109_vm0, %v195_v62, 0.0  ;;  %v222_v5 = vsel %vm109_vm0, %v196_v63, 0.0 }
  0xaf   :  { %217 = vadd.xlane.f32.xlu1 %v216_v59  ;;  %220 = vadd.xlane.f32.xlu0 %v219_v2  ;;  %v136_v3 = vpop.xlane.xlu0 %135  ;;  %v139_v4 = vpop.xlane.xlu1 %138 }
  0xb0   :  { %v167_v6 = vmul.f32 0.33333334, %v136_v3  ;;  %v168_v7 = vmul.f32 0.33333334, %v139_v4  ;;  %v197_v11 = vmul.f32 %v7977_v0, %v7977_v0  ;;  %v198_v8 = vmul.f32 %v7980_v1, %v7980_v1 }
  0xb2   :  { %v7989_v12 = vsub.f32 %v7883_v10, %v167_v6  ;;  %v7992_v9 = vsub.f32 %v7890_v13, %v168_v7  ;;  %v225_v16 = vsel %vm109_vm0, %v197_v11, 0.0  ;;  %v228_v19 = vsel %vm109_vm0, %v198_v8, 0.0 }
  0xb3   :  { %223 = vadd.xlane.f32.xlu1 %v222_v5  ;;  %226 = vadd.xlane.f32.xlu0 %v225_v16  ;;  %v142_v17 = vpop.xlane.xlu0 %141  ;;  %v145_v18 = vpop.xlane.xlu1 %144 }
  0xb4   :  { %v169_v20 = vmul.f32 0.33333334, %v142_v17  ;;  %v170_v21 = vmul.f32 0.33333334, %v145_v18  ;;  %v199_v22 = vmul.f32 %v7989_v12, %v7989_v12  ;;  %v200_v10 = vmul.f32 %v7992_v9, %v7992_v9 }
  0xb6   :  { %v8001_v23 = vsub.f32 %v7895_v14, %v169_v20  ;;  %v8004_v13 = vsub.f32 %v7900_v15, %v170_v21  ;;  %v231_v26 = vsel %vm109_vm0, %v199_v22, 0.0  ;;  %v234_v31 = vsel %vm109_vm0, %v200_v10, 0.0 }
  0xb7   :  { %229 = vadd.xlane.f32.xlu1 %v228_v19  ;;  %232 = vadd.xlane.f32.xlu0 %v231_v26  ;;  %v148_v27 = vpop.xlane.xlu0 %147  ;;  %v151_v30 = vpop.xlane.xlu1 %150 }
  0xb8   :  { %v171_v32 = vmul.f32 0.33333334, %v148_v27  ;;  %v172_v33 = vmul.f32 0.33333334, %v151_v30  ;;  %v201_v34 = vmul.f32 %v8001_v23, %v8001_v23  ;;  %v202_v14 = vmul.f32 %v8004_v13, %v8004_v13 }
  0xba   :  { %v8013_v35 = vsub.f32 %v7921_v24, %v171_v32  ;;  %v8016_v15 = vsub.f32 %v7926_v25, %v172_v33  ;;  %v237_v38 = vsel %vm109_vm0, %v201_v34, 0.0  ;;  %v240_v41 = vsel %vm109_vm0, %v202_v14, 0.0  ;;  %v8047_v14 = vld [vmem:[%s10455_s2] ss:$0 sm:$0xff]  ;;  %s10460_s2 = sld [smem:[#allocation17_spill]] }
  0xbb   :  { %235 = vadd.xlane.f32.xlu1 %v234_v31  ;;  %238 = vadd.xlane.f32.xlu0 %v237_v38  ;;  %v154_v39 = vpop.xlane.xlu0 %153  ;;  %v157_v40 = vpop.xlane.xlu1 %156 }
  0xbc   :  { %v173_v42 = vmul.f32 0.33333334, %v154_v39  ;;  %v174_v43 = vmul.f32 0.33333334, %v157_v40  ;;  %v203_v46 = vmul.f32 %v8013_v35, %v8013_v35  ;;  %v204_v24 = vmul.f32 %v8016_v15, %v8016_v15 }
  0xbe   :  { %v8025_v47 = vsub.f32 %v7935_v28, %v173_v42  ;;  %v8028_v25 = vsub.f32 %v7940_v29, %v174_v43  ;;  %v243_v48 = vsel %vm109_vm0, %v203_v46, 0.0  ;;  %v246_v49 = vsel %vm109_vm0, %v204_v24, 0.0 }
  0xbf   :  { %241 = vadd.xlane.f32.xlu1 %v240_v41  ;;  %244 = vadd.xlane.f32.xlu0 %v243_v48  ;;  %v7692_v29 = vmov 65535  }
  0xc0   :  { %v205_v50 = vmul.f32 %v8025_v47, %v8025_v47  ;;  %v206_v51 = vmul.f32 %v8028_v25, %v8028_v25  ;;  %v398_v53 = vsel %vm396_vm1, 4294967295, %v7692_v29 }
  0xc1   :  { %v8041_v57 = vsel %vm397_vm2, %v398_v53, 0 }
  0xc2   :  { %v249_v52 = vsel %vm109_vm0, %v205_v50, 0.0  ;;  %v252_v28 = vsel %vm109_vm0, %v206_v51, 0.0  ;;  %v401_v58 = vand.u32 %v8041_v57, %v371_v56  ;;  %v8054_v50 = vld [vmem:[%s10456_s1] ss:$0 sm:$0xff]  ;;  %s10459_s1 = sld [smem:[#allocation18_spill]] }
  0xc3   :  { %247 = vadd.xlane.f32.xlu1 %v246_v49  ;;  %250 = vadd.xlane.f32.xlu0 %v249_v52 }
  0xc4   :  { %6638 = vmatprep.subr.bf16.mxu0 %v401_v58 }
  0xc5   :  { %6639 = vmatpush3.bf16.msra.mxu0 %v401_v58 }
  0xc7   :  { %253 = vadd.xlane.f32.xlu1 %v252_v28 }
 0x130   :  { %v209_v59 = vpop.xlane.xlu0 %208 }
 0x131   :  { %v255_v60 = vmul.f32 0.33333334, %v209_v59 }
 0x133   :  { %v271_v61 = vadd.f32 1e-05, %v255_v60 }
 0x134   :  { %v212_v62 = vpop.xlane.xlu1 %211  ;;  %v215_v63 = vpop.xlane.xlu0 %214 }
 0x135   :  { %7206 = vrsqrt.f32 %v271_v61  ;;  %v256_v2 = vmul.f32 0.33333334, %v212_v62  ;;  %v257_v3 = vmul.f32 0.33333334, %v215_v63 }
 0x137   :  { %v272_v4 = vadd.f32 1e-05, %v256_v2  ;;  %v273_v5 = vadd.f32 1e-05, %v257_v3 }
 0x138   :  { %v218_v6 = vpop.xlane.xlu1 %217  ;;  %v221_v7 = vpop.xlane.xlu0 %220 }
 0x139   :  { %7208 = vrsqrt.f32 %v272_v4  ;;  %v258_v11 = vmul.f32 0.33333334, %v218_v6  ;;  %v259_v8 = vmul.f32 0.33333334, %v221_v7 }
 0x13a   :  { %7210 = vrsqrt.f32 %v273_v5 }
 0x13b   :  { %v274_v16 = vadd.f32 1e-05, %v258_v11  ;;  %v275_v17 = vadd.f32 1e-05, %v259_v8 }
 0x13c   :  { %v224_v18 = vpop.xlane.xlu1 %223  ;;  %v227_v19 = vpop.xlane.xlu0 %226 }
 0x13d   :  { %7212 = vrsqrt.f32 %v274_v16  ;;  %v260_v20 = vmul.f32 0.33333334, %v224_v18  ;;  %v261_v21 = vmul.f32 0.33333334, %v227_v19 }
 0x13e   :  { %7214 = vrsqrt.f32 %v275_v17 }
 0x13f   :  { %v276_v22 = vadd.f32 1e-05, %v260_v20  ;;  %v277_v10 = vadd.f32 1e-05, %v261_v21 }
 0x140   :  { %v230_v26 = vpop.xlane.xlu1 %229  ;;  %v233_v27 = vpop.xlane.xlu0 %232 }
 0x141   :  { %7216 = vrsqrt.f32 %v276_v22  ;;  %v262_v30 = vmul.f32 0.33333334, %v230_v26  ;;  %v263_v31 = vmul.f32 0.33333334, %v233_v27 }
 0x142   :  { %v7207_v32 = vpop.eup %7206  ;;  %7218 = vrsqrt.f32 %v277_v10 }
 0x143   :  { %v278_v33 = vadd.f32 1e-05, %v262_v30  ;;  %v279_v34 = vadd.f32 1e-05, %v263_v31  ;;  %v303_v38 = vmul.f32 %v7207_v32, %v7946_v36 }
 0x144   :  { %v236_v39 = vpop.xlane.xlu1 %235  ;;  %v239_v40 = vpop.xlane.xlu0 %238 }
 0x145   :  { %7220 = vrsqrt.f32 %v278_v33  ;;  %v264_v41 = vmul.f32 0.33333334, %v236_v39  ;;  %v265_v42 = vmul.f32 0.33333334, %v239_v40  ;;  %v325_v46 = vmul.f32 %v8047_v14, %v303_v38 }
 0x146   :  { %v7209_v43 = vpop.eup %7208  ;;  %7222 = vrsqrt.f32 %v279_v34 }
 0x147   :  { %v7211_v24 = vpop.eup %7210  ;;  %v280_v48 = vadd.f32 1e-05, %v264_v41  ;;  %v281_v49 = vadd.f32 1e-05, %v265_v42  ;;  %v304_v51 = vmul.f32 %v7209_v43, %v7954_v44  ;;  %v347_v59 = vadd.f32 %v8054_v50, %v325_v46 }
 0x148   :  { %v242_v36 = vpop.xlane.xlu1 %241  ;;  %v245_v52 = vpop.xlane.xlu0 %244  ;;  %v305_v28 = vmul.f32 %v7211_v24, %v7948_v37 }
 0x149   :  { %7224 = vrsqrt.f32 %v280_v48  ;;  %v266_v29 = vmul.f32 0.33333334, %v242_v36  ;;  %v267_v53 = vmul.f32 0.33333334, %v245_v52  ;;  %v326_v56 = vmul.f32 %v8047_v14, %v304_v51 }
 0x14a   :  { %v7213_v58 = vpop.eup %7212  ;;  %7226 = vrsqrt.f32 %v281_v49  ;;  %v327_v37 = vmul.f32 %v8047_v14, %v305_v28 }
 0x14b   :  { %v7215_v60 = vpop.eup %7214  ;;  %v282_v61 = vadd.f32 1e-05, %v266_v29  ;;  %v283_v62 = vadd.f32 1e-05, %v267_v53  ;;  %v348_v63 = vadd.f32 %v8054_v50, %v326_v56  ;;  %v306_v44 = vmul.f32 %v7213_v58, %v7956_v45 }
 0x14c   :  { %v248_v2 = vpop.xlane.xlu1 %247  ;;  %v251_v3 = vpop.xlane.xlu0 %250  ;;  %v307_v4 = vmul.f32 %v7215_v60, %v7965_v54  ;;  %v349_v54 = vadd.f32 %v8054_v50, %v327_v37 }
 0x14d   :  { %7228 = vrsqrt.f32 %v282_v61  ;;  %v268_v5 = vmul.f32 0.33333334, %v248_v2  ;;  %v269_v6 = vmul.f32 0.33333334, %v251_v3  ;;  %v363_v7 = vpack.c.bf16 %v348_v63, %v347_v59 }
 0x14e   :  { %v7217_v11 = vpop.eup %7216  ;;  %7230 = vrsqrt.f32 %v283_v62  ;;  %v328_v8 = vmul.f32 %v8047_v14, %v306_v44  ;;  %v329_v16 = vmul.f32 %v8047_v14, %v307_v4 }
 0x14f   :  { %v7219_v17 = vpop.eup %7218  ;;  %v284_v18 = vadd.f32 1e-05, %v268_v5  ;;  %v285_v19 = vadd.f32 1e-05, %v269_v6  ;;  %6640 = vmatprep.mubr.msk.bf16.mxu0 %vm109_vm0, %v363_v7  ;;  %v308_v45 = vmul.f32 %v7217_v11, %v7968_v55 }
 0x150   :  { %v254_v20 = vpop.xlane.xlu1 %253  ;;  %v350_v21 = vadd.f32 %v8054_v50, %v328_v8  ;;  %v309_v22 = vmul.f32 %v7219_v17, %v7977_v0  ;;  %v351_v31 = vadd.f32 %v8054_v50, %v329_v16 }
 0x151   :  { %7232 = vrsqrt.f32 %v284_v18  ;;  %v270_v10 = vmul.f32 0.33333334, %v254_v20  ;;  %v330_v26 = vmul.f32 %v8047_v14, %v308_v45 }
 0x152   :  { %v7221_v27 = vpop.eup %7220  ;;  %7234 = vrsqrt.f32 %v285_v19  ;;  %v364_v30 = vpack.c.bf16 %v350_v21, %v349_v54  ;;  %v331_v38 = vmul.f32 %v8047_v14, %v309_v22 }
 0x153   :  { %v7223_v32 = vpop.eup %7222  ;;  %v286_v33 = vadd.f32 1e-05, %v270_v10  ;;  %v352_v55 = vadd.f32 %v8054_v50, %v330_v26  ;;  %v310_v34 = vmul.f32 %v7221_v27, %v7980_v1 }
 0x154   :  { %6641 = vmatmul.mubr.msk.bf16.vlgmr.msra.gmra.mxu0 %vm109_vm0, %v364_v30  ;;  %v311_v0 = vmul.f32 %v7223_v32, %v7989_v12  ;;  %v353_v43 = vadd.f32 %v8054_v50, %v331_v38 }
 0x155   :  { %7236 = vrsqrt.f32 %v286_v33  ;;  %v365_v39 = vpack.c.bf16 %v352_v55, %v351_v31  ;;  %v332_v40 = vmul.f32 %v8047_v14, %v310_v34 }
 0x156   :  { %v7225_v41 = vpop.eup %7224  ;;  %v333_v24 = vmul.f32 %v8047_v14, %v311_v0 }
 0x157   :  { %v7227_v42 = vpop.eup %7226  ;;  %6644 = vmatprep.mubr.msk.bf16.mxu0 %vm109_vm0, %v365_v39  ;;  %v354_v46 = vadd.f32 %v8054_v50, %v332_v40  ;;  %v312_v1 = vmul.f32 %v7225_v41, %v7992_v9 }
 0x158   :  { %v313_v48 = vmul.f32 %v7227_v42, %v8001_v23  ;;  %v355_v52 = vadd.f32 %v8054_v50, %v333_v24 }
 0x159   :  { %v366_v49 = vpack.c.bf16 %v354_v46, %v353_v43  ;;  %v334_v12 = vmul.f32 %v8047_v14, %v312_v1 }
 0x15a   :  { %v7229_v51 = vpop.eup %7228  ;;  %v335_v53 = vmul.f32 %v8047_v14, %v313_v48 }
 0x15b   :  { %v7231_v36 = vpop.eup %7230  ;;  %v356_v28 = vadd.f32 %v8054_v50, %v334_v12  ;;  %v314_v29 = vmul.f32 %v7229_v51, %v8004_v13 }
 0x15c   :  { %6645 = vmatmul.mubr.msk.bf16.gmra.mxu0 %vm109_vm0, %v366_v49  ;;  %v315_v9 = vmul.f32 %v7231_v36, %v8013_v35  ;;  %v357_v60 = vadd.f32 %v8054_v50, %v335_v53 }
 0x15d   :  { %v367_v56 = vpack.c.bf16 %v356_v28, %v355_v52  ;;  %v336_v23 = vmul.f32 %v8047_v14, %v314_v29 }
 0x15e   :  { %v7233_v58 = vpop.eup %7232  ;;  %v337_v13 = vmul.f32 %v8047_v14, %v315_v9 }
 0x15f   :  { %v7235_v59 = vpop.eup %7234  ;;  %6648 = vmatprep.mubr.msk.bf16.mxu0 %vm109_vm0, %v367_v56  ;;  %v358_v61 = vadd.f32 %v8054_v50, %v336_v23  ;;  %v316_v62 = vmul.f32 %v7233_v58, %v8016_v15  ;;  %v6383_v56 = vld [vmem:[%s10457_s3 + $0x8] sm:$0xff]   ;;  %v6352_v23 = vld [vmem:[%s10457_s3] sm:$0xff]  }
 0x160   :  { %v317_v63 = vmul.f32 %v7235_v59, %v8025_v47  ;;  %v359_v3 = vadd.f32 %v8054_v50, %v337_v13  ;;  %v6357_v58 = vunpack.c.l.bf16 %v6383_v56  ;;  %v6353_v59 = vunpack.c.l.bf16 %v6352_v23 }
 0x161   :  { %v368_v44 = vpack.c.bf16 %v358_v61, %v357_v60  ;;  %v338_v35 = vmul.f32 %v8047_v14, %v316_v62 }
 0x162   :  { %v7237_v2 = vpop.eup %7236  ;;  %v339_v5 = vmul.f32 %v8047_v14, %v317_v63 }
 0x163   :  { %v360_v37 = vadd.f32 %v8054_v50, %v338_v35  ;;  %v318_v4 = vmul.f32 %v7237_v2, %v8028_v25  ;;  %v6354_v35 = vunpack.c.h.bf16 %v6352_v23 }
 0x164   :  { %6649 = vmatmul.mubr.msk.bf16.gmra.mxu0 %vm109_vm0, %v368_v44  ;;  %v361_v47 = vadd.f32 %v8054_v50, %v339_v5  ;;  %v6358_v44 = vunpack.c.h.bf16 %v6383_v56 }
 0x165   :  { %v369_v6 = vpack.c.bf16 %v360_v37, %v359_v3  ;;  %v340_v15 = vmul.f32 %v8047_v14, %v318_v4 }
 0x167   :  { %6652 = vmatprep.mubr.msk.bf16.mxu0 %vm109_vm0, %v369_v6  ;;  %v362_v7 = vadd.f32 %v8054_v50, %v340_v15 }
 0x169   :  { %v370_v11 = vpack.c.bf16 %v362_v7, %v361_v47 }
 0x16c   :  { %6653 = vmatmul.mubr.msk.bf16.gmra.mxu0 %vm109_vm0, %v370_v11 }
 0x214   :  { %v6642_v8 = vpop.f32.mrf.mxu0 }
 0x216   :  { %v437_v16 = vpop.f32.mrf.mxu0 }
 0x218   :  { %v6643_v17 = vpop.f32.mrf.mxu0 }
 0x219   :  { %v8110_v25 = vpack.c.bf16 %v6643_v17, %v6642_v8 }
 0x21a   :  { %v440_v18 = vpop.f32.mrf.mxu0 }
 0x21b   :  { %v8112_v19 = vpack.c.bf16 %v440_v18, %v437_v16  ;;  %521 = vrot.lane.b32.xlu0 %v8110_v25, %s7693_s4 }
 0x21c   :  { %v6646_v14 = vpop.f32.mrf.mxu0 }
 0x21d   :  { %519 = vrot.lane.b32.xlu1 %v8112_v19, %s7693_s4  ;;  %6660 = vmatprep.mubr.msk.bf16.mxu1 %vm523_vm3, %v8112_v19 }
 0x21e   :  { %v453_v50 = vpop.f32.mrf.mxu0 }
 0x220   :  { %v6647_v45 = vpop.f32.mrf.mxu0 }
 0x221   :  { %v8120_v20 = vpack.c.bf16 %v6647_v45, %v6646_v14 }
 0x222   :  { %v456_v54 = vpop.f32.mrf.mxu0 }
 0x223   :  { %589 = vrot.lane.b32.xlu1 %v8120_v20, %s7693_s4  ;;  %v8124_v22 = vpack.c.bf16 %v456_v54, %v453_v50 }
 0x224   :  { %v6650_v21 = vpop.f32.mrf.mxu0 }
 0x226   :  { %v469_v10 = vpop.f32.mrf.mxu0 }
 0x227   :  { %587 = vrot.lane.b32.xlu1 %v8124_v22, %s7693_s4 }
 0x228   :  { %v6651_v26 = vpop.f32.mrf.mxu0 }
 0x229   :  { %v8128_v27 = vpack.c.bf16 %v6651_v26, %v6650_v21 }
 0x22a   :  { %v472_v30 = vpop.f32.mrf.mxu0 }
 0x22b   :  { %v8130_v31 = vpack.c.bf16 %v472_v30, %v469_v10  ;;  %656 = vrot.lane.b32.xlu0 %v8128_v27, %s7693_s4 }
 0x22c   :  { %v6654_v32 = vpop.f32.mrf.mxu0 }
 0x22d   :  { %654 = vrot.lane.b32.xlu1 %v8130_v31, %s7693_s4  ;;  %6676 = vmatprep.mubr.msk.bf16.mxu0 %vm523_vm3, %v8130_v31 }
 0x22e   :  { %v485_v33 = vpop.f32.mrf.mxu0 }
 0x230   :  { %v6655_v55 = vpop.f32.mrf.mxu0 }
 0x231   :  { %v8138_v34 = vpack.c.bf16 %v6655_v55, %v6654_v32 }
 0x232   :  { %v488_v38 = vpop.f32.mrf.mxu0 }
 0x233   :  { %v8140_v0 = vpack.c.bf16 %v488_v38, %v485_v33  ;;  %723 = vrot.lane.b32.xlu0 %v8138_v34, %s7693_s4 }
 0x235   :  { %721 = vrot.lane.b32.xlu1 %v8140_v0, %s7693_s4 }
 0x237   :  { %973 = vrot.lane.b32.xlu0 %v8110_v25, %s7694_s8 }
 0x239   :  { %971 = vrot.lane.b32.xlu1 %v8112_v19, %s7694_s8 }
 0x28d   :  { %v522_v39 = vpop.permute.xlu0 %521 }
 0x28e   :  { %7139 = vmatprep.subr.msk.bf16.mxu1 %vm523_vm3, %v522_v39  ;;  %v534_v40 = vsel %vm523_vm3, %v522_v39, 0 }
 0x28f   :  { %v520_v41 = vpop.permute.xlu1 %519  ;;  %6657 = vmatpush3.bf16.xpose.msra.mxu1 %v534_v40 }
 0x290   :  { %7140 = vmatprep.subr.msk.bf16.mxu1 %vm523_vm3, %v520_v41  ;;  %v531_v43 = vsel %vm523_vm3, %v520_v41, 0 }
 0x295   :  { %v590_v42 = vpop.permute.xlu1 %589 }
 0x296   :  { %v601_v24 = vsel %vm523_vm3, %v590_v42, 0 }
 0x297   :  { %6659 = vmatpush3.bf16.xpose.msra.mxu1 %v531_v43 }
 0x298   :  { %7141 = vmatprep.subr.msk.bf16.mxu1 %vm523_vm3, %v590_v42 }
 0x299   :  { %v588_v46 = vpop.permute.xlu1 %587 }
 0x29a   :  { %v598_v51 = vsel %vm523_vm3, %v588_v46, 0 }
 0x29d   :  { %v657_v1 = vpop.permute.xlu0 %656 }
 0x29e   :  { %6661 = vmatmul.mubr.msk.bf16.vlgmr.msra.gmra.mxu1 %vm523_vm3, %v8110_v25  ;;  %7143 = vmatprep.subr.msk.bf16.mxu0 %vm523_vm3, %v657_v1  ;;  %v668_v48 = vsel %vm523_vm3, %v657_v1, 0 }
 0x29f   :  { %v655_v49 = vpop.permute.xlu1 %654  ;;  %6665 = vmatpush3.bf16.xpose.msra.mxu1 %v601_v24  ;;  %6668 = vmatprep.mubr.msk.bf16.mxu1 %vm523_vm3, %v8124_v22 }
 0x2a0   :  { %6673 = vmatpush3.bf16.xpose.msra.mxu0 %v668_v48  ;;  %7142 = vmatprep.subr.msk.bf16.mxu1 %vm523_vm3, %v588_v46  ;;  %v665_v36 = vsel %vm523_vm3, %v655_v49, 0 }
 0x2a1   :  { %7144 = vmatprep.subr.msk.bf16.mxu0 %vm523_vm3, %v655_v49 }
 0x2a5   :  { %v724_v12 = vpop.permute.xlu0 %723 }
 0x2a6   :  { %v735_v29 = vsel %vm523_vm3, %v724_v12, 0 }
 0x2a7   :  { %6667 = vmatpush3.bf16.xpose.msra.mxu1 %v598_v51  ;;  %v722_v28 = vpop.permute.xlu1 %721 }
 0x2a8   :  { %6675 = vmatpush3.bf16.xpose.msra.mxu0 %v665_v36  ;;  %7145 = vmatprep.subr.msk.bf16.mxu1 %vm523_vm3, %v724_v12  ;;  %v732_v9 = vsel %vm523_vm3, %v722_v28, 0 }
 0x2a9   :  { %v974_v52 = vpop.permute.xlu0 %973 }
 0x2aa   :  { %6688 = vmatprep.subr.bf16.mxu0 %v974_v52 }
 0x2ab   :  { %v972_v53 = vpop.permute.xlu1 %971 }
 0x2ae   :  { %6669 = vmatmul.mubr.msk.bf16.vlgmr.msra.gmra.mxu1 %vm523_vm3, %v8120_v20 }
 0x2af   :  { %6677 = vmatmul.mubr.msk.bf16.vlgmr.msra.gmra.mxu0 %vm523_vm3, %v8128_v27  ;;  %6681 = vmatpush3.bf16.xpose.msra.mxu1 %v735_v29 }
 0x2b0   :  { %6684 = vmatprep.mubr.msk.bf16.mxu1 %vm523_vm3, %v8140_v0  ;;  %6689 = vmatpush3.bf16.msra.mxu0 %v974_v52 }
 0x2b1   :  { %7146 = vmatprep.subr.msk.bf16.mxu1 %vm523_vm3, %v722_v28  ;;  %6690 = vmatprep.subr.bf16.mxu0 %v972_v53 }
 0x2b4   :  { %6691 = vmatpush3.bf16.msra.mxu0 %v972_v53 }
 0x2b7   :  { %6683 = vmatpush3.bf16.xpose.msra.mxu1 %v732_v9 }
 0x2be   :  { %6685 = vmatmul.mubr.msk.bf16.vlgmr.msra.gmra.mxu1 %vm523_vm3, %v8138_v34 }
 0x35e   :  { %v6662_v60 = vpop.f32.mrf.mxu1 }
 0x35f   :  { %v8184_v61 = vadd.f32 %v6662_v60, %v6357_v58 }
 0x360   :  { %v570_v62 = vpop.f32.mrf.mxu1 }
 0x361   :  { %v8186_v13 = vadd.f32 %v6353_v59, %v570_v62  ;;  %v793_v63 = vsel %vm786_vm4, %v8184_v61, -inf }
 0x362   :  { %794 = vmax.xlane.f32.xlu0 %v793_v63  ;;  %v6663_v2 = vpop.f32.mrf.mxu1 }
 0x363   :  { %v8190_v37 = vadd.f32 %v6663_v2, %v6358_v44  ;;  %v787_v5 = vsel %vm786_vm4, %v8186_v13, -inf }
 0x364   :  { %v573_v3 = vpop.f32.mrf.mxu1 }
 0x365   :  { %v8192_v4 = vadd.f32 %v6354_v35, %v573_v3  ;;  %v796_v15 = vsel %vm786_vm4, %v8190_v37, -inf }
 0x366   :  { %788 = vmax.xlane.f32.xlu0 %v787_v5 }
 0x367   :  { %v790_v6 = vsel %vm786_vm4, %v8192_v4, -inf }
 0x368   :  { %791 = vmax.xlane.f32.xlu1 %v790_v6 }
 0x36a   :  { %797 = vmax.xlane.f32.xlu0 %v796_v15 }
 0x36e   :  { %v6670_v47 = vpop.f32.mrf.mxu1 }
 0x36f   :  { %v8200_v7 = vadd.f32 %v6670_v47, %v6357_v58  ;;  %v6678_v11 = vpop.f32.mrf.mxu0 }
 0x370   :  { %v637_v8 = vpop.f32.mrf.mxu1  ;;  %v8202_v16 = vadd.f32 %v6678_v11, %v6357_v58 }
 0x371   :  { %v704_v17 = vpop.f32.mrf.mxu0  ;;  %v805_v18 = vsel %vm786_vm4, %v8200_v7, -inf  ;;  %v8208_v54 = vadd.f32 %v6353_v59, %v637_v8 }
 0x372   :  { %v6671_v14 = vpop.f32.mrf.mxu1  ;;  %806 = vmax.xlane.f32.xlu0 %v805_v18  ;;  %v817_v26 = vsel %vm786_vm4, %v8202_v16, -inf  ;;  %v8216_v32 = vadd.f32 %v6353_v59, %v704_v17 }
 0x373   :  { %v8206_v50 = vadd.f32 %v6671_v14, %v6358_v44  ;;  %v6679_v45 = vpop.f32.mrf.mxu0  ;;  %v799_v55 = vsel %vm786_vm4, %v8208_v54, -inf }
 0x374   :  { %v8210_v21 = vadd.f32 %v6679_v45, %v6358_v44  ;;  %v640_v30 = vpop.f32.mrf.mxu1  ;;  %v811_v42 = vsel %vm786_vm4, %v8216_v32, -inf }
 0x375   :  { %v808_v10 = vsel %vm786_vm4, %v8206_v50, -inf  ;;  %v8218_v33 = vadd.f32 %v6354_v35, %v640_v30  ;;  %v707_v39 = vpop.f32.mrf.mxu0 }
 0x376   :  { %809 = vmax.xlane.f32.xlu1 %v808_v10  ;;  %818 = vmax.xlane.f32.xlu0 %v817_v26  ;;  %v820_v38 = vsel %vm786_vm4, %v8210_v21, -inf  ;;  %v8224_v40 = vadd.f32 %v6354_v35, %v707_v39 }
 0x377   :  { %v802_v41 = vsel %vm786_vm4, %v8218_v33, -inf }
 0x378   :  { %v814_v48 = vsel %vm786_vm4, %v8224_v40, -inf }
 0x37a   :  { %800 = vmax.xlane.f32.xlu0 %v799_v55  ;;  %821 = vmax.xlane.f32.xlu1 %v820_v38 }
 0x37e   :  { %803 = vmax.xlane.f32.xlu1 %v802_v41  ;;  %812 = vmax.xlane.f32.xlu0 %v811_v42  ;;  %v6686_v43 = vpop.f32.mrf.mxu1 }
 0x37f   :  { %v8230_v46 = vadd.f32 %v6686_v43, %v6357_v58 }
 0x380   :  { %v771_v1 = vpop.f32.mrf.mxu1 }
 0x381   :  { %v8232_v24 = vadd.f32 %v6353_v59, %v771_v1  ;;  %v829_v49 = vsel %vm786_vm4, %v8230_v46, -inf }
 0x382   :  { %815 = vmax.xlane.f32.xlu1 %v814_v48  ;;  %830 = vmax.xlane.f32.xlu0 %v829_v49  ;;  %v6687_v12 = vpop.f32.mrf.mxu1 }
 0x383   :  { %v8238_v51 = vadd.f32 %v6687_v12, %v6358_v44  ;;  %v823_v29 = vsel %vm786_vm4, %v8232_v24, -inf }
 0x384   :  { %v774_v36 = vpop.f32.mrf.mxu1 }
 0x385   :  { %v8240_v52 = vadd.f32 %v6354_v35, %v774_v36  ;;  %v832_v28 = vsel %vm786_vm4, %v8238_v51, -inf }
 0x386   :  { %833 = vmax.xlane.f32.xlu1 %v832_v28  ;;  %824 = vmax.xlane.f32.xlu0 %v823_v29 }
 0x387   :  { %v826_v53 = vsel %vm786_vm4, %v8240_v52, -inf }
 0x38a   :  { %827 = vmax.xlane.f32.xlu1 %v826_v53 }
 0x39c   :  { %1034 = vrot.lane.b32.xlu0 %v8120_v20, %s7694_s8 }
 0x3eb   :  { %v795_v9 = vpop.xlane.xlu0 %794 }
 0x3ec   :  { %v837_v56 = vsub.f32 %v8184_v61, %v795_v9 }
 0x3ee   :  { %v855_v23 = vmul.f32 1.442695, %v837_v56 }
 0x3ef   :  { %v789_v58 = vpop.xlane.xlu0 %788 }
 0x3f0   :  { %7238 = vpow2.f32 %v855_v23  ;;  %v835_v59 = vsub.f32 %v8186_v13, %v789_v58 }
 0x3f1   :  { %v792_v60 = vpop.xlane.xlu1 %791 }
 0x3f2   :  { %v851_v62 = vmul.f32 1.442695, %v835_v59  ;;  %v836_v63 = vsub.f32 %v8192_v4, %v792_v60 }
 0x3f3   :  { %v798_v44 = vpop.xlane.xlu0 %797 }
 0x3f4   :  { %7240 = vpow2.f32 %v851_v62  ;;  %v838_v35 = vsub.f32 %v8190_v37, %v798_v44  ;;  %v853_v2 = vmul.f32 1.442695, %v836_v63 }
 0x3f6   :  { %v857_v3 = vmul.f32 1.442695, %v838_v35 }
 0x3f8   :  { %7242 = vpow2.f32 %v857_v3 }
 0x3f9   :  { %7244 = vpow2.f32 %v853_v2 }
 0x3fb   :  { %v807_v5 = vpop.xlane.xlu0 %806 }
 0x3fc   :  { %v841_v61 = vsub.f32 %v8200_v7, %v807_v5 }
 0x3fd   :  { %v8255_v6 = vpop.eup %7238 }
 0x3fe   :  { %v863_v15 = vmul.f32 1.442695, %v841_v61  ;;  %v889_v13 = vsel %vm786_vm4, %v8255_v6, 0.0 }
 0x3ff   :  { %890 = vadd.xlane.f32.xlu0 %v889_v13  ;;  %v819_v47 = vpop.xlane.xlu0 %818  ;;  %v810_v48 = vpop.xlane.xlu1 %809 }
 0x400   :  { %7246 = vpow2.f32 %v863_v15  ;;  %v845_v4 = vsub.f32 %v8202_v16, %v819_v47  ;;  %v842_v28 = vsub.f32 %v8206_v50, %v810_v48 }
 0x401   :  { %v8260_v11 = vpop.eup %7240 }
 0x402   :  { %v871_v37 = vmul.f32 1.442695, %v845_v4  ;;  %v883_v8 = vsel %vm786_vm4, %v8260_v11, 0.0  ;;  %v865_v56 = vmul.f32 1.442695, %v842_v28 }
 0x403   :  { %884 = vadd.xlane.f32.xlu0 %v883_v8  ;;  %v801_v17 = vpop.xlane.xlu0 %800  ;;  %v822_v49 = vpop.xlane.xlu1 %821 }
 0x404   :  { %v839_v7 = vsub.f32 %v8208_v54, %v801_v17  ;;  %7248 = vpow2.f32 %v871_v37  ;;  %v846_v23 = vsub.f32 %v8210_v21, %v822_v49 }
 0x405   :  { %v8265_v18 = vpop.eup %7242 }
 0x406   :  { %v859_v14 = vmul.f32 1.442695, %v839_v7  ;;  %v892_v45 = vsel %vm786_vm4, %v8265_v18, 0.0  ;;  %v8269_v10 = vpop.eup %7244  ;;  %v873_v62 = vmul.f32 1.442695, %v846_v23 }
 0x407   :  { %893 = vadd.xlane.f32.xlu1 %v892_v45  ;;  %v813_v16 = vpop.xlane.xlu0 %812  ;;  %v886_v26 = vsel %vm786_vm4, %v8269_v10, 0.0  ;;  %v804_v12 = vpop.xlane.xlu1 %803 }
 0x408   :  { %7250 = vpow2.f32 %v859_v14  ;;  %v843_v36 = vsub.f32 %v8216_v32, %v813_v16  ;;  %v840_v63 = vsub.f32 %v8218_v33, %v804_v12 }
 0x40a   :  { %v867_v53 = vmul.f32 1.442695, %v843_v36  ;;  %v861_v44 = vmul.f32 1.442695, %v840_v63 }
 0x40b   :  { %887 = vadd.xlane.f32.xlu1 %v886_v26  ;;  %v831_v30 = vpop.xlane.xlu0 %830  ;;  %v816_v29 = vpop.xlane.xlu1 %815 }
 0x40c   :  { %v849_v9 = vsub.f32 %v8230_v46, %v831_v30  ;;  %7252 = vpow2.f32 %v867_v53  ;;  %v844_v8 = vsub.f32 %v8224_v40, %v816_v29 }
 0x40d   :  { %v8273_v55 = vpop.eup %7246  ;;  %7254 = vpow2.f32 %v865_v56 }
 0x40e   :  { %v901_v54 = vsel %vm786_vm4, %v8273_v55, 0.0  ;;  %v879_v58 = vmul.f32 1.442695, %v849_v9  ;;  %v869_v7 = vmul.f32 1.442695, %v844_v8 }
 0x40f   :  { %902 = vadd.xlane.f32.xlu0 %v901_v54  ;;  %v825_v38 = vpop.xlane.xlu0 %824  ;;  %v834_v60 = vpop.xlane.xlu1 %833 }
 0x410   :  { %v847_v59 = vsub.f32 %v8232_v24, %v825_v38  ;;  %7256 = vpow2.f32 %v879_v58  ;;  %v850_v32 = vsub.f32 %v8238_v51, %v834_v60 }
 0x411   :  { %v8277_v39 = vpop.eup %7248  ;;  %7258 = vpow2.f32 %v873_v62 }
 0x412   :  { %v913_v41 = vsel %vm786_vm4, %v8277_v39, 0.0  ;;  %v875_v50 = vmul.f32 1.442695, %v847_v59  ;;  %v881_v35 = vmul.f32 1.442695, %v850_v32  ;;  %v8391_v32 = vld [vmem:[%s10458_s12] sm:$0xff]  }
 0x413   :  { %v8281_v42 = vpop.permute.xlu0 %1034  ;;  %914 = vadd.xlane.f32.xlu1 %v913_v41  ;;  %v828_v17 = vpop.xlane.xlu1 %827 }
 0x414   :  { %6696 = vmatprep.subr.bf16.mxu0 %v8281_v42  ;;  %7260 = vpow2.f32 %v875_v50  ;;  %v848_v14 = vsub.f32 %v8240_v52, %v828_v17 }
 0x415   :  { %v8284_v43 = vpop.eup %7250  ;;  %7262 = vpow2.f32 %v861_v44 }
 0x416   :  { %v895_v1 = vsel %vm786_vm4, %v8284_v43, 0.0  ;;  %7264 = vpow2.f32 %v881_v35  ;;  %v877_v45 = vmul.f32 1.442695, %v848_v14 }
 0x417   :  { %896 = vadd.xlane.f32.xlu0 %v895_v1  ;;  %7266 = vpow2.f32 %v869_v7 }
 0x418   :  { %7268 = vpow2.f32 %v877_v45 }
 0x419   :  { %v8299_v21 = vpop.eup %7252 }
 0x41a   :  { %v8301_v46 = vpop.eup %7254  ;;  %v907_v24 = vsel %vm786_vm4, %v8299_v21, 0.0 }
 0x41b   :  { %v904_v51 = vsel %vm786_vm4, %v8301_v46, 0.0 }
 0x41d   :  { %v8305_v2 = vpop.eup %7256 }
 0x41e   :  { %v8307_v33 = vpop.eup %7258  ;;  %v925_v3 = vsel %vm786_vm4, %v8305_v2, 0.0 }
 0x41f   :  { %v916_v15 = vsel %vm786_vm4, %v8307_v33, 0.0 }
 0x421   :  { %v8313_v5 = vpop.eup %7260 }
 0x422   :  { %v8315_v61 = vpop.eup %7262  ;;  %v919_v13 = vsel %vm786_vm4, %v8313_v5, 0.0 }
 0x423   :  { %v8321_v47 = vpop.eup %7264  ;;  %v898_v4 = vsel %vm786_vm4, %v8315_v61, 0.0 }
 0x424   :  { %1095 = vrot.lane.b32.xlu1 %v8128_v27, %s7694_s8  ;;  %v928_v37 = vsel %vm786_vm4, %v8321_v47, 0.0  ;;  %v8345_v40 = vpop.eup %7266 }
 0x425   :  { %v910_v52 = vsel %vm786_vm4, %v8345_v40, 0.0  ;;  %v8351_v16 = vpop.eup %7268 }
 0x426   :  { %v922_v30 = vsel %vm786_vm4, %v8351_v16, 0.0 }
 0x42d   :  { %1032 = vrot.lane.b32.xlu0 %v8124_v22, %s7694_s8 }
 0x448   :  { %908 = vadd.xlane.f32.xlu1 %v907_v24 }
 0x44c   :  { %905 = vadd.xlane.f32.xlu1 %v904_v51  ;;  %926 = vadd.xlane.f32.xlu0 %v925_v3 }
 0x450   :  { %917 = vadd.xlane.f32.xlu1 %v916_v15  ;;  %920 = vadd.xlane.f32.xlu0 %v919_v13 }
 0x454   :  { %899 = vadd.xlane.f32.xlu1 %v898_v4  ;;  %929 = vadd.xlane.f32.xlu0 %v928_v37 }
 0x465   :  { %1093 = vrot.lane.b32.xlu1 %v8130_v31, %s7694_s8 }
 0x46a   :  { %1156 = vrot.lane.b32.xlu0 %v8138_v34, %s7694_s8 }
 0x46e   :  { %1389 = vrot.lane.b32.xlu0 %v8110_v25, %s7695_s0 }
 0x472   :  { %1383 = vrot.lane.b32.xlu0 %v8112_v19, %s7696_s11 }
 0x476   :  { %1458 = vrot.lane.b32.xlu0 %v8120_v20, %s7695_s0 }
 0x47a   :  { %1527 = vrot.lane.b32.xlu0 %v8128_v27, %s7695_s0 }
 0x47e   :  { %1454 = vrot.lane.b32.xlu0 %v8120_v20, %s7696_s11 }
 0x482   :  { %1596 = vrot.lane.b32.xlu0 %v8138_v34, %s7695_s0 }
 0x486   :  { %1523 = vrot.lane.b32.xlu0 %v8128_v27, %s7696_s11 }
 0x488   :  { %v891_v26 = vpop.xlane.xlu0 %890 }
 0x489   :  { %911 = vadd.xlane.f32.xlu1 %v910_v52 }
 0x48a   :  { %1590 = vrot.lane.b32.xlu0 %v8140_v0, %s7696_s11 }
 0x48c   :  { %v885_v54 = vpop.xlane.xlu0 %884 }
 0x48d   :  { %923 = vadd.xlane.f32.xlu1 %v922_v30 }
 0x48e   :  { %1845 = vrot.lane.b32.xlu0 %v8110_v25, %s7697_s29 }
 0x490   :  { %v894_v38 = vpop.xlane.xlu1 %893 }
 0x491   :  { %7270 = vrcp.f32 %v894_v38 }
 0x492   :  { %7272 = vrcp.f32 %v885_v54 }
 0x493   :  { %7274 = vrcp.f32 %v891_v26 }
 0x494   :  { %v888_v41 = vpop.xlane.xlu1 %887 }
 0x495   :  { %7276 = vrcp.f32 %v888_v41 }
 0x498   :  { %v903_v49 = vpop.xlane.xlu0 %902 }
 0x49c   :  { %v8359_v1 = vpop.xlane.xlu1 %914 }
 0x49e   :  { %v7271_v48 = vpop.eup %7270  ;;  %1154 = vrot.lane.b32.xlu1 %v8140_v0, %s7694_s8 }
 0x49f   :  { %v7273_v12 = vpop.eup %7272  ;;  %v950_v53 = vmul.f32 %v7271_v48, %v8265_v18 }
 0x4a0   :  { %v7275_v36 = vpop.eup %7274  ;;  %v1096_v28 = vpop.permute.xlu1 %1095  ;;  %v947_v56 = vmul.f32 %v7273_v12, %v8260_v11 }
 0x4a1   :  { %6704 = vmatprep.subr.bf16.mxu1 %v1096_v28  ;;  %v897_v9 = vpop.xlane.xlu0 %896  ;;  %v949_v58 = vmul.f32 %v7275_v36, %v8255_v6 }
 0x4a2   :  { %v7277_v29 = vpop.eup %7276  ;;  %6705 = vmatpush3.bf16.msra.mxu1 %v1096_v28  ;;  %1387 = vrot.lane.b32.xlu1 %v8112_v19, %s7695_s0 }
 0x4a3   :  { %v948_v23 = vmul.f32 %v7277_v29, %v8269_v10  ;;  %v964_v60 = vpack.c.bf16 %v950_v53, %v949_v58 }
 0x4a5   :  { %v963_v59 = vpack.c.bf16 %v948_v23, %v947_v56  ;;  %v1033_v18 = vpop.permute.xlu0 %1032 }
 0x4a6   :  { %1385 = vrot.lane.b32.xlu1 %v8110_v25, %s7696_s11 }
 0x4a7   :  { %6692 = vmatprep.mubr.msk.bf16.mxu0 %vm786_vm4, %v963_v59 }
 0x4a8   :  { %6693 = vmatmul.mubr.msk.bf16.vlgmr.msra.gmra.mxu0 %vm786_vm4, %v964_v60 }
 0x4a9   :  { %6697 = vmatpush3.bf16.msra.mxu0 %v8281_v42 }
 0x4aa   :  { %6698 = vmatprep.subr.bf16.mxu0 %v1033_v18  ;;  %1456 = vrot.lane.b32.xlu1 %v8124_v22, %s7695_s0 }
 0x4ad   :  { %6699 = vmatpush3.bf16.msra.mxu0 %v1033_v18 }
 0x4ae   :  { %1452 = vrot.lane.b32.xlu1 %v8124_v22, %s7696_s11 }
 0x4b2   :  { %1525 = vrot.lane.b32.xlu1 %v8130_v31, %s7695_s0 }
 0x4b6   :  { %1521 = vrot.lane.b32.xlu1 %v8130_v31, %s7696_s11 }
 0x4ba   :  { %1594 = vrot.lane.b32.xlu1 %v8140_v0, %s7695_s0 }
 0x4be   :  { %1592 = vrot.lane.b32.xlu1 %v8138_v34, %s7696_s11 }
 0x4c2   :  { %1843 = vrot.lane.b32.xlu1 %v8112_v19, %s7697_s29 }
 0x4d1   :  { %v909_v25 = vpop.xlane.xlu1 %908 }
 0x4d5   :  { %v906_v6 = vpop.xlane.xlu1 %905  ;;  %v927_v11 = vpop.xlane.xlu0 %926 }
 0x4d6   :  { %7278 = vrcp.f32 %v906_v6 }
 0x4d7   :  { %7280 = vrcp.f32 %v897_v9 }
 0x4d8   :  { %7282 = vrcp.f32 %v903_v49 }
 0x4d9   :  { %v918_v10 = vpop.xlane.xlu1 %917  ;;  %v921_v42 = vpop.xlane.xlu0 %920 }
 0x4dd   :  { %v900_v62 = vpop.xlane.xlu1 %899  ;;  %v930_v63 = vpop.xlane.xlu0 %929 }
 0x4de   :  { %7284 = vrcp.f32 %v900_v62 }
 0x4df   :  { %7286 = vrcp.f32 %v918_v10 }
 0x4e0   :  { %7288 = vrcp.f32 %v909_v25 }
 0x4e1   :  { %v1094_v50 = vpop.permute.xlu1 %1093  ;;  %v1157_v44 = vpop.permute.xlu0 %1156  ;;  %7290 = vrcp.f32 %v8359_v1 }
 0x4e2   :  { %6706 = vmatprep.subr.bf16.mxu1 %v1094_v50  ;;  %6712 = vmatprep.subr.bf16.mxu0 %v1157_v44 }
 0x4e3   :  { %6707 = vmatpush3.bf16.msra.mxu1 %v1094_v50  ;;  %v7279_v19 = vpop.eup %7278 }
 0x4e4   :  { %7137 = vmatprep.subr.bf16.mxu1 %v8391_v32  ;;  %v7281_v35 = vpop.eup %7280  ;;  %v954_v3 = vmul.f32 %v7279_v19, %v8301_v46 }
 0x4e5   :  { %v7283_v24 = vpop.eup %7282  ;;  %v951_v15 = vmul.f32 %v7281_v35, %v8284_v43  ;;  %v1390_v43 = vpop.permute.xlu0 %1389 }
 0x4e6   :  { %v953_v4 = vmul.f32 %v7283_v24, %v8273_v55  ;;  %v1401_v58 = vsel %vm523_vm3, %v1390_v43, 0 }
 0x4e8   :  { %v966_v8 = vpack.c.bf16 %v954_v3, %v953_v4 }
 0x4eb   :  { %v7285_v51 = vpop.eup %7284 }
 0x4ec   :  { %v952_v13 = vmul.f32 %v7285_v51, %v8315_v61  ;;  %v1384_v61 = vpop.permute.xlu0 %1383  ;;  %v7287_v7 = vpop.eup %7286 }
 0x4ed   :  { %v7289_v14 = vpop.eup %7288  ;;  %v958_v26 = vmul.f32 %v7287_v7, %v8307_v33 }
 0x4ee   :  { %v965_v37 = vpack.c.bf16 %v952_v13, %v951_v15  ;;  %v7291_v45 = vpop.eup %7290  ;;  %v955_v38 = vmul.f32 %v7289_v14, %v8299_v21 }
 0x4ef   :  { %v957_v48 = vmul.f32 %v7291_v45, %v8277_v39 }
 0x4f0   :  { %6700 = vmatprep.mubr.msk.bf16.mxu0 %vm786_vm4, %v965_v37  ;;  %v1459_v54 = vpop.permute.xlu0 %1458 }
 0x4f1   :  { %6701 = vmatmul.mubr.msk.bf16.vlgmr.msra.gmra.mxu0 %vm786_vm4, %v966_v8  ;;  %v968_v28 = vpack.c.bf16 %v958_v26, %v957_v48 }
 0x4f2   :  { %6713 = vmatpush3.bf16.msra.mxu0 %v1157_v44  ;;  %v1470_v44 = vsel %vm523_vm3, %v1459_v54, 0 }
 0x512   :  { %v912_v17 = vpop.xlane.xlu1 %911 }
 0x513   :  { %7292 = vrcp.f32 %v912_v17 }
 0x514   :  { %7294 = vrcp.f32 %v930_v63 }
 0x515   :  { %7296 = vrcp.f32 %v921_v42 }
 0x516   :  { %7298 = vrcp.f32 %v927_v11  ;;  %v924_v46 = vpop.xlane.xlu1 %923 }
 0x517   :  { %7300 = vrcp.f32 %v924_v46 }
 0x51a   :  { %v1155_v55 = vpop.permute.xlu1 %1154 }
 0x51b   :  { %6714 = vmatprep.subr.bf16.mxu0 %v1155_v55 }
 0x51c   :  { %6715 = vmatpush3.bf16.msra.mxu0 %v1155_v55 }
 0x51d   :  { %6720 = vmatprep.subr.bf16.mxu0 %v8391_v32 }
 0x51e   :  { %v1388_v59 = vpop.permute.xlu1 %1387 }
 0x51f   :  { %v1398_v60 = vsel %vm523_vm3, %v1388_v59, 0 }
 0x520   :  { %v7293_v52 = vpop.eup %7292 }
 0x521   :  { %v7295_v30 = vpop.eup %7294  ;;  %v956_v41 = vmul.f32 %v7293_v52, %v8345_v40  ;;  %v8412_v40 = vpop.permute.xlu0 %1527 }
 0x522   :  { %v7297_v1 = vpop.eup %7296  ;;  %v962_v29 = vmul.f32 %v7295_v30, %v8321_v47  ;;  %v1386_v11 = vpop.permute.xlu1 %1385  ;;  %v1539_v30 = vsel %vm523_vm3, %v8412_v40, 0 }
 0x523   :  { %v7299_v49 = vpop.eup %7298  ;;  %v967_v12 = vpack.c.bf16 %v956_v41, %v955_v38  ;;  %v959_v53 = vmul.f32 %v7297_v1, %v8313_v5 }
 0x524   :  { %v7301_v36 = vpop.eup %7300  ;;  %v961_v21 = vmul.f32 %v7299_v49, %v8305_v2 }
 0x525   :  { %6708 = vmatprep.mubr.msk.bf16.mxu1 %vm786_vm4, %v967_v12  ;;  %v960_v33 = vmul.f32 %v7301_v36, %v8351_v16 }
 0x526   :  { %6709 = vmatmul.mubr.msk.bf16.vlgmr.msra.gmra.mxu1 %vm786_vm4, %v968_v28  ;;  %v970_v9 = vpack.c.bf16 %v962_v29, %v961_v21  ;;  %v1457_v63 = vpop.permute.xlu1 %1456 }
 0x527   :  { %7138 = vmatpush3.bf16.msra.mxu1 %v8391_v32  ;;  %v969_v39 = vpack.c.bf16 %v960_v33, %v959_v53  ;;  %v1467_v24 = vsel %vm523_vm3, %v1457_v63, 0  ;;  %v6385_v33 = vld [vmem:[%s10457_s3 + $0x18] sm:$0xff]  }
 0x528   :  { %7151 = vmatprep.subr.msk.bf16.mxu1 %vm523_vm3, %v8412_v40  ;;  %v6384_v40 = vld [vmem:[%s10457_s3 + $0x10] sm:$0xff]  }
 0x529   :  { %6716 = vmatprep.mubr.msk.bf16.mxu0 %vm786_vm4, %v969_v39  ;;  %v6365_v39 = vunpack.c.l.bf16 %v6385_v33 }
 0x52a   :  { %6717 = vmatmul.mubr.msk.bf16.vlgmr.msra.gmra.mxu0 %vm786_vm4, %v970_v9  ;;  %v1453_v50 = vpop.permute.xlu1 %1452 }
 0x52b   :  { %6721 = vmatpush3.bf16.msra.mxu0 %v8391_v32  ;;  %v1455_v32 = vpop.permute.xlu0 %1454 }
 0x52c   :  { %7147 = vmatprep.subr.msk.bf16.mxu0 %vm523_vm3, %v1390_v43 }
 0x52e   :  { %v1526_v35 = vpop.permute.xlu1 %1525 }
 0x52f   :  { %v1597_v19 = vpop.permute.xlu0 %1596  ;;  %v1536_v41 = vsel %vm523_vm3, %v1526_v35, 0 }
 0x530   :  { %v1608_v13 = vsel %vm523_vm3, %v1597_v19, 0 }
 0x532   :  { %v1522_v3 = vpop.permute.xlu1 %1521 }
 0x533   :  { %v1524_v51 = vpop.permute.xlu0 %1523 }
 0x536   :  { %v1595_v4 = vpop.permute.xlu1 %1594 }
 0x537   :  { %v1591_v15 = vpop.permute.xlu0 %1590  ;;  %v1605_v37 = vsel %vm523_vm3, %v1595_v4, 0 }
 0x53a   :  { %v1593_v8 = vpop.permute.xlu1 %1592 }
 0x53b   :  { %v1846_v1 = vpop.permute.xlu0 %1845 }
 0x53e   :  { %v1844_v48 = vpop.permute.xlu1 %1843 }
 0x568   :  { %v6694_v5 = vpop.f32.mrf.mxu0 }
 0x56a   :  { %v1017_v47 = vpop.f32.mrf.mxu0 }
 0x56c   :  { %v6695_v2 = vpop.f32.mrf.mxu0 }
 0x56d   :  { %v1216_v23 = vpack.c.bf16 %v6695_v2, %v6694_v5  ;;  %v6361_v5 = vunpack.c.l.bf16 %v6384_v40 }
 0x56e   :  { %v1020_v16 = vpop.f32.mrf.mxu0 }
 0x56f   :  { %v1215_v56 = vpack.c.bf16 %v1020_v16, %v1017_v47 }
 0x571   :  { %6722 = vmatprep.mubr.msk.bf16.mxu0 %vm523_vm3, %v1215_v56 }
 0x572   :  { %6723 = vmatmul.mubr.msk.bf16.vlgmr.msra.gmra.mxu0 %vm523_vm3, %v1216_v23 }
 0x573   :  { %6739 = vmatpush3.bf16.xpose.msra.mxu0 %v1401_v58  ;;  %v8480_v58 = vunpack.c.h.bf16 %v6385_v33 }
 0x574   :  { %7148 = vmatprep.subr.msk.bf16.mxu0 %vm523_vm3, %v1388_v59  ;;  %v8482_v59 = vunpack.c.h.bf16 %v6384_v40 }
 0x57b   :  { %6741 = vmatpush3.bf16.xpose.msra.mxu0 %v1398_v60 }
 0x57c   :  { %7149 = vmatprep.subr.msk.bf16.mxu0 %vm523_vm3, %v1459_v54 }
 0x5b1   :  { %v6702_v18 = vpop.f32.mrf.mxu0 }
 0x5b3   :  { %v1078_v25 = vpop.f32.mrf.mxu0 }
 0x5b5   :  { %v6703_v6 = vpop.f32.mrf.mxu0 }
 0x5b6   :  { %v1218_v62 = vpack.c.bf16 %v6703_v6, %v6702_v18 }
 0x5b7   :  { %v1081_v10 = vpop.f32.mrf.mxu0 }
 0x5b8   :  { %v1217_v42 = vpack.c.bf16 %v1081_v10, %v1078_v25 }
 0x5ba   :  { %6726 = vmatprep.mubr.msk.bf16.mxu0 %vm523_vm3, %v1217_v42 }
 0x5bb   :  { %6727 = vmatmul.mubr.msk.bf16.gmra.mxu0 %vm523_vm3, %v1218_v62 }
 0x5bc   :  { %6742 = vmatprep.mubr.msk.bf16.mxu0 %vm523_vm3, %v1384_v61 }
 0x5c3   :  { %6743 = vmatmul.mubr.msk.bf16.vlgmr.msra.gmra.mxu0 %vm523_vm3, %v1386_v11 }
 0x5c4   :  { %6747 = vmatpush3.bf16.xpose.msra.mxu0 %v1470_v44  ;;  %6750 = vmatprep.mubr.msk.bf16.mxu0 %vm523_vm3, %v1453_v50 }
 0x5c5   :  { %7150 = vmatprep.subr.msk.bf16.mxu0 %vm523_vm3, %v1457_v63 }
 0x5cc   :  { %6749 = vmatpush3.bf16.xpose.msra.mxu0 %v1467_v24 }
 0x5cd   :  { %7153 = vmatprep.subr.msk.bf16.mxu0 %vm523_vm3, %v1597_v19 }
 0x5d3   :  { %6751 = vmatmul.mubr.msk.bf16.vlgmr.msra.gmra.mxu0 %vm523_vm3, %v1455_v32 }
 0x5d4   :  { %6763 = vmatpush3.bf16.xpose.msra.mxu0 %v1608_v13  ;;  %6766 = vmatprep.mubr.msk.bf16.mxu0 %vm523_vm3, %v1591_v15 }
 0x5d5   :  { %7154 = vmatprep.subr.msk.bf16.mxu0 %vm523_vm3, %v1595_v4 }
 0x5dc   :  { %6765 = vmatpush3.bf16.xpose.msra.mxu0 %v1605_v37 }
 0x5e3   :  { %6767 = vmatmul.mubr.msk.bf16.vlgmr.msra.gmra.mxu0 %vm523_vm3, %v1593_v8 }
 0x5e6   :  { %v6710_v17 = vpop.f32.mrf.mxu1 }
 0x5e8   :  { %v1139_v43 = vpop.f32.mrf.mxu1 }
 0x5ea   :  { %v6711_v46 = vpop.f32.mrf.mxu1  ;;  %v6718_v55 = vpop.f32.mrf.mxu0 }
 0x5eb   :  { %v1220_v45 = vpack.c.bf16 %v6711_v46, %v6710_v17 }
 0x5ec   :  { %v1142_v61 = vpop.f32.mrf.mxu1  ;;  %v1200_v7 = vpop.f32.mrf.mxu0 }
 0x5ed   :  { %v1219_v14 = vpack.c.bf16 %v1142_v61, %v1139_v43 }
 0x5ee   :  { %v6719_v52 = vpop.f32.mrf.mxu0 }
 0x5ef   :  { %6730 = vmatprep.mubr.msk.bf16.mxu1 %vm523_vm3, %v1219_v14  ;;  %v1222_v38 = vpack.c.bf16 %v6719_v52, %v6718_v55 }
 0x5f0   :  { %v1203_v26 = vpop.f32.mrf.mxu0  ;;  %6731 = vmatmul.mubr.msk.bf16.vlgmr.msra.gmra.mxu1 %vm523_vm3, %v1220_v45 }
 0x5f1   :  { %v1221_v54 = vpack.c.bf16 %v1203_v26, %v1200_v7  ;;  %6755 = vmatpush3.bf16.xpose.msra.mxu1 %v1539_v30 }
 0x5f2   :  { %7152 = vmatprep.subr.msk.bf16.mxu1 %vm523_vm3, %v1526_v35 }
 0x5f3   :  { %6734 = vmatprep.mubr.msk.bf16.mxu1 %vm523_vm3, %v1221_v54 }
 0x5f8   :  { %6735 = vmatmul.mubr.msk.bf16.gmra.mxu1 %vm523_vm3, %v1222_v38 }
 0x5f9   :  { %6757 = vmatpush3.bf16.xpose.msra.mxu1 %v1536_v41  ;;  %6758 = vmatprep.mubr.msk.bf16.mxu1 %vm523_vm3, %v1522_v3 }
 0x5fa   :  { %6770 = vmatprep.subr.bf16.mxu1 %v1846_v1 }
 0x600   :  { %6759 = vmatmul.mubr.msk.bf16.vlgmr.msra.gmra.mxu1 %vm523_vm3, %v1524_v51 }
 0x601   :  { %6771 = vmatpush3.bf16.msra.mxu1 %v1846_v1 }
 0x602   :  { %6772 = vmatprep.subr.bf16.mxu1 %v1844_v48 }
 0x605   :  { %6773 = vmatpush3.bf16.msra.mxu1 %v1844_v48 }
 0x632   :  { %v8452_v49 = vpop.f32.mrf.mxu0 }
 0x634   :  { %v8454_v12 = vpop.f32.mrf.mxu0 }
 0x636   :  { %v8456_v36 = vpop.f32.mrf.mxu0 }
 0x638   :  { %v8458_v28 = vpop.f32.mrf.mxu0 }
 0x67b   :  { %v8460_v29 = vpop.f32.mrf.mxu0 }
 0x67d   :  { %v8462_v53 = vpop.f32.mrf.mxu0 }
 0x67f   :  { %v8467_v21 = vpop.f32.mrf.mxu0 }
 0x681   :  { %v8472_v9 = vpop.f32.mrf.mxu0 }
 0x683   :  { %v6744_v47 = vpop.f32.mrf.mxu0 }
 0x684   :  { %v8474_v2 = vadd.f32 %v6744_v47, %v6365_v39 }
 0x685   :  { %v1437_v16 = vpop.f32.mrf.mxu0 }
 0x686   :  { %v8476_v56 = vadd.f32 %v6361_v5, %v1437_v16  ;;  %v1665_v23 = vsel %vm786_vm4, %v8474_v2, -inf }
 0x687   :  { %1666 = vmax.xlane.f32.xlu0 %v1665_v23  ;;  %v6745_v60 = vpop.f32.mrf.mxu0 }
 0x688   :  { %v8485_v25 = vadd.f32 %v6745_v60, %v8480_v58  ;;  %v1659_v11 = vsel %vm786_vm4, %v8476_v56, -inf }
 0x689   :  { %v1440_v18 = vpop.f32.mrf.mxu0 }
 0x68a   :  { %v8488_v6 = vadd.f32 %v8482_v59, %v1440_v18  ;;  %v1668_v42 = vsel %vm786_vm4, %v8485_v25, -inf }
 0x68b   :  { %1660 = vmax.xlane.f32.xlu0 %v1659_v11 }
 0x68c   :  { %v1662_v10 = vsel %vm786_vm4, %v8488_v6, -inf }
 0x68d   :  { %1663 = vmax.xlane.f32.xlu1 %v1662_v10 }
 0x68f   :  { %1669 = vmax.xlane.f32.xlu0 %v1668_v42 }
 0x693   :  { %v6752_v62 = vpop.f32.mrf.mxu0 }
 0x694   :  { %v8496_v63 = vadd.f32 %v6752_v62, %v6365_v39 }
 0x695   :  { %v1506_v32 = vpop.f32.mrf.mxu0 }
 0x696   :  { %v1677_v50 = vsel %vm786_vm4, %v8496_v63, -inf  ;;  %v8523_v55 = vadd.f32 %v6361_v5, %v1506_v32 }
 0x697   :  { %1678 = vmax.xlane.f32.xlu0 %v1677_v50  ;;  %v6753_v44 = vpop.f32.mrf.mxu0 }
 0x698   :  { %v8501_v19 = vadd.f32 %v6753_v44, %v8480_v58  ;;  %v1671_v30 = vsel %vm786_vm4, %v8523_v55, -inf }
 0x699   :  { %v1509_v7 = vpop.f32.mrf.mxu0 }
 0x69a   :  { %v1680_v35 = vsel %vm786_vm4, %v8501_v19, -inf  ;;  %v8531_v52 = vadd.f32 %v8482_v59, %v1509_v7 }
 0x69b   :  { %1681 = vmax.xlane.f32.xlu1 %v1680_v35 }
 0x69c   :  { %v1674_v33 = vsel %vm786_vm4, %v8531_v52, -inf }
 0x6a3   :  { %v6768_v38 = vpop.f32.mrf.mxu0 }
 0x6a4   :  { %v8539_v1 = vadd.f32 %v6768_v38, %v6365_v39 }
 0x6a5   :  { %v1644_v47 = vpop.f32.mrf.mxu0 }
 0x6a6   :  { %v8548_v16 = vadd.f32 %v6361_v5, %v1644_v47 }
 0x6a8   :  { %v1695_v60 = vsel %vm786_vm4, %v8548_v16, -inf }
 0x6b0   :  { %v8505_v24 = vpop.f32.mrf.mxu1 }
 0x6b2   :  { %v8507_v51 = vpop.f32.mrf.mxu1 }
 0x6b4   :  { %v8509_v3 = vpop.f32.mrf.mxu1 }
 0x6b6   :  { %v8511_v15 = vpop.f32.mrf.mxu1 }
 0x6b8   :  { %v8513_v13 = vpop.f32.mrf.mxu1 }
 0x6ba   :  { %v8515_v4 = vpop.f32.mrf.mxu1 }
 0x6bc   :  { %v8517_v37 = vpop.f32.mrf.mxu1 }
 0x6be   :  { %v8519_v8 = vpop.f32.mrf.mxu1 }
 0x6c0   :  { %v6760_v17 = vpop.f32.mrf.mxu1 }
 0x6c1   :  { %v8521_v43 = vadd.f32 %v6760_v17, %v6365_v39  ;;  %v1701_v39 = vsel %vm786_vm4, %v8539_v1, -inf }
 0x6c2   :  { %v1575_v46 = vpop.f32.mrf.mxu1 }
 0x6c3   :  { %v1689_v61 = vsel %vm786_vm4, %v8521_v43, -inf  ;;  %v8533_v26 = vadd.f32 %v6361_v5, %v1575_v46  ;;  %v6769_v5 = vpop.f32.mrf.mxu0 }
 0x6c4   :  { %1690 = vmax.xlane.f32.xlu0 %v1689_v61  ;;  %v6761_v14 = vpop.f32.mrf.mxu1  ;;  %v8561_v18 = vadd.f32 %v6769_v5, %v8480_v58 }
 0x6c5   :  { %v8528_v45 = vadd.f32 %v6761_v14, %v8480_v58  ;;  %v1683_v40 = vsel %vm786_vm4, %v8533_v26, -inf  ;;  %v1647_v11 = vpop.f32.mrf.mxu0 }
 0x6c6   :  { %v1578_v41 = vpop.f32.mrf.mxu1  ;;  %v8564_v10 = vadd.f32 %v8482_v59, %v1647_v11  ;;  %v1704_v42 = vsel %vm786_vm4, %v8561_v18, -inf }
 0x6c7   :  { %v1692_v54 = vsel %vm786_vm4, %v8528_v45, -inf  ;;  %v8542_v48 = vadd.f32 %v8482_v59, %v1578_v41 }
 0x6c8   :  { %1672 = vmax.xlane.f32.xlu0 %v1671_v30  ;;  %1693 = vmax.xlane.f32.xlu1 %v1692_v54  ;;  %v1698_v62 = vsel %vm786_vm4, %v8564_v10, -inf }
 0x6c9   :  { %v1686_v23 = vsel %vm786_vm4, %v8542_v48, -inf }
 0x6cc   :  { %1675 = vmax.xlane.f32.xlu1 %v1674_v33  ;;  %1684 = vmax.xlane.f32.xlu0 %v1683_v40 }
 0x6d0   :  { %1687 = vmax.xlane.f32.xlu1 %v1686_v23  ;;  %1702 = vmax.xlane.f32.xlu0 %v1701_v39 }
 0x6d4   :  { %1696 = vmax.xlane.f32.xlu0 %v1695_v60 }
 0x6e1   :  { %1904 = vrot.lane.b32.xlu1 %v8124_v22, %s7697_s29 }
 0x6ea   :  { %1906 = vrot.lane.b32.xlu0 %v8120_v20, %s7697_s29 }
 0x705   :  { %1705 = vmax.xlane.f32.xlu1 %v1704_v42 }
 0x709   :  { %1699 = vmax.xlane.f32.xlu1 %v1698_v62 }
 0x710   :  { %v1667_v22 = vpop.xlane.xlu0 %1666 }
 0x711   :  { %v1709_v32 = vsub.f32 %v8474_v2, %v1667_v22 }
 0x713   :  { %v1727_v20 = vmul.f32 1.442695, %v1709_v32 }
 0x714   :  { %v1661_v50 = vpop.xlane.xlu0 %1660 }
 0x715   :  { %7302 = vpow2.f32 %v1727_v20  ;;  %v1707_v58 = vsub.f32 %v8476_v56, %v1661_v50 }
 0x716   :  { %v1664_v61 = vpop.xlane.xlu1 %1663 }
 0x717   :  { %v1723_v44 = vmul.f32 1.442695, %v1707_v58  ;;  %v1708_v7 = vsub.f32 %v8488_v6, %v1664_v61 }
 0x718   :  { %v1670_v35 = vpop.xlane.xlu0 %1669 }
 0x719   :  { %7304 = vpow2.f32 %v1723_v44  ;;  %v1710_v46 = vsub.f32 %v8485_v25, %v1670_v35 }
 0x71a   :  { %1965 = vrot.lane.b32.xlu1 %v8130_v31, %s7697_s29  ;;  %v1725_v31 = vmul.f32 1.442695, %v1708_v7 }
 0x71b   :  { %v1729_v14 = vmul.f32 1.442695, %v1710_v46 }
 0x71d   :  { %7306 = vpow2.f32 %v1729_v14 }
 0x71e   :  { %7308 = vpow2.f32 %v1725_v31 }
 0x720   :  { %v1679_v25 = vpop.xlane.xlu0 %1678 }
 0x721   :  { %v1713_v6 = vsub.f32 %v8496_v63, %v1679_v25 }
 0x722   :  { %v8574_v59 = vpop.eup %7302 }
 0x723   :  { %v1761_v17 = vsel %vm786_vm4, %v8574_v59, 0.0  ;;  %v1735_v33 = vmul.f32 1.442695, %v1713_v6 }
 0x724   :  { %1762 = vadd.xlane.f32.xlu0 %v1761_v17  ;;  %v1682_v47 = vpop.xlane.xlu1 %1681 }
 0x725   :  { %7310 = vpow2.f32 %v1735_v33  ;;  %v1714_v42 = vsub.f32 %v8501_v19, %v1682_v47 }
 0x726   :  { %v8579_v2 = vpop.eup %7304 }
 0x727   :  { %v1755_v56 = vsel %vm786_vm4, %v8579_v2, 0.0  ;;  %v1737_v50 = vmul.f32 1.442695, %v1714_v42 }
 0x728   :  { %1756 = vadd.xlane.f32.xlu0 %v1755_v56 }
 0x72a   :  { %v8584_v30 = vpop.eup %7306 }
 0x72b   :  { %v1764_v54 = vsel %vm786_vm4, %v8584_v30, 0.0  ;;  %v8588_v38 = vpop.eup %7308 }
 0x72c   :  { %v1758_v41 = vsel %vm786_vm4, %v8588_v38, 0.0 }
 0x732   :  { %v8599_v20 = vpop.eup %7310 }
 0x73e   :  { %1967 = vrot.lane.b32.xlu0 %v8128_v27, %s7697_s29  ;;  %1765 = vadd.xlane.f32.xlu1 %v1764_v54 }
 0x742   :  { %1759 = vadd.xlane.f32.xlu1 %v1758_v41 }
 0x74d   :  { %v1691_v40 = vpop.xlane.xlu0 %1690 }
 0x74e   :  { %v1717_v23 = vsub.f32 %v8521_v43, %v1691_v40 }
 0x750   :  { %v1743_v39 = vmul.f32 1.442695, %v1717_v23 }
 0x751   :  { %v1673_v60 = vpop.xlane.xlu0 %1672  ;;  %v1694_v5 = vpop.xlane.xlu1 %1693 }
 0x752   :  { %7312 = vpow2.f32 %v1743_v39  ;;  %v1711_v27 = vsub.f32 %v8523_v55, %v1673_v60  ;;  %v1718_v43 = vsub.f32 %v8528_v45, %v1694_v5  ;;  %v1773_v55 = vsel %vm786_vm4, %v8599_v20, 0.0 }
 0x754   :  { %v1731_v11 = vmul.f32 1.442695, %v1711_v27  ;;  %v1745_v19 = vmul.f32 1.442695, %v1718_v43 }
 0x755   :  { %v1685_v62 = vpop.xlane.xlu0 %1684  ;;  %v1676_v63 = vpop.xlane.xlu1 %1675 }
 0x756   :  { %v1715_v22 = vsub.f32 %v8533_v26, %v1685_v62  ;;  %7314 = vpow2.f32 %v1731_v11  ;;  %v1712_v26 = vsub.f32 %v8531_v52, %v1676_v63 }
 0x758   :  { %v1739_v32 = vmul.f32 1.442695, %v1715_v22  ;;  %v1733_v7 = vmul.f32 1.442695, %v1712_v26 }
 0x759   :  { %v1703_v58 = vpop.xlane.xlu0 %1702  ;;  %v1688_v46 = vpop.xlane.xlu1 %1687 }
 0x75a   :  { %v1721_v44 = vsub.f32 %v8539_v1, %v1703_v58  ;;  %7316 = vpow2.f32 %v1739_v32  ;;  %v1716_v14 = vsub.f32 %v8542_v48, %v1688_v46 }
 0x75b   :  { %7318 = vpow2.f32 %v1737_v50 }
 0x75c   :  { %v1751_v35 = vmul.f32 1.442695, %v1721_v44 }
 0x75d   :  { %1774 = vadd.xlane.f32.xlu0 %v1773_v55  ;;  %v1697_v17 = vpop.xlane.xlu0 %1696  ;;  %v1905_v62 = vpop.permute.xlu1 %1904 }
 0x75e   :  { %v1719_v61 = vsub.f32 %v8548_v16, %v1697_v17  ;;  %7320 = vpow2.f32 %v1751_v35  ;;  %v1741_v16 = vmul.f32 1.442695, %v1716_v14 }
 0x75f   :  { %v8607_v56 = vpop.eup %7312  ;;  %7322 = vpow2.f32 %v1745_v19 }
 0x760   :  { %v1747_v45 = vmul.f32 1.442695, %v1719_v61  ;;  %v1785_v1 = vsel %vm786_vm4, %v8607_v56, 0.0 }
 0x761   :  { %1786 = vadd.xlane.f32.xlu1 %v1785_v1  ;;  %v8612_v31 = vpop.permute.xlu0 %1906 }
 0x762   :  { %7324 = vpow2.f32 %v1747_v45  ;;  %6778 = vmatprep.subr.bf16.mxu1 %v8612_v31 }
 0x763   :  { %v8615_v52 = vpop.eup %7314  ;;  %7326 = vpow2.f32 %v1733_v7 }
 0x764   :  { %v1767_v54 = vsel %vm786_vm4, %v8615_v52, 0.0  ;;  %7328 = vpow2.f32 %v1741_v16 }
 0x765   :  { %1768 = vadd.xlane.f32.xlu0 %v1767_v54 }
 0x767   :  { %v8619_v25 = vpop.eup %7316 }
 0x768   :  { %v1779_v48 = vsel %vm786_vm4, %v8619_v25, 0.0  ;;  %v8623_v41 = vpop.eup %7318 }
 0x769   :  { %1780 = vadd.xlane.f32.xlu1 %v1779_v48  ;;  %v1776_v33 = vsel %vm786_vm4, %v8623_v41, 0.0 }
 0x76b   :  { %v8625_v6 = vpop.eup %7320 }
 0x76c   :  { %v1797_v40 = vsel %vm786_vm4, %v8625_v6, 0.0  ;;  %v8631_v47 = vpop.eup %7322 }
 0x76d   :  { %1777 = vadd.xlane.f32.xlu1 %v1776_v33  ;;  %1798 = vadd.xlane.f32.xlu0 %v1797_v40  ;;  %v1788_v60 = vsel %vm786_vm4, %v8631_v47, 0.0 }
 0x76f   :  { %v8633_v23 = vpop.eup %7324 }
 0x770   :  { %v1791_v39 = vsel %vm786_vm4, %v8633_v23, 0.0  ;;  %v8639_v5 = vpop.eup %7326 }
 0x771   :  { %1789 = vadd.xlane.f32.xlu1 %v1788_v60  ;;  %1792 = vadd.xlane.f32.xlu0 %v1791_v39  ;;  %v1770_v27 = vsel %vm786_vm4, %v8639_v5, 0.0  ;;  %v8643_v11 = vpop.eup %7328 }
 0x772   :  { %v1782_v42 = vsel %vm786_vm4, %v8643_v11, 0.0 }
 0x775   :  { %1771 = vadd.xlane.f32.xlu1 %v1770_v27 }
 0x779   :  { %1783 = vadd.xlane.f32.xlu1 %v1782_v42 }
 0x78e   :  { %v1706_v22 = vpop.xlane.xlu1 %1705 }
 0x78f   :  { %v1722_v63 = vsub.f32 %v8561_v18, %v1706_v22 }
 0x791   :  { %v1753_v32 = vmul.f32 1.442695, %v1722_v63 }
 0x792   :  { %v1700_v50 = vpop.xlane.xlu1 %1699 }
 0x793   :  { %7330 = vpow2.f32 %v1753_v32  ;;  %v1720_v43 = vsub.f32 %v8564_v10, %v1700_v50 }
 0x795   :  { %v1749_v58 = vmul.f32 1.442695, %v1720_v43 }
 0x796   :  { %v1966_v46 = vpop.permute.xlu1 %1965 }
 0x797   :  { %7332 = vpow2.f32 %v1749_v58 }
 0x7a0   :  { %v8649_v44 = vpop.eup %7330 }
 0x7a1   :  { %v1800_v35 = vsel %vm786_vm4, %v8649_v44, 0.0 }
 0x7a2   :  { %1801 = vadd.xlane.f32.xlu0 %v1800_v35 }
 0x7a4   :  { %v8653_v55 = vpop.eup %7332 }
 0x7a5   :  { %v1794_v19 = vsel %vm786_vm4, %v8653_v55, 0.0 }
 0x7a6   :  { %1795 = vadd.xlane.f32.xlu1 %v1794_v19 }
 0x7ad   :  { %v1763_v18 = vpop.xlane.xlu0 %1762 }
 0x7b1   :  { %v1757_v26 = vpop.xlane.xlu0 %1756 }
 0x7b5   :  { %v1968_v17 = vpop.permute.xlu0 %1967 }
 0x7b6   :  { %6786 = vmatprep.subr.bf16.mxu0 %v1968_v17 }
 0x7b7   :  { %2026 = vrot.lane.b32.xlu1 %v8140_v0, %s7697_s29  ;;  %6787 = vmatpush3.bf16.msra.mxu0 %v1968_v17 }
 0x7b8   :  { %2028 = vrot.lane.b32.xlu0 %v8138_v34, %s7697_s29  ;;  %6788 = vmatprep.subr.bf16.mxu0 %v1966_v46 }
 0x7bb   :  { %6789 = vmatpush3.bf16.msra.mxu0 %v1966_v46 }
 0x7c7   :  { %v1766_v10 = vpop.xlane.xlu1 %1765 }
 0x7c8   :  { %7334 = vrcp.f32 %v1766_v10 }
 0x7c9   :  { %7336 = vrcp.f32 %v1757_v26 }
 0x7ca   :  { %7338 = vrcp.f32 %v1763_v18 }
 0x7cb   :  { %v1760_v61 = vpop.xlane.xlu1 %1759 }
 0x7cc   :  { %7340 = vrcp.f32 %v1760_v61 }
 0x7d5   :  { %v7335_v45 = vpop.eup %7334 }
 0x7d6   :  { %v7337_v1 = vpop.eup %7336  ;;  %v1822_v16 = vmul.f32 %v7335_v45, %v8584_v30 }
 0x7d7   :  { %v7339_v7 = vpop.eup %7338  ;;  %v1819_v0 = vmul.f32 %v7337_v1, %v8579_v2 }
 0x7d8   :  { %v1821_v34 = vmul.f32 %v7339_v7, %v8574_v59 }
 0x7d9   :  { %v7341_v14 = vpop.eup %7340 }
 0x7da   :  { %v1820_v54 = vmul.f32 %v7341_v14, %v8588_v38  ;;  %v1836_v33 = vpack.c.bf16 %v1822_v16, %v1821_v34 }
 0x7dc   :  { %v1835_v48 = vpack.c.bf16 %v1820_v54, %v1819_v0 }
 0x7de   :  { %6774 = vmatprep.mubr.msk.bf16.mxu1 %vm786_vm4, %v1835_v48 }
 0x7df   :  { %6775 = vmatmul.mubr.msk.bf16.vlgmr.msra.gmra.mxu1 %vm786_vm4, %v1836_v33 }
 0x7e0   :  { %6779 = vmatpush3.bf16.msra.mxu1 %v8612_v31 }
 0x7e1   :  { %6780 = vmatprep.subr.bf16.mxu1 %v1905_v62 }
 0x7e4   :  { %6781 = vmatpush3.bf16.msra.mxu1 %v1905_v62 }
 0x7e6   :  { %v1775_v60 = vpop.xlane.xlu0 %1774 }
 0x7ea   :  { %v1787_v40 = vpop.xlane.xlu1 %1786 }
 0x7ee   :  { %v1769_v27 = vpop.xlane.xlu0 %1768 }
 0x7f2   :  { %v1781_v39 = vpop.xlane.xlu1 %1780 }
 0x7f6   :  { %v1778_v30 = vpop.xlane.xlu1 %1777 }
 0x7f7   :  { %7342 = vrcp.f32 %v1778_v30 }
 0x7f8   :  { %7344 = vrcp.f32 %v1769_v27 }
 0x7f9   :  { %7346 = vrcp.f32 %v1775_v60  ;;  %v7655_v60 = vld [vmem:[%s10453_s9 + $0x8] sm:$0xff] }
 0x7fa   :  { %v1790_v2 = vpop.xlane.xlu1 %1789 }
 0x7fe   :  { %v1772_v59 = vpop.xlane.xlu1 %1771 }
 0x7ff   :  { %7348 = vrcp.f32 %v1772_v59  ;;  %v7659_v59 = vld [vmem:[%s10453_s9 + $0x28] sm:$0xff] }
 0x800   :  { %7350 = vrcp.f32 %v1790_v2 }
 0x801   :  { %7352 = vrcp.f32 %v1781_v39 }
 0x802   :  { %7354 = vrcp.f32 %v1787_v40  ;;  %v1784_v38 = vpop.xlane.xlu1 %1783 }
 0x803   :  { %7356 = vrcp.f32 %v1784_v38 }
 0x804   :  { %v7343_v42 = vpop.eup %7342 }
 0x805   :  { %v7345_v31 = vpop.eup %7344  ;;  %v1826_v63 = vmul.f32 %v7343_v42, %v8623_v41  ;;  %v7660_v42 = vld [vmem:[%s10453_s9 + $0x30] sm:$0xff] }
 0x806   :  { %v7347_v22 = vpop.eup %7346  ;;  %v1823_v50 = vmul.f32 %v7345_v31, %v8615_v52  ;;  %v7661_v31 = vld [vmem:[%s10453_s9 + $0x38] sm:$0xff] }
 0x807   :  { %v1825_v35 = vmul.f32 %v7347_v22, %v8599_v20  ;;  %v1799_v20 = vpop.xlane.xlu0 %1798  ;;  %v2244_v22 = vpack.c.bf16 %v7661_v31, %v7660_v42 }
 0x809   :  { %v1838_v17 = vpack.c.bf16 %v1826_v63, %v1825_v35  ;;  %v7663_v63 = vld [vmem:[%s10453_s9 + $0x48] sm:$0xff]  ;;  %v7666_v35 = vld [vmem:[%s10453_s9 + $0x60] sm:$0xff] }
 0x80b   :  { %v1793_v45 = vpop.xlane.xlu0 %1792 }
 0x80c   :  { %v7349_v62 = vpop.eup %7348 }
 0x80d   :  { %v7351_v32 = vpop.eup %7350  ;;  %v1824_v43 = vmul.f32 %v7349_v62, %v8639_v5  ;;  %v7662_v62 = vld [vmem:[%s10453_s9 + $0x40] sm:$0xff] }
 0x80e   :  { %v7353_v58 = vpop.eup %7352  ;;  %v1830_v46 = vmul.f32 %v7351_v32, %v8631_v47  ;;  %v7181_v47 = vld [vmem:[%s10458_s12 + $0x8] sm:$0xff]   ;;  %v2245_v32 = vpack.c.bf16 %v7663_v63, %v7662_v62  ;;  %s10461_s12 = sld [smem:[#allocation21_spill]] }
 0x80f   :  { %v7355_v19 = vpop.eup %7354  ;;  %v1837_v18 = vpack.c.bf16 %v1824_v43, %v1823_v50  ;;  %v1827_v10 = vmul.f32 %v7353_v58, %v8619_v25  ;;  %6802 = vmatprep.subr.bf16.mxu0 %v7181_v47  ;;  %v7664_v50 = vld [vmem:[%s10453_s9 + $0x50] sm:$0xff]  ;;  %v7665_v43 = vld [vmem:[%s10453_s9 + $0x58] sm:$0xff] }
 0x810   :  { %v7357_v26 = vpop.eup %7356  ;;  %v1829_v52 = vmul.f32 %v7355_v19, %v8607_v56  ;;  %v2249_v56 = vld [vmem:[%s10459_s1] sm:$0x3]  ;;  %v2246_v58 = vpack.c.bf16 %v7665_v43, %v7664_v50  ;;  %v7667_v19 = vld [vmem:[%s10453_s9 + $0x68] sm:$0xff]  ;;  %s10465_s1 = sld [smem:[#allocation22_spill]] }
 0x811   :  { %6782 = vmatprep.mubr.msk.bf16.mxu1 %vm786_vm4, %v1837_v18  ;;  %v1828_v41 = vmul.f32 %v7357_v26, %v8643_v11  ;;  %v2275_v7 = vand.u32 %v2249_v56, %v8041_v57  ;;  %v7654_v57 = vld [vmem:[%s10453_s9] sm:$0xff]  ;;  %v2247_v18 = vpack.c.bf16 %v7667_v19, %v7666_v35  ;;  %v7668_v26 = vld [vmem:[%s10453_s9 + $0x70] sm:$0xff] }
 0x812   :  { %6783 = vmatmul.mubr.msk.bf16.vlgmr.msra.gmra.mxu1 %vm786_vm4, %v1838_v17  ;;  %v1840_v61 = vpack.c.bf16 %v1830_v46, %v1829_v52  ;;  %v2241_v30 = vpack.c.bf16 %v7655_v60, %v7654_v57  ;;  %v7669_v17 = vld [vmem:[%s10453_s9 + $0x78] sm:$0xff] }
 0x813   :  { %v1839_v5 = vpack.c.bf16 %v1828_v41, %v1827_v10  ;;  %v2248_v46 = vpack.c.bf16 %v7669_v17, %v7668_v26 }
 0x815   :  { %6790 = vmatprep.mubr.msk.bf16.mxu0 %vm786_vm4, %v1839_v5 }
 0x816   :  { %6791 = vmatmul.mubr.msk.bf16.vlgmr.msra.gmra.mxu0 %vm786_vm4, %v1840_v61 }
 0x817   :  { %6803 = vmatpush3.bf16.msra.mxu0 %v7181_v47 }
 0x82b   :  { %v1802_v25 = vpop.xlane.xlu0 %1801 }
 0x82c   :  { %7358 = vrcp.f32 %v1802_v25 }
 0x82d   :  { %7360 = vrcp.f32 %v1793_v45 }
 0x82e   :  { %7362 = vrcp.f32 %v1799_v20 }
 0x82f   :  { %v1796_v11 = vpop.xlane.xlu1 %1795  ;;  %v2029_v1 = vpop.permute.xlu0 %2028 }
 0x830   :  { %7364 = vrcp.f32 %v1796_v11  ;;  %6794 = vmatprep.subr.bf16.mxu1 %v2029_v1 }
 0x831   :  { %6795 = vmatpush3.bf16.msra.mxu1 %v2029_v1 }
 0x833   :  { %v2027_v14 = vpop.permute.xlu1 %2026 }
 0x834   :  { %6796 = vmatprep.subr.bf16.mxu1 %v2027_v14 }
 0x835   :  { %6797 = vmatpush3.bf16.msra.mxu1 %v2027_v14 }
 0x836   :  { %6820 = vmatprep.subr.bf16.mxu1 %v2275_v7 }
 0x839   :  { %v7359_v16 = vpop.eup %7358 }
 0x83a   :  { %v7361_v0 = vpop.eup %7360  ;;  %v1834_v48 = vmul.f32 %v7359_v16, %v8649_v44 }
 0x83b   :  { %v7363_v54 = vpop.eup %7362  ;;  %v1831_v33 = vmul.f32 %v7361_v0, %v8633_v23  ;;  %v7657_v23 = vld [vmem:[%s10453_s9 + $0x18] sm:$0xff] }
 0x83c   :  { %v1833_v39 = vmul.f32 %v7363_v54, %v8625_v6  ;;  %v7656_v6 = vld [vmem:[%s10453_s9 + $0x10] sm:$0xff] }
 0x83d   :  { %v7365_v34 = vpop.eup %7364  ;;  %v2242_v44 = vpack.c.bf16 %v7657_v23, %v7656_v6 }
 0x83e   :  { %v1832_v40 = vmul.f32 %v7365_v34, %v8653_v55  ;;  %v1842_v2 = vpack.c.bf16 %v1834_v48, %v1833_v39  ;;  %v7658_v55 = vld [vmem:[%s10453_s9 + $0x20] sm:$0xff]  ;;  %s10462_s9 = sld [smem:[#allocation19_spill]] }
 0x83f   :  { %v2243_v38 = vpack.c.bf16 %v7659_v59, %v7658_v55 }
 0x840   :  { %v1841_v27 = vpack.c.bf16 %v1832_v40, %v1831_v33 }
 0x842   :  { %6798 = vmatprep.mubr.msk.bf16.mxu1 %vm786_vm4, %v1841_v27  ;;  %v8760_v27 = vld [vmem:[%s10460_s2] ss:$0 sm:$0xff] }
 0x843   :  { %6799 = vmatmul.mubr.msk.bf16.vlgmr.msra.gmra.mxu1 %vm786_vm4, %v1842_v2  ;;  %v1360_v23 = vadd.f32 %v8452_v49, %v8760_v27  ;;  %v1359_v62 = vadd.f32 %v8760_v27, %v8458_v28 }
 0x844   :  { %6821 = vmatpush3.bf16.msra.mxu1 %v2275_v7  ;;  %6822 = vmatprep.mubr.msk.bf16.mxu1 %vm109_vm0, %v2241_v30 }
 0x84b   :  { %6823 = vmatmul.mubr.msk.bf16.vlgmr.msra.gmra.mxu1 %vm109_vm0, %v2242_v44  ;;  %v1358_v44 = vadd.f32 %v8760_v27, %v8454_v12 }
 0x84c   :  { %6826 = vmatprep.mubr.msk.bf16.mxu1 %vm109_vm0, %v2243_v38 }
 0x853   :  { %6827 = vmatmul.mubr.msk.bf16.gmra.mxu1 %vm109_vm0, %v2244_v22  ;;  %v1361_v22 = vadd.f32 %v8456_v36, %v8760_v27 }
 0x854   :  { %6830 = vmatprep.mubr.msk.bf16.mxu1 %vm109_vm0, %v2245_v32 }
 0x85b   :  { %6831 = vmatmul.mubr.msk.bf16.gmra.mxu1 %vm109_vm0, %v2246_v58 }
 0x85c   :  { %6834 = vmatprep.mubr.msk.bf16.mxu1 %vm109_vm0, %v2247_v18 }
 0x863   :  { %6835 = vmatmul.mubr.msk.bf16.gmra.mxu1 %vm109_vm0, %v2248_v46 }
 0x89f   :  { %v6776_v10 = vpop.f32.mrf.mxu1 }
 0x8a1   :  { %v1889_v41 = vpop.f32.mrf.mxu1 }
 0x8a3   :  { %v6777_v52 = vpop.f32.mrf.mxu1 }
 0x8a4   :  { %v2088_v20 = vpack.c.bf16 %v6777_v52, %v6776_v10  ;;  %v1364_v52 = vadd.f32 %v8460_v29, %v8760_v27 }
 0x8a5   :  { %v1892_v5 = vpop.f32.mrf.mxu1 }
 0x8a6   :  { %v2087_v61 = vpack.c.bf16 %v1892_v5, %v1889_v41  ;;  %v1362_v5 = vadd.f32 %v8760_v27, %v8462_v53 }
 0x8a8   :  { %6804 = vmatprep.mubr.msk.bf16.mxu0 %vm523_vm3, %v2087_v61 }
 0x8a9   :  { %6805 = vmatmul.mubr.msk.bf16.vlgmr.msra.gmra.mxu0 %vm523_vm3, %v2088_v20 }
 0x8d2   :  { %v6784_v47 = vpop.f32.mrf.mxu1 }
 0x8d4   :  { %v1950_v45 = vpop.f32.mrf.mxu1 }
 0x8d6   :  { %v6785_v25 = vpop.f32.mrf.mxu1  ;;  %v6792_v56 = vpop.f32.mrf.mxu0 }
 0x8d7   :  { %v2090_v14 = vpack.c.bf16 %v6785_v25, %v6784_v47  ;;  %v1365_v25 = vadd.f32 %v8467_v21, %v8760_v27  ;;  %v1368_v21 = vadd.f32 %v8505_v24, %v8760_v27  ;;  %v1369_v24 = vadd.f32 %v8509_v3, %v8760_v27 }
 0x8d8   :  { %v1953_v11 = vpop.f32.mrf.mxu1  ;;  %v2011_v1 = vpop.f32.mrf.mxu0 }
 0x8d9   :  { %v2089_v7 = vpack.c.bf16 %v1953_v11, %v1950_v45  ;;  %v1363_v11 = vadd.f32 %v8760_v27, %v8472_v9 }
 0x8da   :  { %v6793_v16 = vpop.f32.mrf.mxu0 }
 0x8db   :  { %6808 = vmatprep.mubr.msk.bf16.mxu0 %vm523_vm3, %v2089_v7  ;;  %v2092_v34 = vpack.c.bf16 %v6793_v16, %v6792_v56 }
 0x8dc   :  { %v2014_v0 = vpop.f32.mrf.mxu0  ;;  %6809 = vmatmul.mubr.msk.bf16.gmra.mxu0 %vm523_vm3, %v2090_v14 }
 0x8dd   :  { %v2091_v54 = vpack.c.bf16 %v2014_v0, %v2011_v1 }
 0x8df   :  { %6812 = vmatprep.mubr.msk.bf16.mxu0 %vm523_vm3, %v2091_v54 }
 0x8e4   :  { %6813 = vmatmul.mubr.msk.bf16.gmra.mxu0 %vm523_vm3, %v2092_v34  ;;  %v1366_v34 = vadd.f32 %v8760_v27, %v8507_v51  ;;  %v1367_v51 = vadd.f32 %v8760_v27, %v8511_v15 }
 0x903   :  { %v6800_v48 = vpop.f32.mrf.mxu1 }
 0x905   :  { %v2072_v33 = vpop.f32.mrf.mxu1 }
 0x907   :  { %v6801_v40 = vpop.f32.mrf.mxu1 }
 0x908   :  { %v2094_v60 = vpack.c.bf16 %v6801_v40, %v6800_v48 }
 0x909   :  { %v2075_v39 = vpop.f32.mrf.mxu1 }
 0x90a   :  { %v2093_v57 = vpack.c.bf16 %v2075_v39, %v2072_v33 }
 0x90b   :  { %v6824_v30 = vpop.f32.mrf.mxu1 }
 0x90c   :  { %6816 = vmatprep.mubr.msk.bf16.mxu0 %vm523_vm3, %v2093_v57 }
 0x90d   :  { %6817 = vmatmul.mubr.msk.bf16.gmra.mxu0 %vm523_vm3, %v2094_v60  ;;  %v2311_v2 = vpop.f32.mrf.mxu1 }
 0x90f   :  { %v6825_v59 = vpop.f32.mrf.mxu1 }
 0x911   :  { %v2314_v50 = vpop.f32.mrf.mxu1 }
 0x913   :  { %v6828_v26 = vpop.f32.mrf.mxu1 }
 0x915   :  { %v2327_v17 = vpop.f32.mrf.mxu1 }
 0x917   :  { %v6829_v46 = vpop.f32.mrf.mxu1 }
 0x919   :  { %v2330_v10 = vpop.f32.mrf.mxu1 }
 0x91b   :  { %v6832_v20 = vpop.f32.mrf.mxu1 }
 0x91d   :  { %v2343_v16 = vpop.f32.mrf.mxu1 }
 0x91f   :  { %v6833_v40 = vpop.f32.mrf.mxu1 }
 0x969   :  { %v6806_v6 = vpop.f32.mrf.mxu0 }
 0x96a   :  { %v2227_v38 = vadd.f32 %v6806_v6, %v1360_v23 }
 0x96b   :  { %v2162_v55 = vpop.f32.mrf.mxu0 }
 0x96c   :  { %v2225_v42 = vadd.f32 %v2162_v55, %v1358_v44  ;;  %v8772_v43 = vadd.f32 %v6824_v30, %v2227_v38  ;;  %v2346_v44 = vpop.f32.mrf.mxu1 }
 0x96d   :  { %v6807_v31 = vpop.f32.mrf.mxu0 }
 0x96e   :  { %v8770_v63 = vadd.f32 %v2311_v2, %v2225_v42  ;;  %v2228_v49 = vadd.f32 %v6807_v31, %v1361_v22  ;;  %v2382_v28 = vsel %vm786_vm4, %v8772_v43, 0.0 }
 0x96f   :  { %v2165_v32 = vpop.f32.mrf.mxu0 }
 0x970   :  { %v2226_v58 = vadd.f32 %v2165_v32, %v1359_v62  ;;  %v2376_v12 = vsel %vm786_vm4, %v8770_v63, 0.0  ;;  %v8778_v19 = vadd.f32 %v6825_v59, %v2228_v49 }
 0x971   :  { %2377 = vadd.xlane.f32.xlu0 %v2376_v12  ;;  %v1372_v12 = vadd.f32 %v8513_v13, %v8760_v27 }
 0x972   :  { %v8776_v35 = vadd.f32 %v2314_v50, %v2226_v58  ;;  %v2385_v18 = vsel %vm786_vm4, %v8778_v19, 0.0  ;;  %v6836_v50 = vpop.f32.mrf.mxu1 }
 0x974   :  { %v2379_v36 = vsel %vm786_vm4, %v8776_v35, 0.0  ;;  %v2359_v58 = vpop.f32.mrf.mxu1 }
 0x975   :  { %2380 = vadd.xlane.f32.xlu1 %v2379_v36  ;;  %2383 = vadd.xlane.f32.xlu0 %v2382_v28  ;;  %v1370_v36 = vadd.f32 %v8760_v27, %v8515_v4 }
 0x979   :  { %2386 = vadd.xlane.f32.xlu0 %v2385_v18 }
 0x99c   :  { %v6810_v41 = vpop.f32.mrf.mxu0 }
 0x99d   :  { %v2231_v47 = vadd.f32 %v6810_v41, %v1364_v52  ;;  %v1371_v41 = vadd.f32 %v8760_v27, %v8519_v8 }
 0x99e   :  { %v2178_v61 = vpop.f32.mrf.mxu0 }
 0x99f   :  { %v2229_v45 = vadd.f32 %v2178_v61, %v1362_v5  ;;  %v8796_v29 = vadd.f32 %v6828_v26, %v2231_v47 }
 0x9a0   :  { %v6811_v56 = vpop.f32.mrf.mxu0 }
 0x9a1   :  { %v8794_v1 = vadd.f32 %v2327_v17, %v2229_v45  ;;  %v2232_v7 = vadd.f32 %v6811_v56, %v1365_v25  ;;  %v2394_v30 = vsel %vm786_vm4, %v8796_v29, 0.0 }
 0x9a2   :  { %v2181_v14 = vpop.f32.mrf.mxu0 }
 0x9a3   :  { %v2230_v0 = vadd.f32 %v2181_v14, %v1363_v11  ;;  %v2388_v53 = vsel %vm786_vm4, %v8794_v1, 0.0  ;;  %v8806_v48 = vadd.f32 %v6829_v46, %v2232_v7  ;;  %v6837_v46 = vpop.f32.mrf.mxu1 }
 0x9a4   :  { %v6814_v54 = vpop.f32.mrf.mxu0  ;;  %2389 = vadd.xlane.f32.xlu0 %v2388_v53 }
 0x9a5   :  { %v8804_v9 = vadd.f32 %v2330_v10, %v2230_v0  ;;  %v2235_v39 = vadd.f32 %v6814_v54, %v1368_v21  ;;  %v2397_v55 = vsel %vm786_vm4, %v8806_v48, 0.0  ;;  %v1373_v10 = vadd.f32 %v8517_v37, %v8760_v27  ;;  %v2362_v47 = vpop.f32.mrf.mxu1 }
 0x9a6   :  { %v2194_v33 = vpop.f32.mrf.mxu0 }
 0x9a7   :  { %v2233_v57 = vadd.f32 %v2194_v33, %v1366_v34  ;;  %v2391_v60 = vsel %vm786_vm4, %v8804_v9, 0.0  ;;  %v8820_v59 = vadd.f32 %v6832_v20, %v2235_v39 }
 0x9a8   :  { %v6815_v2 = vpop.f32.mrf.mxu0  ;;  %2392 = vadd.xlane.f32.xlu1 %v2391_v60  ;;  %2395 = vadd.xlane.f32.xlu0 %v2394_v30 }
 0x9a9   :  { %v8816_v6 = vadd.f32 %v2343_v16, %v2233_v57  ;;  %v2236_v38 = vadd.f32 %v6815_v2, %v1369_v24  ;;  %v2406_v62 = vsel %vm786_vm4, %v8820_v59, 0.0 }
 0x9aa   :  { %v2197_v23 = vpop.f32.mrf.mxu0 }
 0x9ab   :  { %v2234_v42 = vadd.f32 %v2197_v23, %v1367_v51  ;;  %v2400_v31 = vsel %vm786_vm4, %v8816_v6, 0.0  ;;  %v8826_v22 = vadd.f32 %v6833_v40, %v2236_v38 }
 0x9ac   :  { %2398 = vadd.xlane.f32.xlu1 %v2397_v55  ;;  %2401 = vadd.xlane.f32.xlu0 %v2400_v31  ;;  %v7183_v55 = vld [vmem:[%s10461_s12] sm:$0xff]  }
 0x9ad   :  { %v8824_v3 = vadd.f32 %v2346_v44, %v2234_v42  ;;  %v2409_v32 = vsel %vm786_vm4, %v8826_v22, 0.0  ;;  %v7182_v44 = vld [vmem:[%s10461_s12 + $0x8] sm:$0xff]  }
 0x9ae   :  { %6838 = vmatprep.subr.bf16.mxu0 %v7182_v44 }
 0x9af   :  { %v2403_v15 = vsel %vm786_vm4, %v8824_v3, 0.0  ;;  %6839 = vmatpush3.bf16.msra.mxu0 %v7182_v44 }
 0x9b0   :  { %2404 = vadd.xlane.f32.xlu1 %v2403_v15  ;;  %2407 = vadd.xlane.f32.xlu0 %v2406_v62 }
 0x9b1   :  { %6840 = vmatprep.subr.bf16.mxu0 %v7183_v55 }
 0x9b3   :  { %6841 = vmatpush3.bf16.msra.mxu0 %v7183_v55 }
 0x9b4   :  { %2410 = vadd.xlane.f32.xlu1 %v2409_v32 }
 0x9cd   :  { %v6818_v49 = vpop.f32.mrf.mxu0 }
 0x9ce   :  { %v2239_v18 = vadd.f32 %v6818_v49, %v1372_v12 }
 0x9cf   :  { %v2210_v28 = vpop.f32.mrf.mxu0 }
 0x9d0   :  { %v2237_v26 = vadd.f32 %v2210_v28, %v1370_v36  ;;  %v8844_v61 = vadd.f32 %v6836_v50, %v2239_v18 }
 0x9d1   :  { %v6819_v17 = vpop.f32.mrf.mxu0 }
 0x9d2   :  { %v8842_v52 = vadd.f32 %v2359_v58, %v2237_v26  ;;  %v2240_v13 = vadd.f32 %v6819_v17, %v1373_v10  ;;  %v2418_v37 = vsel %vm786_vm4, %v8844_v61, 0.0 }
 0x9d3   :  { %v2213_v5 = vpop.f32.mrf.mxu0 }
 0x9d4   :  { %v2238_v20 = vadd.f32 %v2213_v5, %v1371_v41  ;;  %v2412_v4 = vsel %vm786_vm4, %v8842_v52, 0.0  ;;  %v8850_v25 = vadd.f32 %v6837_v46, %v2240_v13 }
 0x9d5   :  { %2413 = vadd.xlane.f32.xlu0 %v2412_v4 }
 0x9d6   :  { %v8848_v45 = vadd.f32 %v2362_v47, %v2238_v20  ;;  %v2421_v27 = vsel %vm786_vm4, %v8850_v25, 0.0 }
 0x9d8   :  { %v2415_v8 = vsel %vm786_vm4, %v8848_v45, 0.0 }
 0x9d9   :  { %2419 = vadd.xlane.f32.xlu0 %v2418_v37  ;;  %2416 = vadd.xlane.f32.xlu1 %v2415_v8 }
 0x9dd   :  { %2422 = vadd.xlane.f32.xlu1 %v2421_v27 }
 0x9fa   :  { %v2378_v56 = vpop.xlane.xlu0 %2377 }
 0x9fb   :  { %v2425_v11 = vmul.f32 0.03125, %v2378_v56 }
 0x9fd   :  { %v8859_v7 = vsub.f32 %v8770_v63, %v2425_v11 }
 0x9fe   :  { %v2381_v14 = vpop.xlane.xlu1 %2380  ;;  %v2384_v16 = vpop.xlane.xlu0 %2383 }
 0x9ff   :  { %v2426_v0 = vmul.f32 0.03125, %v2381_v14  ;;  %v2427_v53 = vmul.f32 0.03125, %v2384_v16  ;;  %v2457_v54 = vmul.f32 %v8859_v7, %v8859_v7 }
 0xa01   :  { %v8864_v21 = vsub.f32 %v8776_v35, %v2426_v0  ;;  %v8867_v34 = vsub.f32 %v8772_v43, %v2427_v53  ;;  %v2473_v33 = vsel %vm786_vm4, %v2457_v54, 0.0 }
 0xa02   :  { %v2387_v40 = vpop.xlane.xlu0 %2386  ;;  %2474 = vadd.xlane.f32.xlu0 %v2473_v33 }
 0xa03   :  { %v2428_v39 = vmul.f32 0.03125, %v2387_v40  ;;  %v2459_v57 = vmul.f32 %v8867_v34, %v8867_v34  ;;  %v2458_v60 = vmul.f32 %v8864_v21, %v8864_v21 }
 0xa05   :  { %v8875_v30 = vsub.f32 %v8778_v19, %v2428_v39  ;;  %v2479_v2 = vsel %vm786_vm4, %v2459_v57, 0.0  ;;  %v2476_v24 = vsel %vm786_vm4, %v2458_v60, 0.0 }
 0xa06   :  { %2480 = vadd.xlane.f32.xlu0 %v2479_v2  ;;  %2477 = vadd.xlane.f32.xlu1 %v2476_v24 }
 0xa07   :  { %v2460_v51 = vmul.f32 %v8875_v30, %v8875_v30 }
 0xa09   :  { %v2482_v23 = vsel %vm786_vm4, %v2460_v51, 0.0 }
 0xa0a   :  { %2483 = vadd.xlane.f32.xlu1 %v2482_v23 }
 0xa2d   :  { %v2390_v38 = vpop.xlane.xlu0 %2389 }
 0xa2e   :  { %v2429_v42 = vmul.f32 0.03125, %v2390_v38 }
 0xa30   :  { %v8889_v31 = vsub.f32 %v8794_v1, %v2429_v42 }
 0xa31   :  { %v2393_v15 = vpop.xlane.xlu1 %2392  ;;  %v2396_v62 = vpop.xlane.xlu0 %2395 }
 0xa32   :  { %v2430_v32 = vmul.f32 0.03125, %v2393_v15  ;;  %v2431_v50 = vmul.f32 0.03125, %v2396_v62  ;;  %v2461_v49 = vmul.f32 %v8889_v31, %v8889_v31 }
 0xa34   :  { %v8894_v58 = vsub.f32 %v8804_v9, %v2430_v32  ;;  %v8897_v12 = vsub.f32 %v8796_v29, %v2431_v50  ;;  %v2485_v36 = vsel %vm786_vm4, %v2461_v49, 0.0 }
 0xa35   :  { %v2399_v28 = vpop.xlane.xlu1 %2398  ;;  %v2402_v18 = vpop.xlane.xlu0 %2401  ;;  %2486 = vadd.xlane.f32.xlu0 %v2485_v36 }
 0xa36   :  { %v2432_v26 = vmul.f32 0.03125, %v2399_v28  ;;  %v2433_v17 = vmul.f32 0.03125, %v2402_v18  ;;  %v2463_v46 = vmul.f32 %v8897_v12, %v8897_v12  ;;  %v2462_v10 = vmul.f32 %v8894_v58, %v8894_v58 }
 0xa38   :  { %v8905_v41 = vsub.f32 %v8806_v48, %v2432_v26  ;;  %v8908_v5 = vsub.f32 %v8816_v6, %v2433_v17  ;;  %v2491_v13 = vsel %vm786_vm4, %v2463_v46, 0.0  ;;  %v2488_v20 = vsel %vm786_vm4, %v2462_v10, 0.0 }
 0xa39   :  { %v2405_v4 = vpop.xlane.xlu1 %2404  ;;  %v2408_v47 = vpop.xlane.xlu0 %2407  ;;  %2492 = vadd.xlane.f32.xlu0 %v2491_v13  ;;  %2489 = vadd.xlane.f32.xlu1 %v2488_v20 }
 0xa3a   :  { %v2434_v37 = vmul.f32 0.03125, %v2405_v4  ;;  %v2435_v8 = vmul.f32 0.03125, %v2408_v47  ;;  %v2465_v27 = vmul.f32 %v8908_v5, %v8908_v5  ;;  %v2464_v56 = vmul.f32 %v8905_v41, %v8905_v41 }
 0xa3c   :  { %v8917_v11 = vsub.f32 %v8824_v3, %v2434_v37  ;;  %v8920_v14 = vsub.f32 %v8820_v59, %v2435_v8  ;;  %v2497_v16 = vsel %vm786_vm4, %v2465_v27, 0.0  ;;  %v2494_v0 = vsel %vm786_vm4, %v2464_v56, 0.0 }
 0xa3d   :  { %v2411_v53 = vpop.xlane.xlu1 %2410  ;;  %2498 = vadd.xlane.f32.xlu0 %v2497_v16  ;;  %2495 = vadd.xlane.f32.xlu1 %v2494_v0 }
 0xa3e   :  { %v2436_v54 = vmul.f32 0.03125, %v2411_v53  ;;  %v2467_v33 = vmul.f32 %v8920_v14, %v8920_v14  ;;  %v2466_v40 = vmul.f32 %v8917_v11, %v8917_v11 }
 0xa40   :  { %v8929_v39 = vsub.f32 %v8826_v22, %v2436_v54  ;;  %v2503_v57 = vsel %vm786_vm4, %v2467_v33, 0.0  ;;  %v2500_v60 = vsel %vm786_vm4, %v2466_v40, 0.0 }
 0xa41   :  { %2504 = vadd.xlane.f32.xlu0 %v2503_v57  ;;  %2501 = vadd.xlane.f32.xlu1 %v2500_v60 }
 0xa42   :  { %v2468_v2 = vmul.f32 %v8929_v39, %v8929_v39 }
 0xa44   :  { %v2506_v24 = vsel %vm786_vm4, %v2468_v2, 0.0  ;;  %v8964_v2 = vld [vmem:[%s10462_s9] ss:$0 sm:$0xff] }
 0xa45   :  { %2507 = vadd.xlane.f32.xlu1 %v2506_v24 }
 0xa5e   :  { %v2414_v51 = vpop.xlane.xlu0 %2413 }
 0xa5f   :  { %v2437_v23 = vmul.f32 0.03125, %v2414_v51 }
 0xa61   :  { %v8937_v44 = vsub.f32 %v8842_v52, %v2437_v23 }
 0xa62   :  { %v2420_v55 = vpop.xlane.xlu0 %2419  ;;  %v2417_v38 = vpop.xlane.xlu1 %2416 }
 0xa63   :  { %v2439_v42 = vmul.f32 0.03125, %v2420_v55  ;;  %v2438_v15 = vmul.f32 0.03125, %v2417_v38  ;;  %v2469_v62 = vmul.f32 %v8937_v44, %v8937_v44 }
 0xa65   :  { %v8942_v32 = vsub.f32 %v8844_v61, %v2439_v42  ;;  %v8945_v50 = vsub.f32 %v8848_v45, %v2438_v15  ;;  %v2509_v49 = vsel %vm786_vm4, %v2469_v62, 0.0  ;;  %v8972_v42 = vld [vmem:[%s10463_s7] ss:$0 sm:$0xff] }
 0xa66   :  { %2510 = vadd.xlane.f32.xlu0 %v2509_v49  ;;  %v2423_v36 = vpop.xlane.xlu1 %2422 }
 0xa67   :  { %v2440_v28 = vmul.f32 0.03125, %v2423_v36  ;;  %v2471_v18 = vmul.f32 %v8942_v32, %v8942_v32  ;;  %v2470_v26 = vmul.f32 %v8945_v50, %v8945_v50 }
 0xa69   :  { %v8953_v17 = vsub.f32 %v8850_v25, %v2440_v28  ;;  %v2515_v46 = vsel %vm786_vm4, %v2471_v18, 0.0  ;;  %v2512_v10 = vsel %vm786_vm4, %v2470_v26, 0.0 }
 0xa6a   :  { %2516 = vadd.xlane.f32.xlu0 %v2515_v46  ;;  %2513 = vadd.xlane.f32.xlu1 %v2512_v10 }
 0xa6b   :  { %v2472_v13 = vmul.f32 %v8953_v17, %v8953_v17 }
 0xa6d   :  { %v2518_v20 = vsel %vm786_vm4, %v2472_v13, 0.0 }
 0xa6e   :  { %2519 = vadd.xlane.f32.xlu1 %v2518_v20 }
 0xa8b   :  { %v2475_v4 = vpop.xlane.xlu0 %2474 }
 0xa8c   :  { %v2521_v47 = vmul.f32 0.03125, %v2475_v4 }
 0xa8e   :  { %v2537_v37 = vadd.f32 1e-05, %v2521_v47 }
 0xa8f   :  { %v2481_v8 = vpop.xlane.xlu0 %2480  ;;  %v2478_v27 = vpop.xlane.xlu1 %2477 }
 0xa90   :  { %7366 = vrsqrt.f32 %v2537_v37  ;;  %v2523_v56 = vmul.f32 0.03125, %v2481_v8  ;;  %v2522_v16 = vmul.f32 0.03125, %v2478_v27 }
 0xa92   :  { %v2539_v0 = vadd.f32 1e-05, %v2523_v56  ;;  %v2538_v53 = vadd.f32 1e-05, %v2522_v16 }
 0xa93   :  { %v2484_v54 = vpop.xlane.xlu1 %2483 }
 0xa94   :  { %7368 = vrsqrt.f32 %v2539_v0  ;;  %v2524_v33 = vmul.f32 0.03125, %v2484_v54 }
 0xa95   :  { %7370 = vrsqrt.f32 %v2538_v53 }
 0xa96   :  { %v2540_v40 = vadd.f32 1e-05, %v2524_v33 }
 0xa98   :  { %7372 = vrsqrt.f32 %v2540_v40 }
 0xa9d   :  { %v7367_v57 = vpop.eup %7366 }
 0xa9e   :  { %v2569_v60 = vmul.f32 %v7367_v57, %v8859_v7 }
 0xaa0   :  { %v2591_v38 = vmul.f32 %v8964_v2, %v2569_v60 }
 0xaa1   :  { %v7369_v24 = vpop.eup %7368 }
 0xaa2   :  { %v7371_v51 = vpop.eup %7370  ;;  %v2571_v23 = vmul.f32 %v7369_v24, %v8867_v34  ;;  %v2613_v36 = vadd.f32 %v8972_v42, %v2591_v38 }
 0xaa3   :  { %v2570_v55 = vmul.f32 %v7371_v51, %v8864_v21 }
 0xaa4   :  { %v2593_v62 = vmul.f32 %v8964_v2, %v2571_v23 }
 0xaa5   :  { %v7373_v15 = vpop.eup %7372  ;;  %v2592_v7 = vmul.f32 %v8964_v2, %v2570_v55 }
 0xaa6   :  { %v2572_v49 = vmul.f32 %v7373_v15, %v8875_v30  ;;  %v2615_v18 = vadd.f32 %v8972_v42, %v2593_v62 }
 0xaa7   :  { %v2614_v34 = vadd.f32 %v8972_v42, %v2592_v7 }
 0xaa8   :  { %v2594_v21 = vmul.f32 %v8964_v2, %v2572_v49 }
 0xaa9   :  { %v2629_v28 = vpack.c.bf16 %v2614_v34, %v2613_v36 }
 0xaaa   :  { %v2616_v26 = vadd.f32 %v8972_v42, %v2594_v21 }
 0xaab   :  { %6842 = vmatprep.mubr.msk.bf16.mxu0 %vm786_vm4, %v2629_v28 }
 0xaac   :  { %v2630_v46 = vpack.c.bf16 %v2616_v26, %v2615_v18 }
 0xaae   :  { %6843 = vmatmul.mubr.msk.bf16.vlgmr.msra.gmra.mxu0 %vm786_vm4, %v2630_v46 }
 0xabe   :  { %v2487_v10 = vpop.xlane.xlu0 %2486 }
 0xabf   :  { %v2525_v13 = vmul.f32 0.03125, %v2487_v10 }
 0xac1   :  { %v2541_v20 = vadd.f32 1e-05, %v2525_v13 }
 0xac2   :  { %v2493_v30 = vpop.xlane.xlu0 %2492  ;;  %v2490_v4 = vpop.xlane.xlu1 %2489 }
 0xac3   :  { %7374 = vrsqrt.f32 %v2541_v20  ;;  %v2527_v47 = vmul.f32 0.03125, %v2493_v30  ;;  %v2526_v37 = vmul.f32 0.03125, %v2490_v4 }
 0xac5   :  { %v2543_v8 = vadd.f32 1e-05, %v2527_v47  ;;  %v2542_v27 = vadd.f32 1e-05, %v2526_v37 }
 0xac6   :  { %v2499_v56 = vpop.xlane.xlu0 %2498  ;;  %v2496_v16 = vpop.xlane.xlu1 %2495 }
 0xac7   :  { %7376 = vrsqrt.f32 %v2543_v8  ;;  %v2529_v0 = vmul.f32 0.03125, %v2499_v56  ;;  %v2528_v53 = vmul.f32 0.03125, %v2496_v16 }
 0xac8   :  { %7378 = vrsqrt.f32 %v2542_v27 }
 0xac9   :  { %v2545_v54 = vadd.f32 1e-05, %v2529_v0  ;;  %v2544_v33 = vadd.f32 1e-05, %v2528_v53 }
 0xaca   :  { %v2505_v40 = vpop.xlane.xlu0 %2504  ;;  %v2502_v57 = vpop.xlane.xlu1 %2501 }
 0xacb   :  { %7380 = vrsqrt.f32 %v2545_v54  ;;  %v2531_v60 = vmul.f32 0.03125, %v2505_v40  ;;  %v2530_v24 = vmul.f32 0.03125, %v2502_v57 }
 0xacc   :  { %7382 = vrsqrt.f32 %v2544_v33 }
 0xacd   :  { %v2547_v51 = vadd.f32 1e-05, %v2531_v60  ;;  %v2546_v23 = vadd.f32 1e-05, %v2530_v24 }
 0xace   :  { %v2508_v55 = vpop.xlane.xlu1 %2507 }
 0xacf   :  { %7384 = vrsqrt.f32 %v2547_v51  ;;  %v2532_v38 = vmul.f32 0.03125, %v2508_v55 }
 0xad0   :  { %v7375_v15 = vpop.eup %7374  ;;  %7386 = vrsqrt.f32 %v2546_v23 }
 0xad1   :  { %v2548_v7 = vadd.f32 1e-05, %v2532_v38  ;;  %v2573_v62 = vmul.f32 %v7375_v15, %v8889_v31 }
 0xad3   :  { %7388 = vrsqrt.f32 %v2548_v7  ;;  %v2595_v34 = vmul.f32 %v8964_v2, %v2573_v62 }
 0xad4   :  { %v7377_v49 = vpop.eup %7376 }
 0xad5   :  { %v7379_v36 = vpop.eup %7378  ;;  %v2575_v28 = vmul.f32 %v7377_v49, %v8897_v12  ;;  %v2617_v10 = vadd.f32 %v8972_v42, %v2595_v34 }
 0xad6   :  { %v2574_v21 = vmul.f32 %v7379_v36, %v8894_v58  ;;  %v7184_v36 = vld [vmem:[%s10464_s5 + $0x38] sm:$0xff]  }
 0xad7   :  { %v2597_v31 = vmul.f32 %v8964_v2, %v2575_v28  ;;  %6858 = vmatprep.subr.bf16.mxu1 %v7184_v36 }
 0xad8   :  { %v7381_v18 = vpop.eup %7380  ;;  %v2596_v26 = vmul.f32 %v8964_v2, %v2574_v21  ;;  %6859 = vmatpush3.bf16.msra.mxu1 %v7184_v36 }
 0xad9   :  { %v7383_v46 = vpop.eup %7382  ;;  %v2577_v30 = vmul.f32 %v7381_v18, %v8908_v5  ;;  %v2619_v8 = vadd.f32 %v8972_v42, %v2597_v31  ;;  %v7185_v18 = vld [vmem:[%s10464_s5 + $0x30] sm:$0xff]  }
 0xada   :  { %v2618_v13 = vadd.f32 %v8972_v42, %v2596_v26  ;;  %v2576_v20 = vmul.f32 %v7383_v46, %v8905_v41  ;;  %6860 = vmatprep.subr.bf16.mxu1 %v7185_v18  ;;  %v7186_v26 = vld [vmem:[%s10464_s5 + $0x28] sm:$0xff]   ;;  %v7187_v46 = vld [vmem:[%s10464_s5 + $0x20] sm:$0xff]  }
 0xadb   :  { %v2599_v41 = vmul.f32 %v8964_v2, %v2577_v30 }
 0xadc   :  { %v7385_v4 = vpop.eup %7384  ;;  %v2631_v47 = vpack.c.bf16 %v2618_v13, %v2617_v10  ;;  %v2598_v58 = vmul.f32 %v8964_v2, %v2576_v20  ;;  %6861 = vmatpush3.bf16.msra.mxu1 %v7185_v18  ;;  %v7188_v13 = vld [vmem:[%s10464_s5 + $0x18] sm:$0xff]  }
 0xadd   :  { %v7387_v37 = vpop.eup %7386  ;;  %v2579_v12 = vmul.f32 %v7385_v4, %v8920_v14  ;;  %v2621_v14 = vadd.f32 %v8972_v42, %v2599_v41  ;;  %6862 = vmatprep.subr.bf16.mxu1 %v7186_v26 }
 0xade   :  { %6846 = vmatprep.mubr.msk.bf16.mxu0 %vm786_vm4, %v2631_v47  ;;  %v2620_v27 = vadd.f32 %v8972_v42, %v2598_v58  ;;  %v2578_v56 = vmul.f32 %v7387_v37, %v8917_v11  ;;  %v7189_v47 = vld [vmem:[%s10464_s5 + $0x10] sm:$0xff]  }
 0xadf   :  { %v2601_v54 = vmul.f32 %v8964_v2, %v2579_v12 }
 0xae0   :  { %v7389_v16 = vpop.eup %7388  ;;  %v2632_v0 = vpack.c.bf16 %v2620_v27, %v2619_v8  ;;  %v2600_v5 = vmul.f32 %v8964_v2, %v2578_v56  ;;  %6863 = vmatpush3.bf16.msra.mxu1 %v7186_v26 }
 0xae1   :  { %v2580_v53 = vmul.f32 %v7389_v16, %v8929_v39  ;;  %v2623_v11 = vadd.f32 %v8972_v42, %v2601_v54  ;;  %6864 = vmatprep.subr.bf16.mxu1 %v7187_v46 }
 0xae2   :  { %6847 = vmatmul.mubr.msk.bf16.gmra.mxu0 %vm786_vm4, %v2632_v0  ;;  %v2622_v33 = vadd.f32 %v8972_v42, %v2600_v5 }
 0xae3   :  { %v2602_v40 = vmul.f32 %v8964_v2, %v2580_v53 }
 0xae4   :  { %v2633_v57 = vpack.c.bf16 %v2622_v33, %v2621_v14  ;;  %6865 = vmatpush3.bf16.msra.mxu1 %v7187_v46 }
 0xae5   :  { %v2624_v60 = vadd.f32 %v8972_v42, %v2602_v40  ;;  %6866 = vmatprep.subr.bf16.mxu1 %v7188_v13 }
 0xae6   :  { %6850 = vmatprep.mubr.msk.bf16.mxu0 %vm786_vm4, %v2633_v57 }
 0xae7   :  { %v2634_v24 = vpack.c.bf16 %v2624_v60, %v2623_v11 }
 0xae8   :  { %6867 = vmatpush3.bf16.msra.mxu1 %v7188_v13 }
 0xae9   :  { %6868 = vmatprep.subr.bf16.mxu1 %v7189_v47 }
 0xaea   :  { %6851 = vmatmul.mubr.msk.bf16.gmra.mxu0 %vm786_vm4, %v2634_v24 }
 0xaec   :  { %6869 = vmatpush3.bf16.msra.mxu1 %v7189_v47 }
 0xaef   :  { %v2511_v39 = vpop.xlane.xlu0 %2510 }
 0xaf0   :  { %v2533_v51 = vmul.f32 0.03125, %v2511_v39 }
 0xaf2   :  { %v2549_v23 = vadd.f32 1e-05, %v2533_v51 }
 0xaf3   :  { %v2517_v55 = vpop.xlane.xlu0 %2516  ;;  %v2514_v38 = vpop.xlane.xlu1 %2513 }
 0xaf4   :  { %7390 = vrsqrt.f32 %v2549_v23  ;;  %v2535_v15 = vmul.f32 0.03125, %v2517_v55  ;;  %v2534_v7 = vmul.f32 0.03125, %v2514_v38 }
 0xaf6   :  { %v2551_v62 = vadd.f32 1e-05, %v2535_v15  ;;  %v2550_v49 = vadd.f32 1e-05, %v2534_v7 }
 0xaf7   :  { %v2520_v34 = vpop.xlane.xlu1 %2519 }
 0xaf8   :  { %7392 = vrsqrt.f32 %v2551_v62  ;;  %v2536_v21 = vmul.f32 0.03125, %v2520_v34 }
 0xaf9   :  { %7394 = vrsqrt.f32 %v2550_v49 }
 0xafa   :  { %v2552_v28 = vadd.f32 1e-05, %v2536_v21 }
 0xafc   :  { %7396 = vrsqrt.f32 %v2552_v28 }
 0xb01   :  { %v7391_v10 = vpop.eup %7390 }
 0xb02   :  { %v2581_v20 = vmul.f32 %v7391_v10, %v8937_v44 }
 0xb04   :  { %v2603_v37 = vmul.f32 %v8964_v2, %v2581_v20 }
 0xb05   :  { %v7393_v31 = vpop.eup %7392 }
 0xb06   :  { %v7395_v30 = vpop.eup %7394  ;;  %v2583_v4 = vmul.f32 %v7393_v31, %v8942_v32  ;;  %v7190_v32 = vld [vmem:[%s10464_s5 + $0x8] sm:$0xff]   ;;  %v2625_v56 = vadd.f32 %v8972_v42, %v2603_v37 }
 0xb07   :  { %v2582_v58 = vmul.f32 %v7395_v30, %v8945_v50  ;;  %6870 = vmatprep.subr.bf16.mxu1 %v7190_v32 }
 0xb08   :  { %v2605_v27 = vmul.f32 %v8964_v2, %v2583_v4  ;;  %6871 = vmatpush3.bf16.msra.mxu1 %v7190_v32 }
 0xb09   :  { %v7397_v12 = vpop.eup %7396  ;;  %v2604_v8 = vmul.f32 %v8964_v2, %v2582_v58 }
 0xb0a   :  { %v2584_v44 = vmul.f32 %v7397_v12, %v8953_v17  ;;  %v2627_v0 = vadd.f32 %v8972_v42, %v2605_v27  ;;  %v7191_v17 = vld [vmem:[%s10464_s5] sm:$0xff]  }
 0xb0b   :  { %v2626_v41 = vadd.f32 %v8972_v42, %v2604_v8  ;;  %6872 = vmatprep.subr.bf16.mxu1 %v7191_v17 }
 0xb0c   :  { %v2606_v50 = vmul.f32 %v8964_v2, %v2584_v44  ;;  %6873 = vmatpush3.bf16.msra.mxu1 %v7191_v17  ;;  %v9053_v2 = vld [vmem:[%s10465_s1] ss:$0 sm:$0xff] }
 0xb0d   :  { %v2635_v16 = vpack.c.bf16 %v2626_v41, %v2625_v56 }
 0xb0e   :  { %v2628_v5 = vadd.f32 %v8972_v42, %v2606_v50 }
 0xb0f   :  { %6854 = vmatprep.mubr.msk.bf16.mxu0 %vm786_vm4, %v2635_v16 }
 0xb10   :  { %v2636_v53 = vpack.c.bf16 %v2628_v5, %v2627_v0 }
 0xb12   :  { %6855 = vmatmul.mubr.msk.bf16.gmra.mxu0 %vm786_vm4, %v2636_v53 }
 0xb6e   :  { %v6844_v54 = vpop.f32.mrf.mxu0 }
 0xb6f   :  { %v2727_v42 = vadd.f32 %v6844_v54, %v9053_v2 }
 0xb70   :  { %v2718_v14 = vpop.f32.mrf.mxu0 }
 0xb71   :  { %v2799_v33 = vmul.f32 0.044715, %v2727_v42  ;;  %v2719_v40 = vadd.f32 %v9053_v2, %v2718_v14  ;;  %v2783_v56 = vmul.f32 0.5, %v2727_v42 }
 0xb72   :  { %v6845_v57 = vpop.f32.mrf.mxu0 }
 0xb73   :  { %v2815_v11 = vmul.f32 %v2799_v33, %v2727_v42  ;;  %v2797_v60 = vmul.f32 0.044715, %v2719_v40  ;;  %v2730_v24 = vadd.f32 %v6845_v57, %v9053_v2  ;;  %v2781_v44 = vmul.f32 0.5, %v2719_v40 }
 0xb74   :  { %v2721_v39 = vpop.f32.mrf.mxu0 }
 0xb75   :  { %v2831_v51 = vmul.f32 %v2815_v11, %v2727_v42  ;;  %v2813_v23 = vmul.f32 %v2797_v60, %v2719_v40  ;;  %v2800_v55 = vmul.f32 0.044715, %v2730_v24  ;;  %v2722_v38 = vadd.f32 %v9053_v2, %v2721_v39 }
 0xb76   :  { %v2784_v12 = vmul.f32 0.5, %v2730_v24 }
 0xb77   :  { %v2847_v15 = vadd.f32 %v2831_v51, %v2727_v42  ;;  %v2829_v7 = vmul.f32 %v2813_v23, %v2719_v40  ;;  %v2816_v62 = vmul.f32 %v2800_v55, %v2730_v24  ;;  %v2798_v49 = vmul.f32 0.044715, %v2722_v38 }
 0xb78   :  { %v2782_v27 = vmul.f32 0.5, %v2722_v38 }
 0xb79   :  { %v2863_v36 = vmul.f32 0.7978846, %v2847_v15  ;;  %v2832_v34 = vmul.f32 %v2816_v62, %v2730_v24  ;;  %v2845_v21 = vadd.f32 %v2829_v7, %v2719_v40  ;;  %v2814_v28 = vmul.f32 %v2798_v49, %v2722_v38 }
 0xb7b   :  { %v2848_v18 = vadd.f32 %v2832_v34, %v2730_v24  ;;  %v2861_v26 = vmul.f32 0.7978846, %v2845_v21  ;;  %v2830_v46 = vmul.f32 %v2814_v28, %v2722_v38  ;;  %7398 = vtanh.f32 %v2863_v36 }
 0xb7d   :  { %v2864_v10 = vmul.f32 0.7978846, %v2848_v18  ;;  %v2846_v13 = vadd.f32 %v2830_v46, %v2722_v38  ;;  %7400 = vtanh.f32 %v2861_v26 }
 0xb7f   :  { %7402 = vtanh.f32 %v2864_v10  ;;  %v2862_v20 = vmul.f32 0.7978846, %v2846_v13 }
 0xb81   :  { %7404 = vtanh.f32 %v2862_v20 }
 0xb88   :  { %v7399_v31 = vpop.eup %7398 }
 0xb89   :  { %v2895_v8 = vadd.f32 1.0, %v7399_v31 }
 0xb8a   :  { %v7401_v30 = vpop.eup %7400 }
 0xb8b   :  { %v2893_v58 = vadd.f32 1.0, %v7401_v30  ;;  %v2911_v0 = vmul.f32 %v2895_v8, %v2783_v56 }
 0xb8c   :  { %v7403_v4 = vpop.eup %7402 }
 0xb8d   :  { %v2896_v47 = vadd.f32 1.0, %v7403_v4  ;;  %v2909_v50 = vmul.f32 %v2893_v58, %v2781_v44 }
 0xb8e   :  { %v7405_v37 = vpop.eup %7404 }
 0xb8f   :  { %v2894_v32 = vadd.f32 1.0, %v7405_v37  ;;  %v2912_v41 = vmul.f32 %v2896_v47, %v2784_v12 }
 0xb91   :  { %v2910_v16 = vmul.f32 %v2894_v32, %v2782_v27  ;;  %v2926_v17 = vpack.c.bf16 %v2912_v41, %v2911_v0 }
 0xb93   :  { %v2925_v5 = vpack.c.bf16 %v2910_v16, %v2909_v50 }
 0xb95   :  { %6874 = vmatprep.mubr.bf16.mxu1 %v2925_v5 }
 0xb96   :  { %6875 = vmatmul.mubr.bf16.vlgmr.msra.gmra.mxu1 %v2926_v17 }
 0xba2   :  { %v6848_v53 = vpop.f32.mrf.mxu0 }
 0xba3   :  { %v9060_v54 = vadd.f32 %v6848_v53, %v9053_v2 }
 0xba4   :  { %v2734_v14 = vpop.f32.mrf.mxu0 }
 0xba5   :  { %v2803_v33 = vmul.f32 0.044715, %v9060_v54  ;;  %v9064_v40 = vadd.f32 %v9053_v2, %v2734_v14 }
 0xba6   :  { %v6849_v57 = vpop.f32.mrf.mxu0 }
 0xba7   :  { %v2819_v42 = vmul.f32 %v2803_v33, %v9060_v54  ;;  %v2801_v11 = vmul.f32 0.044715, %v9064_v40  ;;  %v2746_v60 = vadd.f32 %v6849_v57, %v9053_v2 }
 0xba8   :  { %v2737_v24 = vpop.f32.mrf.mxu0 }
 0xba9   :  { %v2835_v39 = vmul.f32 %v2819_v42, %v9060_v54  ;;  %v2817_v51 = vmul.f32 %v2801_v11, %v9064_v40  ;;  %v2804_v23 = vmul.f32 0.044715, %v2746_v60  ;;  %v2738_v55 = vadd.f32 %v9053_v2, %v2737_v24 }
 0xbaa   :  { %v6852_v38 = vpop.f32.mrf.mxu0 }
 0xbab   :  { %v2833_v15 = vmul.f32 %v2817_v51, %v9064_v40  ;;  %v2820_v7 = vmul.f32 %v2804_v23, %v2746_v60  ;;  %v2802_v62 = vmul.f32 0.044715, %v2738_v55  ;;  %v9074_v49 = vadd.f32 %v6852_v38, %v9053_v2 }
 0xbac   :  { %v2750_v36 = vpop.f32.mrf.mxu0  ;;  %v2851_v34 = vadd.f32 %v2835_v39, %v9060_v54 }
 0xbad   :  { %v2836_v21 = vmul.f32 %v2820_v7, %v2746_v60  ;;  %v2818_v28 = vmul.f32 %v2802_v62, %v2738_v55  ;;  %v2807_v18 = vmul.f32 0.044715, %v9074_v49  ;;  %v9079_v26 = vadd.f32 %v9053_v2, %v2750_v36 }
 0xbae   :  { %v6853_v46 = vpop.f32.mrf.mxu0  ;;  %v2849_v10 = vadd.f32 %v2833_v15, %v9064_v40  ;;  %v2867_v13 = vmul.f32 0.7978846, %v2851_v34  ;;  %v2788_v34 = vmul.f32 0.5, %v2746_v60 }
 0xbaf   :  { %v2834_v20 = vmul.f32 %v2818_v28, %v2738_v55  ;;  %v2823_v31 = vmul.f32 %v2807_v18, %v9074_v49  ;;  %v2805_v30 = vmul.f32 0.044715, %v9079_v26  ;;  %v2762_v4 = vadd.f32 %v6853_v46, %v9053_v2 }
 0xbb0   :  { %v2753_v47 = vpop.f32.mrf.mxu0  ;;  %v2865_v58 = vmul.f32 0.7978846, %v2849_v10  ;;  %v2852_v37 = vadd.f32 %v2836_v21, %v2746_v60  ;;  %v2785_v28 = vmul.f32 0.5, %v9064_v40  ;;  %v2786_v18 = vmul.f32 0.5, %v2738_v55 }
 0xbb1   :  { %v2839_v12 = vmul.f32 %v2823_v31, %v9074_v49  ;;  %v2821_v8 = vmul.f32 %v2805_v30, %v9079_v26  ;;  %v2808_v44 = vmul.f32 0.044715, %v2762_v4  ;;  %v2754_v27 = vadd.f32 %v9053_v2, %v2753_v47 }
 0xbb2   :  { %v2850_v32 = vadd.f32 %v2834_v20, %v2738_v55  ;;  %7406 = vtanh.f32 %v2865_v58  ;;  %v2868_v56 = vmul.f32 0.7978846, %v2852_v37  ;;  %v2787_v10 = vmul.f32 0.5, %v9060_v54 }
 0xbb3   :  { %v2837_v41 = vmul.f32 %v2821_v8, %v9079_v26  ;;  %v2824_v50 = vmul.f32 %v2808_v44, %v2762_v4  ;;  %v2806_v16 = vmul.f32 0.044715, %v2754_v27  ;;  %7408 = vtanh.f32 %v2867_v13 }
 0xbb4   :  { %v2866_v0 = vmul.f32 0.7978846, %v2850_v32  ;;  %7410 = vtanh.f32 %v2868_v56  ;;  %v2855_v5 = vadd.f32 %v2839_v12, %v9074_v49  ;;  %v2789_v60 = vmul.f32 0.5, %v9079_v26 }
 0xbb5   :  { %v2840_v17 = vmul.f32 %v2824_v50, %v2762_v4  ;;  %v2822_v53 = vmul.f32 %v2806_v16, %v2754_v27  ;;  %v2853_v14 = vadd.f32 %v2837_v41, %v9079_v26  ;;  %v2790_v40 = vmul.f32 0.5, %v2754_v27 }
 0xbb6   :  { %7412 = vtanh.f32 %v2866_v0  ;;  %v2871_v33 = vmul.f32 0.7978846, %v2855_v5  ;;  %v2792_v41 = vmul.f32 0.5, %v2762_v4  ;;  %v2791_v0 = vmul.f32 0.5, %v9074_v49 }
 0xbb7   :  { %v2838_v57 = vmul.f32 %v2822_v53, %v2754_v27  ;;  %v2869_v42 = vmul.f32 0.7978846, %v2853_v14  ;;  %v2856_v11 = vadd.f32 %v2840_v17, %v2762_v4 }
 0xbb9   :  { %v2854_v24 = vadd.f32 %v2838_v57, %v2754_v27  ;;  %7414 = vtanh.f32 %v2869_v42  ;;  %v2872_v39 = vmul.f32 0.7978846, %v2856_v11 }
 0xbba   :  { %7416 = vtanh.f32 %v2871_v33 }
 0xbbb   :  { %v2870_v51 = vmul.f32 0.7978846, %v2854_v24  ;;  %7418 = vtanh.f32 %v2872_v39 }
 0xbbd   :  { %7420 = vtanh.f32 %v2870_v51 }
 0xbbf   :  { %v7407_v23 = vpop.eup %7406 }
 0xbc0   :  { %v7409_v38 = vpop.eup %7408  ;;  %v2897_v7 = vadd.f32 1.0, %v7407_v23 }
 0xbc1   :  { %v7411_v15 = vpop.eup %7410  ;;  %v2899_v21 = vadd.f32 1.0, %v7409_v38 }
 0xbc2   :  { %v2900_v62 = vadd.f32 1.0, %v7411_v15  ;;  %v2913_v31 = vmul.f32 %v2897_v7, %v2785_v28 }
 0xbc3   :  { %v7413_v36 = vpop.eup %7412  ;;  %v2915_v58 = vmul.f32 %v2899_v21, %v2787_v10 }
 0xbc4   :  { %v2898_v46 = vadd.f32 1.0, %v7413_v36  ;;  %v2916_v13 = vmul.f32 %v2900_v62, %v2788_v34 }
 0xbc6   :  { %v7415_v20 = vpop.eup %7414  ;;  %v2914_v30 = vmul.f32 %v2898_v46, %v2786_v18  ;;  %v2928_v8 = vpack.c.bf16 %v2916_v13, %v2915_v58 }
 0xbc7   :  { %v7417_v47 = vpop.eup %7416  ;;  %v2901_v44 = vadd.f32 1.0, %v7415_v20 }
 0xbc8   :  { %v7419_v37 = vpop.eup %7418  ;;  %v2927_v12 = vpack.c.bf16 %v2914_v30, %v2913_v31  ;;  %v2903_v54 = vadd.f32 1.0, %v7417_v47 }
 0xbc9   :  { %v2904_v32 = vadd.f32 1.0, %v7419_v37  ;;  %v2917_v50 = vmul.f32 %v2901_v44, %v2789_v60 }
 0xbca   :  { %v7421_v56 = vpop.eup %7420  ;;  %6878 = vmatprep.mubr.bf16.mxu1 %v2927_v12  ;;  %v2919_v53 = vmul.f32 %v2903_v54, %v2791_v0 }
 0xbcb   :  { %6879 = vmatmul.mubr.bf16.gmra.mxu1 %v2928_v8  ;;  %v2902_v55 = vadd.f32 1.0, %v7421_v56  ;;  %v2920_v5 = vmul.f32 %v2904_v32, %v2792_v41 }
 0xbcd   :  { %v2918_v16 = vmul.f32 %v2902_v55, %v2790_v40  ;;  %v2930_v14 = vpack.c.bf16 %v2920_v5, %v2919_v53 }
 0xbcf   :  { %v2929_v17 = vpack.c.bf16 %v2918_v16, %v2917_v50 }
 0xbd1   :  { %6882 = vmatprep.mubr.bf16.mxu1 %v2929_v17 }
 0xbd2   :  { %v6856_v33 = vpop.f32.mrf.mxu0 }
 0xbd3   :  { %v2775_v57 = vadd.f32 %v6856_v33, %v9053_v2  ;;  %6883 = vmatmul.mubr.bf16.gmra.mxu1 %v2930_v14  ;;  %v9102_v14 = vld [vmem:[%s10413_s13] ss:$0 sm:$0xff] }
 0xbd4   :  { %v2766_v42 = vpop.f32.mrf.mxu0 }
 0xbd5   :  { %v2811_v26 = vmul.f32 0.044715, %v2775_v57  ;;  %v2767_v27 = vadd.f32 %v9053_v2, %v2766_v42  ;;  %v2795_v41 = vmul.f32 0.5, %v2775_v57 }
 0xbd6   :  { %v6857_v11 = vpop.f32.mrf.mxu0 }
 0xbd7   :  { %v2827_v4 = vmul.f32 %v2811_v26, %v2775_v57  ;;  %v2809_v24 = vmul.f32 0.044715, %v2767_v27  ;;  %v2778_v39 = vadd.f32 %v6857_v11, %v9053_v2  ;;  %v2793_v60 = vmul.f32 0.5, %v2767_v27 }
 0xbd8   :  { %v2769_v51 = vpop.f32.mrf.mxu0 }
 0xbd9   :  { %v2843_v49 = vmul.f32 %v2827_v4, %v2775_v57  ;;  %v2825_v23 = vmul.f32 %v2809_v24, %v2767_v27  ;;  %v2812_v38 = vmul.f32 0.044715, %v2778_v39  ;;  %v2770_v15 = vadd.f32 %v9053_v2, %v2769_v51 }
 0xbda   :  { %v2796_v32 = vmul.f32 0.5, %v2778_v39 }
 0xbdb   :  { %v2841_v7 = vmul.f32 %v2825_v23, %v2767_v27  ;;  %v2828_v62 = vmul.f32 %v2812_v38, %v2778_v39  ;;  %v2810_v36 = vmul.f32 0.044715, %v2770_v15  ;;  %v2859_v34 = vadd.f32 %v2843_v49, %v2775_v57 }
 0xbdc   :  { %v2794_v40 = vmul.f32 0.5, %v2770_v15 }
 0xbdd   :  { %v2844_v21 = vmul.f32 %v2828_v62, %v2778_v39  ;;  %v2826_v28 = vmul.f32 %v2810_v36, %v2770_v15  ;;  %v2857_v18 = vadd.f32 %v2841_v7, %v2767_v27  ;;  %v2875_v46 = vmul.f32 0.7978846, %v2859_v34 }
 0xbdf   :  { %v2842_v10 = vmul.f32 %v2826_v28, %v2770_v15  ;;  %v2873_v13 = vmul.f32 0.7978846, %v2857_v18  ;;  %v2860_v20 = vadd.f32 %v2844_v21, %v2778_v39 }
 0xbe1   :  { %v2858_v31 = vadd.f32 %v2842_v10, %v2770_v15  ;;  %7422 = vtanh.f32 %v2873_v13  ;;  %v2876_v30 = vmul.f32 0.7978846, %v2860_v20 }
 0xbe2   :  { %7424 = vtanh.f32 %v2875_v46 }
 0xbe3   :  { %v2874_v47 = vmul.f32 0.7978846, %v2858_v31  ;;  %7426 = vtanh.f32 %v2876_v30 }
 0xbe5   :  { %7428 = vtanh.f32 %v2874_v47 }
 0xbee   :  { %v7423_v58 = vpop.eup %7422 }
 0xbef   :  { %v7425_v2 = vpop.eup %7424  ;;  %v2905_v12 = vadd.f32 1.0, %v7423_v58 }
 0xbf0   :  { %v7427_v37 = vpop.eup %7426  ;;  %v2907_v56 = vadd.f32 1.0, %v7425_v2 }
 0xbf1   :  { %v2908_v8 = vadd.f32 1.0, %v7427_v37  ;;  %v2921_v50 = vmul.f32 %v2905_v12, %v2793_v60 }
 0xbf2   :  { %v7429_v44 = vpop.eup %7428  ;;  %v2923_v0 = vmul.f32 %v2907_v56, %v2795_v41 }
 0xbf3   :  { %v2906_v55 = vadd.f32 1.0, %v7429_v44  ;;  %v2924_v54 = vmul.f32 %v2908_v8, %v2796_v32 }
 0xbf5   :  { %v2922_v16 = vmul.f32 %v2906_v55, %v2794_v40  ;;  %v2932_v17 = vpack.c.bf16 %v2924_v54, %v2923_v0 }
 0xbf7   :  { %v2931_v5 = vpack.c.bf16 %v2922_v16, %v2921_v50 }
 0xbf9   :  { %6886 = vmatprep.mubr.bf16.mxu1 %v2931_v5 }
 0xbfa   :  { %6887 = vmatmul.mubr.bf16.gmra.mxu1 %v2932_v17 }
 0xc56   :  { %v6876_v53 = vpop.f32.mrf.mxu1 }
 0xc57   :  { %v3047_v42 = vadd.f32 %v6876_v53, %v9102_v14 }
 0xc58   :  { %v3038_v33 = vpop.f32.mrf.mxu1 }
 0xc59   :  { %v3039_v26 = vadd.f32 %v9102_v14, %v3038_v33  ;;  %v9110_v4 = vadd.f32 %v3047_v42, %v8772_v43 }
 0xc5a   :  { %v6877_v57 = vpop.f32.mrf.mxu1 }
 0xc5b   :  { %v9107_v27 = vadd.f32 %v3039_v26, %v8770_v63  ;;  %v3050_v24 = vadd.f32 %v6877_v57, %v9102_v14  ;;  %v3125_v43 = vsel %vm786_vm4, %v9110_v4, 0.0 }
 0xc5c   :  { %v3041_v11 = vpop.f32.mrf.mxu1 }
 0xc5d   :  { %v3042_v39 = vadd.f32 %v9102_v14, %v3041_v11  ;;  %v3119_v51 = vsel %vm786_vm4, %v9107_v27, 0.0  ;;  %v9120_v23 = vadd.f32 %v3050_v24, %v8778_v19 }
 0xc5e   :  { %3120 = vadd.xlane.f32.xlu0 %v3119_v51 }
 0xc5f   :  { %v9117_v49 = vadd.f32 %v3042_v39, %v8776_v35  ;;  %v3128_v38 = vsel %vm786_vm4, %v9120_v23, 0.0 }
 0xc61   :  { %v3122_v63 = vsel %vm786_vm4, %v9117_v49, 0.0 }
 0xc62   :  { %3123 = vadd.xlane.f32.xlu1 %v3122_v63  ;;  %3126 = vadd.xlane.f32.xlu0 %v3125_v43 }
 0xc66   :  { %3129 = vadd.xlane.f32.xlu1 %v3128_v38 }
 0xc8b   :  { %v6880_v15 = vpop.f32.mrf.mxu1 }
 0xc8c   :  { %v3063_v35 = vadd.f32 %v6880_v15, %v9102_v14 }
 0xc8d   :  { %v3054_v7 = vpop.f32.mrf.mxu1 }
 0xc8e   :  { %v3055_v62 = vadd.f32 %v9102_v14, %v3054_v7  ;;  %v9135_v28 = vadd.f32 %v3063_v35, %v8796_v29 }
 0xc8f   :  { %v6881_v19 = vpop.f32.mrf.mxu1 }
 0xc90   :  { %v9131_v36 = vadd.f32 %v3055_v62, %v8794_v1  ;;  %v3066_v34 = vadd.f32 %v6881_v19, %v9102_v14  ;;  %v3137_v47 = vsel %vm786_vm4, %v9135_v28, 0.0 }
 0xc91   :  { %v3057_v21 = vpop.f32.mrf.mxu1 }
 0xc92   :  { %v3058_v18 = vadd.f32 %v9102_v14, %v3057_v21  ;;  %v3131_v46 = vsel %vm786_vm4, %v9131_v36, 0.0  ;;  %v9144_v20 = vadd.f32 %v3066_v34, %v8806_v48 }
 0xc93   :  { %3132 = vadd.xlane.f32.xlu0 %v3131_v46  ;;  %v6884_v10 = vpop.f32.mrf.mxu1  ;;  %v7192_v46 = vld [vmem:[%s10416_s16 + $0x8] sm:$0xff]  }
 0xc94   :  { %v9141_v13 = vadd.f32 %v3058_v18, %v8804_v9  ;;  %v3079_v31 = vadd.f32 %v6884_v10, %v9102_v14  ;;  %v3140_v48 = vsel %vm786_vm4, %v9144_v20, 0.0  ;;  %6890 = vmatprep.subr.bf16.mxu0 %v7192_v46  ;;  %v7193_v10 = vld [vmem:[%s10416_s16] sm:$0xff]  }
 0xc95   :  { %v3070_v1 = vpop.f32.mrf.mxu1  ;;  %6891 = vmatpush3.bf16.msra.mxu0 %v7192_v46 }
 0xc96   :  { %v3071_v30 = vadd.f32 %v9102_v14, %v3070_v1  ;;  %v3134_v29 = vsel %vm786_vm4, %v9141_v13, 0.0  ;;  %v9158_v37 = vadd.f32 %v3079_v31, %v8820_v59  ;;  %6892 = vmatprep.subr.bf16.mxu0 %v7193_v10 }
 0xc97   :  { %3135 = vadd.xlane.f32.xlu1 %v3134_v29  ;;  %3138 = vadd.xlane.f32.xlu0 %v3137_v47  ;;  %v6885_v58 = vpop.f32.mrf.mxu1 }
 0xc98   :  { %v9153_v9 = vadd.f32 %v3071_v30, %v8816_v6  ;;  %v3082_v12 = vadd.f32 %v6885_v58, %v9102_v14  ;;  %v3149_v59 = vsel %vm786_vm4, %v9158_v37, 0.0 }
 0xc99   :  { %v3073_v2 = vpop.f32.mrf.mxu1  ;;  %6893 = vmatpush3.bf16.msra.mxu0 %v7193_v10 }
 0xc9a   :  { %v3074_v8 = vadd.f32 %v9102_v14, %v3073_v2  ;;  %v3143_v44 = vsel %vm786_vm4, %v9153_v9, 0.0  ;;  %v9168_v6 = vadd.f32 %v3082_v12, %v8826_v22 }
 0xc9b   :  { %3141 = vadd.xlane.f32.xlu1 %v3140_v48  ;;  %3144 = vadd.xlane.f32.xlu0 %v3143_v44 }
 0xc9c   :  { %v9165_v32 = vadd.f32 %v3074_v8, %v8824_v3  ;;  %10467 = vst [vmem:[#allocation6_spill] sm:$0xff] %v9168_v6  ;;  %v3152_v60 = vsel %vm786_vm4, %v9168_v6, 0.0 }
 0xc9e   :  { %10466 = vst [vmem:[#allocation5_spill] sm:$0xff] %v9165_v32  ;;  %v3146_v56 = vsel %vm786_vm4, %v9165_v32, 0.0 }
 0xc9f   :  { %3147 = vadd.xlane.f32.xlu1 %v3146_v56  ;;  %3150 = vadd.xlane.f32.xlu0 %v3149_v59 }
 0xca3   :  { %3153 = vadd.xlane.f32.xlu1 %v3152_v60 }
 0xcba   :  { %v6888_v40 = vpop.f32.mrf.mxu1 }
 0xcbb   :  { %v3095_v3 = vadd.f32 %v6888_v40, %v9102_v14 }
 0xcbc   :  { %v3086_v55 = vpop.f32.mrf.mxu1 }
 0xcbd   :  { %v3087_v41 = vadd.f32 %v9102_v14, %v3086_v55  ;;  %v9182_v16 = vadd.f32 %v3095_v3, %v8844_v61 }
 0xcbe   :  { %v6889_v22 = vpop.f32.mrf.mxu1 }
 0xcbf   :  { %v9179_v54 = vadd.f32 %v3087_v41, %v8842_v52  ;;  %10469 = vst [vmem:[#allocation8_spill] sm:$0xff] %v9182_v16  ;;  %v3098_v0 = vadd.f32 %v6889_v22, %v9102_v14  ;;  %v3161_v61 = vsel %vm786_vm4, %v9182_v16, 0.0 }
 0xcc0   :  { %v3089_v50 = vpop.f32.mrf.mxu1 }
 0xcc1   :  { %10468 = vst [vmem:[#allocation7_spill] sm:$0xff] %v9179_v54  ;;  %v3090_v5 = vadd.f32 %v9102_v14, %v3089_v50  ;;  %v3155_v17 = vsel %vm786_vm4, %v9179_v54, 0.0  ;;  %v9192_v33 = vadd.f32 %v3098_v0, %v8850_v25 }
 0xcc2   :  { %3156 = vadd.xlane.f32.xlu0 %v3155_v17 }
 0xcc3   :  { %v9189_v53 = vadd.f32 %v3090_v5, %v8848_v45  ;;  %10471 = vst [vmem:[#allocation10_spill] sm:$0xff] %v9192_v33  ;;  %v3164_v14 = vsel %vm786_vm4, %v9192_v33, 0.0 }
 0xcc5   :  { %10470 = vst [vmem:[#allocation9_spill] sm:$0xff] %v9189_v53  ;;  %v3158_v52 = vsel %vm786_vm4, %v9189_v53, 0.0 }
 0xcc6   :  { %3159 = vadd.xlane.f32.xlu1 %v3158_v52  ;;  %3162 = vadd.xlane.f32.xlu0 %v3161_v61 }
 0xcca   :  { %3165 = vadd.xlane.f32.xlu1 %v3164_v14 }
 0xce7   :  { %v3121_v42 = vpop.xlane.xlu0 %3120 }
 0xce8   :  { %v3167_v26 = vmul.f32 0.03125, %v3121_v42 }
 0xcea   :  { %v9201_v45 = vsub.f32 %v9107_v27, %v3167_v26 }
 0xceb   :  { %v3127_v57 = vpop.xlane.xlu0 %3126  ;;  %v3124_v25 = vpop.xlane.xlu1 %3123 }
 0xcec   :  { %v3169_v11 = vmul.f32 0.03125, %v3127_v57  ;;  %v3168_v24 = vmul.f32 0.03125, %v3124_v25  ;;  %v3199_v39 = vmul.f32 %v9201_v45, %v9201_v45 }
 0xcee   :  { %v9206_v51 = vsub.f32 %v9110_v4, %v3169_v11  ;;  %v9209_v63 = vsub.f32 %v9117_v49, %v3168_v24  ;;  %v3215_v43 = vsel %vm786_vm4, %v3199_v39, 0.0 }
 0xcef   :  { %3216 = vadd.xlane.f32.xlu0 %v3215_v43  ;;  %v3130_v38 = vpop.xlane.xlu1 %3129 }
 0xcf0   :  { %v3170_v15 = vmul.f32 0.03125, %v3130_v38  ;;  %v3201_v7 = vmul.f32 %v9206_v51, %v9206_v51  ;;  %v3200_v35 = vmul.f32 %v9209_v63, %v9209_v63 }
 0xcf2   :  { %v9217_v62 = vsub.f32 %v9120_v23, %v3170_v15  ;;  %v3221_v19 = vsel %vm786_vm4, %v3201_v7, 0.0  ;;  %v3218_v34 = vsel %vm786_vm4, %v3200_v35, 0.0 }
 0xcf3   :  { %3222 = vadd.xlane.f32.xlu0 %v3221_v19  ;;  %3219 = vadd.xlane.f32.xlu1 %v3218_v34 }
 0xcf4   :  { %v3202_v21 = vmul.f32 %v9217_v62, %v9217_v62 }
 0xcf6   :  { %v3224_v18 = vsel %vm786_vm4, %v3202_v21, 0.0 }
 0xcf7   :  { %3225 = vadd.xlane.f32.xlu1 %v3224_v18 }
 0xd1c   :  { %v3133_v1 = vpop.xlane.xlu0 %3132 }
 0xd1d   :  { %v3171_v31 = vmul.f32 0.03125, %v3133_v1 }
 0xd1f   :  { %v9231_v30 = vsub.f32 %v9131_v36, %v3171_v31 }
 0xd20   :  { %v3139_v29 = vpop.xlane.xlu0 %3138  ;;  %v3136_v47 = vpop.xlane.xlu1 %3135 }
 0xd21   :  { %v3173_v58 = vmul.f32 0.03125, %v3139_v29  ;;  %v3172_v2 = vmul.f32 0.03125, %v3136_v47  ;;  %v3203_v48 = vmul.f32 %v9231_v30, %v9231_v30 }
 0xd23   :  { %v9236_v12 = vsub.f32 %v9135_v28, %v3173_v58  ;;  %v9239_v8 = vsub.f32 %v9141_v13, %v3172_v2  ;;  %v3227_v44 = vsel %vm786_vm4, %v3203_v48, 0.0 }
 0xd24   :  { %v3145_v56 = vpop.xlane.xlu0 %3144  ;;  %3228 = vadd.xlane.f32.xlu0 %v3227_v44  ;;  %v3142_v59 = vpop.xlane.xlu1 %3141 }
 0xd25   :  { %v3175_v60 = vmul.f32 0.03125, %v3145_v56  ;;  %v3174_v40 = vmul.f32 0.03125, %v3142_v59  ;;  %v3205_v55 = vmul.f32 %v9236_v12, %v9236_v12  ;;  %v3204_v3 = vmul.f32 %v9239_v8, %v9239_v8 }
 0xd27   :  { %v9247_v41 = vsub.f32 %v9153_v9, %v3175_v60  ;;  %v9250_v22 = vsub.f32 %v9144_v20, %v3174_v40  ;;  %v3233_v50 = vsel %vm786_vm4, %v3205_v55, 0.0  ;;  %v3230_v0 = vsel %vm786_vm4, %v3204_v3, 0.0 }
 0xd28   :  { %v3151_v5 = vpop.xlane.xlu0 %3150  ;;  %3234 = vadd.xlane.f32.xlu0 %v3233_v50  ;;  %3231 = vadd.xlane.f32.xlu1 %v3230_v0  ;;  %v3148_v17 = vpop.xlane.xlu1 %3147 }
 0xd29   :  { %v3177_v52 = vmul.f32 0.03125, %v3151_v5  ;;  %v3176_v61 = vmul.f32 0.03125, %v3148_v17  ;;  %v3207_v14 = vmul.f32 %v9247_v41, %v9247_v41  ;;  %v3206_v42 = vmul.f32 %v9250_v22, %v9250_v22 }
 0xd2b   :  { %v9259_v26 = vsub.f32 %v9158_v37, %v3177_v52  ;;  %v9262_v57 = vsub.f32 %v9165_v32, %v3176_v61  ;;  %v3239_v25 = vsel %vm786_vm4, %v3207_v14, 0.0  ;;  %v3236_v11 = vsel %vm786_vm4, %v3206_v42, 0.0 }
 0xd2c   :  { %3240 = vadd.xlane.f32.xlu0 %v3239_v25  ;;  %3237 = vadd.xlane.f32.xlu1 %v3236_v11  ;;  %v3154_v24 = vpop.xlane.xlu1 %3153 }
 0xd2d   :  { %v3178_v39 = vmul.f32 0.03125, %v3154_v24  ;;  %v3209_v43 = vmul.f32 %v9259_v26, %v9259_v26  ;;  %v3208_v38 = vmul.f32 %v9262_v57, %v9262_v57 }
 0xd2f   :  { %v9271_v15 = vsub.f32 %v9168_v6, %v3178_v39  ;;  %v3245_v7 = vsel %vm786_vm4, %v3209_v43, 0.0  ;;  %v3242_v35 = vsel %vm786_vm4, %v3208_v38, 0.0 }
 0xd30   :  { %3246 = vadd.xlane.f32.xlu0 %v3245_v7  ;;  %3243 = vadd.xlane.f32.xlu1 %v3242_v35 }
 0xd31   :  { %v3210_v19 = vmul.f32 %v9271_v15, %v9271_v15 }
 0xd33   :  { %v3248_v34 = vsel %vm786_vm4, %v3210_v19, 0.0  ;;  %v9306_v19 = vld [vmem:[%s10414_s14] ss:$0 sm:$0xff] }
 0xd34   :  { %3249 = vadd.xlane.f32.xlu1 %v3248_v34 }
 0xd4b   :  { %v3157_v21 = vpop.xlane.xlu0 %3156 }
 0xd4c   :  { %v3179_v18 = vmul.f32 0.03125, %v3157_v21 }
 0xd4e   :  { %v9279_v46 = vsub.f32 %v9179_v54, %v3179_v18 }
 0xd4f   :  { %v3163_v10 = vpop.xlane.xlu0 %3162  ;;  %v3160_v1 = vpop.xlane.xlu1 %3159 }
 0xd50   :  { %v3181_v31 = vmul.f32 0.03125, %v3163_v10  ;;  %v3180_v29 = vmul.f32 0.03125, %v3160_v1  ;;  %v3211_v47 = vmul.f32 %v9279_v46, %v9279_v46 }
 0xd52   :  { %v9284_v58 = vsub.f32 %v9182_v16, %v3181_v31  ;;  %v9287_v2 = vsub.f32 %v9189_v53, %v3180_v29  ;;  %v3251_v48 = vsel %vm786_vm4, %v3211_v47, 0.0  ;;  %v9314_v31 = vld [vmem:[%s10415_s15] ss:$0 sm:$0xff] }
 0xd53   :  { %3252 = vadd.xlane.f32.xlu0 %v3251_v48  ;;  %v3166_v44 = vpop.xlane.xlu1 %3165 }
 0xd54   :  { %v3182_v56 = vmul.f32 0.03125, %v3166_v44  ;;  %v3213_v59 = vmul.f32 %v9284_v58, %v9284_v58  ;;  %v3212_v60 = vmul.f32 %v9287_v2, %v9287_v2 }
 0xd56   :  { %v9295_v40 = vsub.f32 %v9192_v33, %v3182_v56  ;;  %v3257_v55 = vsel %vm786_vm4, %v3213_v59, 0.0  ;;  %v3254_v3 = vsel %vm786_vm4, %v3212_v60, 0.0 }
 0xd57   :  { %3258 = vadd.xlane.f32.xlu0 %v3257_v55  ;;  %3255 = vadd.xlane.f32.xlu1 %v3254_v3 }
 0xd58   :  { %v3214_v50 = vmul.f32 %v9295_v40, %v9295_v40 }
 0xd5a   :  { %v3260_v0 = vsel %vm786_vm4, %v3214_v50, 0.0 }
 0xd5b   :  { %3261 = vadd.xlane.f32.xlu1 %v3260_v0 }
 0xd78   :  { %v3217_v5 = vpop.xlane.xlu0 %3216 }
 0xd79   :  { %v3263_v17 = vmul.f32 0.03125, %v3217_v5 }
 0xd7b   :  { %v3279_v52 = vadd.f32 1e-05, %v3263_v17 }
 0xd7c   :  { %v3223_v61 = vpop.xlane.xlu0 %3222  ;;  %v3220_v14 = vpop.xlane.xlu1 %3219 }
 0xd7d   :  { %7430 = vrsqrt.f32 %v3279_v52  ;;  %v3265_v42 = vmul.f32 0.03125, %v3223_v61  ;;  %v3264_v25 = vmul.f32 0.03125, %v3220_v14 }
 0xd7f   :  { %v3281_v11 = vadd.f32 1e-05, %v3265_v42  ;;  %v3280_v24 = vadd.f32 1e-05, %v3264_v25 }
 0xd80   :  { %v3226_v39 = vpop.xlane.xlu1 %3225 }
 0xd81   :  { %7432 = vrsqrt.f32 %v3281_v11  ;;  %v3266_v43 = vmul.f32 0.03125, %v3226_v39 }
 0xd82   :  { %7434 = vrsqrt.f32 %v3280_v24 }
 0xd83   :  { %v3282_v38 = vadd.f32 1e-05, %v3266_v43 }
 0xd85   :  { %7436 = vrsqrt.f32 %v3282_v38 }
 0xd8a   :  { %v7431_v7 = vpop.eup %7430 }
 0xd8b   :  { %v3311_v35 = vmul.f32 %v7431_v7, %v9201_v45 }
 0xd8d   :  { %v3333_v1 = vmul.f32 %v9306_v19, %v3311_v35 }
 0xd8e   :  { %v7433_v34 = vpop.eup %7432 }
 0xd8f   :  { %v7435_v21 = vpop.eup %7434  ;;  %v3313_v18 = vmul.f32 %v7433_v34, %v9206_v51  ;;  %v3355_v44 = vadd.f32 %v9314_v31, %v3333_v1 }
 0xd90   :  { %v3312_v10 = vmul.f32 %v7435_v21, %v9209_v63 }
 0xd91   :  { %v3335_v47 = vmul.f32 %v9306_v19, %v3313_v18 }
 0xd92   :  { %v7437_v29 = vpop.eup %7436  ;;  %v3334_v45 = vmul.f32 %v9306_v19, %v3312_v10 }
 0xd93   :  { %v3314_v48 = vmul.f32 %v7437_v29, %v9217_v62  ;;  %v3357_v59 = vadd.f32 %v9314_v31, %v3335_v47 }
 0xd94   :  { %v3356_v51 = vadd.f32 %v9314_v31, %v3334_v45 }
 0xd95   :  { %v3336_v63 = vmul.f32 %v9306_v19, %v3314_v48 }
 0xd96   :  { %v3371_v56 = vpack.c.bf16 %v3356_v51, %v3355_v44 }
 0xd97   :  { %v3358_v60 = vadd.f32 %v9314_v31, %v3336_v63 }
 0xd98   :  { %6894 = vmatprep.mubr.msk.bf16.mxu0 %vm786_vm4, %v3371_v56 }
 0xd99   :  { %v3372_v55 = vpack.c.bf16 %v3358_v60, %v3357_v59 }
 0xd9b   :  { %6895 = vmatmul.mubr.msk.bf16.vlgmr.msra.gmra.mxu0 %vm786_vm4, %v3372_v55 }
 0xdad   :  { %v3229_v3 = vpop.xlane.xlu0 %3228 }
 0xdae   :  { %v3267_v50 = vmul.f32 0.03125, %v3229_v3 }
 0xdb0   :  { %v3283_v0 = vadd.f32 1e-05, %v3267_v50 }
 0xdb1   :  { %v3235_v62 = vpop.xlane.xlu0 %3234  ;;  %v3232_v5 = vpop.xlane.xlu1 %3231 }
 0xdb2   :  { %7438 = vrsqrt.f32 %v3283_v0  ;;  %v3269_v17 = vmul.f32 0.03125, %v3235_v62  ;;  %v3268_v52 = vmul.f32 0.03125, %v3232_v5 }
 0xdb4   :  { %v3285_v61 = vadd.f32 1e-05, %v3269_v17  ;;  %v3284_v14 = vadd.f32 1e-05, %v3268_v52 }
 0xdb5   :  { %v3241_v42 = vpop.xlane.xlu0 %3240  ;;  %v3238_v25 = vpop.xlane.xlu1 %3237 }
 0xdb6   :  { %7440 = vrsqrt.f32 %v3285_v61  ;;  %v3271_v11 = vmul.f32 0.03125, %v3241_v42  ;;  %v3270_v24 = vmul.f32 0.03125, %v3238_v25 }
 0xdb7   :  { %7442 = vrsqrt.f32 %v3284_v14 }
 0xdb8   :  { %v3287_v39 = vadd.f32 1e-05, %v3271_v11  ;;  %v3286_v43 = vadd.f32 1e-05, %v3270_v24 }
 0xdb9   :  { %v3247_v38 = vpop.xlane.xlu0 %3246  ;;  %v3244_v7 = vpop.xlane.xlu1 %3243 }
 0xdba   :  { %7444 = vrsqrt.f32 %v3287_v39  ;;  %v3273_v35 = vmul.f32 0.03125, %v3247_v38  ;;  %v3272_v34 = vmul.f32 0.03125, %v3244_v7 }
 0xdbb   :  { %7446 = vrsqrt.f32 %v3286_v43 }
 0xdbc   :  { %v3289_v21 = vadd.f32 1e-05, %v3273_v35  ;;  %v3288_v18 = vadd.f32 1e-05, %v3272_v34 }
 0xdbd   :  { %v3250_v10 = vpop.xlane.xlu1 %3249 }
 0xdbe   :  { %7448 = vrsqrt.f32 %v3289_v21  ;;  %v3274_v1 = vmul.f32 0.03125, %v3250_v10 }
 0xdbf   :  { %v7439_v29 = vpop.eup %7438  ;;  %7450 = vrsqrt.f32 %v3288_v18 }
 0xdc0   :  { %v3290_v45 = vadd.f32 1e-05, %v3274_v1  ;;  %v3315_v47 = vmul.f32 %v7439_v29, %v9231_v30 }
 0xdc2   :  { %7452 = vrsqrt.f32 %v3290_v45  ;;  %v3337_v51 = vmul.f32 %v9306_v19, %v3315_v47 }
 0xdc3   :  { %v7441_v48 = vpop.eup %7440 }
 0xdc4   :  { %v7443_v44 = vpop.eup %7442  ;;  %v3317_v56 = vmul.f32 %v7441_v48, %v9236_v12  ;;  %v3359_v3 = vadd.f32 %v9314_v31, %v3337_v51 }
 0xdc5   :  { %v3316_v63 = vmul.f32 %v7443_v44, %v9239_v8 }
 0xdc6   :  { %v3339_v30 = vmul.f32 %v9306_v19, %v3317_v56 }
 0xdc7   :  { %v7445_v59 = vpop.eup %7444  ;;  %v3338_v60 = vmul.f32 %v9306_v19, %v3316_v63 }
 0xdc8   :  { %v7447_v55 = vpop.eup %7446  ;;  %v3319_v62 = vmul.f32 %v7445_v59, %v9247_v41  ;;  %v3361_v61 = vadd.f32 %v9314_v31, %v3339_v30 }
 0xdc9   :  { %v3360_v50 = vadd.f32 %v9314_v31, %v3338_v60  ;;  %v3318_v0 = vmul.f32 %v7447_v55, %v9250_v22 }
 0xdca   :  { %v3341_v22 = vmul.f32 %v9306_v19, %v3319_v62 }
 0xdcb   :  { %v7449_v5 = vpop.eup %7448  ;;  %v3373_v17 = vpack.c.bf16 %v3360_v50, %v3359_v3  ;;  %v3340_v8 = vmul.f32 %v9306_v19, %v3318_v0 }
 0xdcc   :  { %v7451_v52 = vpop.eup %7450  ;;  %v3321_v12 = vmul.f32 %v7449_v5, %v9259_v26  ;;  %v3363_v26 = vadd.f32 %v9314_v31, %v3341_v22 }
 0xdcd   :  { %6898 = vmatprep.mubr.msk.bf16.mxu0 %vm786_vm4, %v3373_v17  ;;  %v3362_v14 = vadd.f32 %v9314_v31, %v3340_v8  ;;  %v3320_v42 = vmul.f32 %v7451_v52, %v9262_v57 }
 0xdce   :  { %v3343_v39 = vmul.f32 %v9306_v19, %v3321_v12 }
 0xdcf   :  { %v7453_v25 = vpop.eup %7452  ;;  %v3374_v11 = vpack.c.bf16 %v3362_v14, %v3361_v61  ;;  %v3342_v41 = vmul.f32 %v9306_v19, %v3320_v42 }
 0xdd0   :  { %v3322_v24 = vmul.f32 %v7453_v25, %v9271_v15  ;;  %v3365_v57 = vadd.f32 %v9314_v31, %v3343_v39 }
 0xdd1   :  { %6899 = vmatmul.mubr.msk.bf16.gmra.mxu0 %vm786_vm4, %v3374_v11  ;;  %v3364_v43 = vadd.f32 %v9314_v31, %v3342_v41 }
 0xdd2   :  { %v3344_v38 = vmul.f32 %v9306_v19, %v3322_v24 }
 0xdd3   :  { %v3375_v7 = vpack.c.bf16 %v3364_v43, %v3363_v26 }
 0xdd4   :  { %v3366_v35 = vadd.f32 %v9314_v31, %v3344_v38 }
 0xdd5   :  { %6902 = vmatprep.mubr.msk.bf16.mxu0 %vm786_vm4, %v3375_v7 }
 0xdd6   :  { %v3376_v34 = vpack.c.bf16 %v3366_v35, %v3365_v57 }
 0xdd9   :  { %6903 = vmatmul.mubr.msk.bf16.gmra.mxu0 %vm786_vm4, %v3376_v34 }
 0xddc   :  { %v3253_v15 = vpop.xlane.xlu0 %3252 }
 0xddd   :  { %v3275_v21 = vmul.f32 0.03125, %v3253_v15 }
 0xddf   :  { %v3291_v18 = vadd.f32 1e-05, %v3275_v21 }
 0xde0   :  { %v3259_v10 = vpop.xlane.xlu0 %3258  ;;  %v3256_v1 = vpop.xlane.xlu1 %3255 }
 0xde1   :  { %7454 = vrsqrt.f32 %v3291_v18  ;;  %v3277_v29 = vmul.f32 0.03125, %v3259_v10  ;;  %v3276_v45 = vmul.f32 0.03125, %v3256_v1 }
 0xde3   :  { %v3293_v47 = vadd.f32 1e-05, %v3277_v29  ;;  %v3292_v48 = vadd.f32 1e-05, %v3276_v45 }
 0xde4   :  { %v3262_v44 = vpop.xlane.xlu1 %3261 }
 0xde5   :  { %7456 = vrsqrt.f32 %v3293_v47  ;;  %v3278_v51 = vmul.f32 0.03125, %v3262_v44 }
 0xde6   :  { %7458 = vrsqrt.f32 %v3292_v48 }
 0xde7   :  { %v3294_v63 = vadd.f32 1e-05, %v3278_v51 }
 0xde9   :  { %7460 = vrsqrt.f32 %v3294_v63 }
 0xdee   :  { %v7455_v56 = vpop.eup %7454 }
 0xdef   :  { %v3323_v59 = vmul.f32 %v7455_v56, %v9279_v46 }
 0xdf1   :  { %v3345_v0 = vmul.f32 %v9306_v19, %v3323_v59 }
 0xdf2   :  { %v7457_v60 = vpop.eup %7456 }
 0xdf3   :  { %v7459_v55 = vpop.eup %7458  ;;  %v3325_v3 = vmul.f32 %v7457_v60, %v9284_v58  ;;  %v3367_v8 = vadd.f32 %v9314_v31, %v3345_v0 }
 0xdf4   :  { %v3324_v50 = vmul.f32 %v7459_v55, %v9287_v2 }
 0xdf5   :  { %v3347_v17 = vmul.f32 %v9306_v19, %v3325_v3 }
 0xdf6   :  { %v7461_v30 = vpop.eup %7460  ;;  %v3346_v62 = vmul.f32 %v9306_v19, %v3324_v50 }
 0xdf7   :  { %v3326_v5 = vmul.f32 %v7461_v30, %v9295_v40  ;;  %v3369_v58 = vadd.f32 %v9314_v31, %v3347_v17 }
 0xdf8   :  { %v3368_v52 = vadd.f32 %v9314_v31, %v3346_v62 }
 0xdf9   :  { %v3348_v46 = vmul.f32 %v9306_v19, %v3326_v5 }
 0xdfa   :  { %v3377_v12 = vpack.c.bf16 %v3368_v52, %v3367_v8  ;;  %v6386_v52 = vld [vmem:[%s10417_s17 + $0x8] sm:$0xff]  }
 0xdfb   :  { %v3370_v2 = vadd.f32 %v9314_v31, %v3348_v46  ;;  %v6368_v46 = vld [vmem:[%s10417_s17] sm:$0xff]  }
 0xdfc   :  { %6906 = vmatprep.mubr.msk.bf16.mxu0 %vm786_vm4, %v3377_v12  ;;  %v6373_v12 = vunpack.c.l.bf16 %v6386_v52 }
 0xdfd   :  { %v3378_v61 = vpack.c.bf16 %v3370_v2, %v3369_v58  ;;  %v6369_v58 = vunpack.c.l.bf16 %v6368_v46 }
 0xdff   :  { %6907 = vmatmul.mubr.msk.bf16.gmra.mxu0 %vm786_vm4, %v3378_v61 }
 0xe5b   :  { %v6896_v14 = vpop.f32.mrf.mxu0 }
 0xe5d   :  { %v3453_v40 = vpop.f32.mrf.mxu0 }
 0xe5f   :  { %v6897_v42 = vpop.f32.mrf.mxu0 }
 0xe60   :  { %v9368_v22 = vpack.c.bf16 %v6897_v42, %v6896_v14 }
 0xe61   :  { %v3456_v25 = vpop.f32.mrf.mxu0 }
 0xe62   :  { %v9370_v11 = vpack.c.bf16 %v3456_v25, %v3453_v40  ;;  %3537 = vrot.lane.b32.xlu0 %v9368_v22, %s7693_s4  ;;  %v6374_v25 = vunpack.c.h.bf16 %v6386_v52 }
 0xe64   :  { %3535 = vrot.lane.b32.xlu1 %v9370_v11, %s7693_s4  ;;  %6914 = vmatprep.mubr.msk.bf16.mxu1 %vm523_vm3, %v9370_v11 }
 0xe91   :  { %v6900_v19 = vpop.f32.mrf.mxu0 }
 0xe93   :  { %v3469_v31 = vpop.f32.mrf.mxu0 }
 0xe95   :  { %v6901_v41 = vpop.f32.mrf.mxu0 }
 0xe96   :  { %v9378_v24 = vpack.c.bf16 %v6901_v41, %v6900_v19  ;;  %v6370_v19 = vunpack.c.h.bf16 %v6368_v46 }
 0xe97   :  { %v3472_v39 = vpop.f32.mrf.mxu0 }
 0xe98   :  { %3604 = vrot.lane.b32.xlu1 %v9378_v24, %s7693_s4  ;;  %v9382_v43 = vpack.c.bf16 %v3472_v39, %v3469_v31 }
 0xe99   :  { %v6904_v26 = vpop.f32.mrf.mxu0 }
 0xe9b   :  { %v3485_v38 = vpop.f32.mrf.mxu0 }
 0xe9c   :  { %3602 = vrot.lane.b32.xlu1 %v9382_v43, %s7693_s4 }
 0xe9d   :  { %v6905_v7 = vpop.f32.mrf.mxu0 }
 0xe9e   :  { %v9386_v57 = vpack.c.bf16 %v6905_v7, %v6904_v26 }
 0xe9f   :  { %v3488_v35 = vpop.f32.mrf.mxu0 }
 0xea0   :  { %v9388_v34 = vpack.c.bf16 %v3488_v35, %v3485_v38  ;;  %3671 = vrot.lane.b32.xlu0 %v9386_v57, %s7693_s4 }
 0xea2   :  { %3669 = vrot.lane.b32.xlu1 %v9388_v34, %s7693_s4  ;;  %6930 = vmatprep.mubr.msk.bf16.mxu0 %vm523_vm3, %v9388_v34 }
 0xebf   :  { %v6908_v15 = vpop.f32.mrf.mxu0 }
 0xec1   :  { %v3501_v21 = vpop.f32.mrf.mxu0 }
 0xec3   :  { %v6909_v18 = vpop.f32.mrf.mxu0 }
 0xec4   :  { %v9396_v10 = vpack.c.bf16 %v6909_v18, %v6908_v15 }
 0xec5   :  { %v3504_v1 = vpop.f32.mrf.mxu0 }
 0xec6   :  { %v9398_v29 = vpack.c.bf16 %v3504_v1, %v3501_v21  ;;  %3738 = vrot.lane.b32.xlu0 %v9396_v10, %s7693_s4 }
 0xec8   :  { %3736 = vrot.lane.b32.xlu1 %v9398_v29, %s7693_s4 }
 0xeca   :  { %3987 = vrot.lane.b32.xlu0 %v9368_v22, %s7694_s8 }
 0xecc   :  { %3985 = vrot.lane.b32.xlu1 %v9370_v11, %s7694_s8 }
 0xed4   :  { %v3538_v45 = vpop.permute.xlu0 %3537 }
 0xed5   :  { %7155 = vmatprep.subr.msk.bf16.mxu1 %vm523_vm3, %v3538_v45  ;;  %v3549_v47 = vsel %vm523_vm3, %v3538_v45, 0 }
 0xed6   :  { %6911 = vmatpush3.bf16.xpose.msra.mxu1 %v3549_v47  ;;  %v3536_v48 = vpop.permute.xlu1 %3535 }
 0xed7   :  { %7156 = vmatprep.subr.msk.bf16.mxu1 %vm523_vm3, %v3536_v48  ;;  %v3546_v44 = vsel %vm523_vm3, %v3536_v48, 0 }
 0xede   :  { %6913 = vmatpush3.bf16.xpose.msra.mxu1 %v3546_v44 }
 0xee5   :  { %6915 = vmatmul.mubr.msk.bf16.vlgmr.msra.gmra.mxu1 %vm523_vm3, %v9368_v22 }
 0xee6   :  { %6922 = vmatprep.mubr.msk.bf16.mxu1 %vm523_vm3, %v9382_v43 }
 0xf0a   :  { %v3605_v51 = vpop.permute.xlu1 %3604 }
 0xf0b   :  { %7157 = vmatprep.subr.msk.bf16.mxu1 %vm523_vm3, %v3605_v51  ;;  %v3616_v63 = vsel %vm523_vm3, %v3605_v51, 0 }
 0xf0c   :  { %6919 = vmatpush3.bf16.xpose.msra.mxu1 %v3616_v63 }
 0xf0e   :  { %v3603_v56 = vpop.permute.xlu1 %3602 }
 0xf0f   :  { %7158 = vmatprep.subr.msk.bf16.mxu1 %vm523_vm3, %v3603_v56  ;;  %v3613_v60 = vsel %vm523_vm3, %v3603_v56, 0 }
 0xf12   :  { %v3672_v59 = vpop.permute.xlu0 %3671 }
 0xf13   :  { %7159 = vmatprep.subr.msk.bf16.mxu0 %vm523_vm3, %v3672_v59  ;;  %v3683_v55 = vsel %vm523_vm3, %v3672_v59, 0 }
 0xf14   :  { %6921 = vmatpush3.bf16.xpose.msra.mxu1 %v3613_v60  ;;  %6927 = vmatpush3.bf16.xpose.msra.mxu0 %v3683_v55  ;;  %v3670_v3 = vpop.permute.xlu1 %3669 }
 0xf15   :  { %7160 = vmatprep.subr.msk.bf16.mxu0 %vm523_vm3, %v3670_v3  ;;  %v3680_v50 = vsel %vm523_vm3, %v3670_v3, 0 }
 0xf1b   :  { %6923 = vmatmul.mubr.msk.bf16.vlgmr.msra.gmra.mxu1 %vm523_vm3, %v9378_v24 }
 0xf1c   :  { %6929 = vmatpush3.bf16.xpose.msra.mxu0 %v3680_v50  ;;  %6938 = vmatprep.mubr.msk.bf16.mxu1 %vm523_vm3, %v9398_v29 }
 0xf23   :  { %6931 = vmatmul.mubr.msk.bf16.vlgmr.msra.gmra.mxu0 %vm523_vm3, %v9386_v57 }
 0xf38   :  { %v3739_v0 = vpop.permute.xlu0 %3738 }
 0xf39   :  { %7161 = vmatprep.subr.msk.bf16.mxu1 %vm523_vm3, %v3739_v0  ;;  %v3750_v30 = vsel %vm523_vm3, %v3739_v0, 0 }
 0xf3a   :  { %6935 = vmatpush3.bf16.xpose.msra.mxu1 %v3750_v30  ;;  %v3737_v62 = vpop.permute.xlu1 %3736 }
 0xf3b   :  { %7162 = vmatprep.subr.msk.bf16.mxu1 %vm523_vm3, %v3737_v62  ;;  %v3747_v8 = vsel %vm523_vm3, %v3737_v62, 0 }
 0xf3c   :  { %v3988_v5 = vpop.permute.xlu0 %3987 }
 0xf3d   :  { %6942 = vmatprep.subr.bf16.mxu0 %v3988_v5 }
 0xf3e   :  { %6943 = vmatpush3.bf16.msra.mxu0 %v3988_v5  ;;  %v3986_v17 = vpop.permute.xlu1 %3985 }
 0xf3f   :  { %6944 = vmatprep.subr.bf16.mxu0 %v3986_v17 }
 0xf42   :  { %6937 = vmatpush3.bf16.xpose.msra.mxu1 %v3747_v8  ;;  %6945 = vmatpush3.bf16.msra.mxu0 %v3986_v17 }
 0xf49   :  { %6939 = vmatmul.mubr.msk.bf16.vlgmr.msra.gmra.mxu1 %vm523_vm3, %v9396_v10 }
 0xfa5   :  { %v6916_v2 = vpop.f32.mrf.mxu1 }
 0xfa6   :  { %v9442_v61 = vadd.f32 %v6916_v2, %v6373_v12 }
 0xfa7   :  { %v3585_v14 = vpop.f32.mrf.mxu1 }
 0xfa8   :  { %v9444_v40 = vadd.f32 %v6369_v58, %v3585_v14  ;;  %v3807_v42 = vsel %vm786_vm4, %v9442_v61, -inf }
 0xfa9   :  { %3808 = vmax.xlane.f32.xlu0 %v3807_v42  ;;  %v6917_v31 = vpop.f32.mrf.mxu1 }
 0xfaa   :  { %v9448_v39 = vadd.f32 %v6917_v31, %v6374_v25  ;;  %v3801_v38 = vsel %vm786_vm4, %v9444_v40, -inf }
 0xfab   :  { %v3588_v41 = vpop.f32.mrf.mxu1 }
 0xfac   :  { %v9450_v26 = vadd.f32 %v6370_v19, %v3588_v41  ;;  %v3810_v35 = vsel %vm786_vm4, %v9448_v39, -inf }
 0xfad   :  { %3802 = vmax.xlane.f32.xlu0 %v3801_v38 }
 0xfae   :  { %v3804_v7 = vsel %vm786_vm4, %v9450_v26, -inf }
 0xfaf   :  { %3805 = vmax.xlane.f32.xlu1 %v3804_v7 }
 0xfb1   :  { %3811 = vmax.xlane.f32.xlu0 %v3810_v35 }
 0xfdb   :  { %v6924_v15 = vpop.f32.mrf.mxu1 }
 0xfdc   :  { %v9458_v21 = vadd.f32 %v6924_v15, %v6373_v12 }
 0xfdd   :  { %v3652_v18 = vpop.f32.mrf.mxu1 }
 0xfde   :  { %v9460_v1 = vadd.f32 %v6369_v58, %v3652_v18  ;;  %v3819_v45 = vsel %vm786_vm4, %v9458_v21, -inf }
 0xfdf   :  { %3820 = vmax.xlane.f32.xlu0 %v3819_v45  ;;  %v6925_v47 = vpop.f32.mrf.mxu1 }
 0xfe0   :  { %v9464_v48 = vadd.f32 %v6925_v47, %v6374_v25  ;;  %v3813_v56 = vsel %vm786_vm4, %v9460_v1, -inf }
 0xfe1   :  { %v3655_v44 = vpop.f32.mrf.mxu1 }
 0xfe2   :  { %v9466_v51 = vadd.f32 %v6370_v19, %v3655_v44  ;;  %v3822_v63 = vsel %vm786_vm4, %v9464_v48, -inf }
 0xfe3   :  { %3823 = vmax.xlane.f32.xlu1 %v3822_v63  ;;  %3814 = vmax.xlane.f32.xlu0 %v3813_v56  ;;  %v6932_v59 = vpop.f32.mrf.mxu0 }
 0xfe4   :  { %v9472_v60 = vadd.f32 %v6932_v59, %v6373_v12  ;;  %v3816_v50 = vsel %vm786_vm4, %v9466_v51, -inf }
 0xfe5   :  { %v3719_v55 = vpop.f32.mrf.mxu0 }
 0xfe6   :  { %v9474_v3 = vadd.f32 %v6369_v58, %v3719_v55  ;;  %v3831_v0 = vsel %vm786_vm4, %v9472_v60, -inf }
 0xfe7   :  { %3817 = vmax.xlane.f32.xlu1 %v3816_v50  ;;  %3832 = vmax.xlane.f32.xlu0 %v3831_v0  ;;  %v6933_v30 = vpop.f32.mrf.mxu0 }
 0xfe8   :  { %v9480_v62 = vadd.f32 %v6933_v30, %v6374_v25  ;;  %v3825_v52 = vsel %vm786_vm4, %v9474_v3, -inf }
 0xfe9   :  { %v3722_v5 = vpop.f32.mrf.mxu0 }
 0xfea   :  { %v9482_v17 = vadd.f32 %v6370_v19, %v3722_v5  ;;  %v3834_v8 = vsel %vm786_vm4, %v9480_v62, -inf }
 0xfeb   :  { %3835 = vmax.xlane.f32.xlu1 %v3834_v8  ;;  %3826 = vmax.xlane.f32.xlu0 %v3825_v52 }
 0xfec   :  { %v3828_v46 = vsel %vm786_vm4, %v9482_v17, -inf }
 0xfef   :  { %3829 = vmax.xlane.f32.xlu1 %v3828_v46 }
0x1009   :  { %v6940_v2 = vpop.f32.mrf.mxu1 }
0x100a   :  { %v9490_v14 = vadd.f32 %v6940_v2, %v6373_v12 }
0x100b   :  { %v3786_v42 = vpop.f32.mrf.mxu1 }
0x100c   :  { %v9492_v31 = vadd.f32 %v6369_v58, %v3786_v42  ;;  %v3843_v41 = vsel %vm786_vm4, %v9490_v14, -inf }
0x100d   :  { %3844 = vmax.xlane.f32.xlu0 %v3843_v41  ;;  %v6941_v38 = vpop.f32.mrf.mxu1 }
0x100e   :  { %v9496_v7 = vadd.f32 %v6941_v38, %v6374_v25  ;;  %v3837_v12 = vsel %vm786_vm4, %v9492_v31, -inf }
0x100f   :  { %v3789_v35 = vpop.f32.mrf.mxu1 }
0x1010   :  { %v9498_v15 = vadd.f32 %v6370_v19, %v3789_v35  ;;  %v3846_v18 = vsel %vm786_vm4, %v9496_v7, -inf }
0x1011   :  { %3847 = vmax.xlane.f32.xlu1 %v3846_v18  ;;  %3838 = vmax.xlane.f32.xlu0 %v3837_v12 }
0x1012   :  { %v3840_v58 = vsel %vm786_vm4, %v9498_v15, -inf }
0x1015   :  { %3841 = vmax.xlane.f32.xlu1 %v3840_v58 }
0x1026   :  { %4107 = vrot.lane.b32.xlu1 %v9388_v34, %s7694_s8 }
0x1027   :  { %4048 = vrot.lane.b32.xlu0 %v9378_v24, %s7694_s8 }
0x102b   :  { %4046 = vrot.lane.b32.xlu0 %v9382_v43, %s7694_s8 }
0x102f   :  { %4109 = vrot.lane.b32.xlu0 %v9386_v57, %s7694_s8 }
0x1032   :  { %v3809_v25 = vpop.xlane.xlu0 %3808 }
0x1033   :  { %v3851_v19 = vsub.f32 %v9442_v61, %v3809_v25 }
0x1035   :  { %v3869_v47 = vmul.f32 1.442695, %v3851_v19 }
0x1036   :  { %v3803_v45 = vpop.xlane.xlu0 %3802 }
0x1037   :  { %v3849_v44 = vsub.f32 %v9444_v40, %v3803_v45  ;;  %7462 = vpow2.f32 %v3869_v47 }
0x1038   :  { %v3806_v63 = vpop.xlane.xlu1 %3805 }
0x1039   :  { %v3850_v56 = vsub.f32 %v9450_v26, %v3806_v63  ;;  %v3865_v50 = vmul.f32 1.442695, %v3849_v44 }
0x103a   :  { %v3812_v59 = vpop.xlane.xlu0 %3811 }
0x103b   :  { %v3852_v55 = vsub.f32 %v9448_v39, %v3812_v59  ;;  %v3867_v0 = vmul.f32 1.442695, %v3850_v56 }
0x103d   :  { %v3871_v30 = vmul.f32 1.442695, %v3852_v55 }
0x103f   :  { %7464 = vpow2.f32 %v3871_v30 }
0x1040   :  { %7466 = vpow2.f32 %v3865_v50 }
0x1041   :  { %7468 = vpow2.f32 %v3867_v0 }
0x1044   :  { %v9518_v5 = vpop.eup %7462 }
0x1045   :  { %v3903_v40 = vsel %vm786_vm4, %v9518_v5, 0.0 }
0x104c   :  { %v9520_v61 = vpop.eup %7464 }
0x104d   :  { %v9524_v8 = vpop.eup %7466  ;;  %v3906_v26 = vsel %vm786_vm4, %v9520_v61, 0.0 }
0x104e   :  { %3904 = vadd.xlane.f32.xlu0 %v3903_v40  ;;  %v9528_v39 = vpop.eup %7468  ;;  %3907 = vadd.xlane.f32.xlu1 %v3906_v26  ;;  %v3897_v52 = vsel %vm786_vm4, %v9524_v8, 0.0 }
0x104f   :  { %v3900_v46 = vsel %vm786_vm4, %v9528_v39, 0.0 }
0x1052   :  { %3898 = vadd.xlane.f32.xlu0 %v3897_v52  ;;  %3901 = vadd.xlane.f32.xlu1 %v3900_v46 }
0x1068   :  { %v3821_v2 = vpop.xlane.xlu0 %3820 }
0x1069   :  { %v3855_v42 = vsub.f32 %v9458_v21, %v3821_v2 }
0x106b   :  { %v3877_v41 = vmul.f32 1.442695, %v3855_v42 }
0x106c   :  { %v3815_v38 = vpop.xlane.xlu0 %3814  ;;  %v3824_v35 = vpop.xlane.xlu1 %3823 }
0x106d   :  { %7470 = vpow2.f32 %v3877_v41  ;;  %v3853_v18 = vsub.f32 %v9460_v1, %v3815_v38  ;;  %v3856_v12 = vsub.f32 %v9464_v48, %v3824_v35 }
0x106f   :  { %v3873_v58 = vmul.f32 1.442695, %v3853_v18  ;;  %v3879_v25 = vmul.f32 1.442695, %v3856_v12 }
0x1070   :  { %v3833_v19 = vpop.xlane.xlu0 %3832  ;;  %v3818_v45 = vpop.xlane.xlu1 %3817 }
0x1071   :  { %7472 = vpow2.f32 %v3873_v58  ;;  %v3859_v47 = vsub.f32 %v9472_v60, %v3833_v19  ;;  %v3854_v44 = vsub.f32 %v9466_v51, %v3818_v45 }
0x1072   :  { %7474 = vpow2.f32 %v3879_v25 }
0x1073   :  { %v3885_v63 = vmul.f32 1.442695, %v3859_v47  ;;  %v3875_v21 = vmul.f32 1.442695, %v3854_v44 }
0x1074   :  { %v3827_v56 = vpop.xlane.xlu0 %3826  ;;  %v3836_v59 = vpop.xlane.xlu1 %3835 }
0x1075   :  { %7476 = vpow2.f32 %v3885_v63  ;;  %v3857_v55 = vsub.f32 %v9474_v3, %v3827_v56  ;;  %v3860_v1 = vsub.f32 %v9480_v62, %v3836_v59 }
0x1076   :  { %7478 = vpow2.f32 %v3875_v21 }
0x1077   :  { %v3881_v48 = vmul.f32 1.442695, %v3857_v55  ;;  %v3887_v50 = vmul.f32 1.442695, %v3860_v1 }
0x1078   :  { %v3830_v0 = vpop.xlane.xlu1 %3829 }
0x1079   :  { %7480 = vpow2.f32 %v3881_v48  ;;  %v3858_v30 = vsub.f32 %v9482_v17, %v3830_v0 }
0x107a   :  { %v9542_v60 = vpop.eup %7470  ;;  %7482 = vpow2.f32 %v3887_v50 }
0x107b   :  { %v3883_v51 = vmul.f32 1.442695, %v3858_v30  ;;  %v3915_v40 = vsel %vm786_vm4, %v9542_v60, 0.0 }
0x107c   :  { %3916 = vadd.xlane.f32.xlu0 %v3915_v40 }
0x107d   :  { %7484 = vpow2.f32 %v3883_v51 }
0x107e   :  { %v9546_v26 = vpop.eup %7472 }
0x107f   :  { %v9548_v3 = vpop.eup %7474  ;;  %v3909_v62 = vsel %vm786_vm4, %v9546_v26, 0.0 }
0x1080   :  { %3910 = vadd.xlane.f32.xlu0 %v3909_v62  ;;  %v3918_v17 = vsel %vm786_vm4, %v9548_v3, 0.0 }
0x1081   :  { %3919 = vadd.xlane.f32.xlu1 %v3918_v17 }
0x1082   :  { %v9554_v52 = vpop.eup %7476 }
0x1083   :  { %v9556_v46 = vpop.eup %7478  ;;  %v3927_v2 = vsel %vm786_vm4, %v9554_v52, 0.0 }
0x1084   :  { %3928 = vadd.xlane.f32.xlu0 %v3927_v2  ;;  %v3912_v42 = vsel %vm786_vm4, %v9556_v46, 0.0 }
0x1085   :  { %3913 = vadd.xlane.f32.xlu1 %v3912_v42 }
0x1086   :  { %v9562_v41 = vpop.eup %7480 }
0x1087   :  { %v9564_v38 = vpop.eup %7482  ;;  %v3921_v35 = vsel %vm786_vm4, %v9562_v41, 0.0 }
0x1088   :  { %3922 = vadd.xlane.f32.xlu0 %v3921_v35  ;;  %v3930_v18 = vsel %vm786_vm4, %v9564_v38, 0.0 }
0x1089   :  { %3931 = vadd.xlane.f32.xlu1 %v3930_v18 }
0x108a   :  { %v9570_v12 = vpop.eup %7484 }
0x108b   :  { %v3924_v58 = vsel %vm786_vm4, %v9570_v12, 0.0 }
0x108d   :  { %3925 = vadd.xlane.f32.xlu1 %v3924_v58 }
0x1096   :  { %v3845_v25 = vpop.xlane.xlu0 %3844 }
0x1097   :  { %v3863_v19 = vsub.f32 %v9490_v14, %v3845_v25 }
0x1099   :  { %v3893_v45 = vmul.f32 1.442695, %v3863_v19 }
0x109a   :  { %v3839_v47 = vpop.xlane.xlu0 %3838  ;;  %v3848_v44 = vpop.xlane.xlu1 %3847 }
0x109b   :  { %7486 = vpow2.f32 %v3893_v45  ;;  %v3861_v63 = vsub.f32 %v9492_v31, %v3839_v47  ;;  %v3864_v21 = vsub.f32 %v9496_v7, %v3848_v44 }
0x109d   :  { %v3889_v56 = vmul.f32 1.442695, %v3861_v63  ;;  %v3895_v59 = vmul.f32 1.442695, %v3864_v21 }
0x109e   :  { %v4049_v55 = vpop.permute.xlu0 %4048  ;;  %v3842_v1 = vpop.xlane.xlu1 %3841  ;;  %4170 = vrot.lane.b32.xlu0 %v9396_v10, %s7694_s8 }
0x109f   :  { %7488 = vpow2.f32 %v3889_v56  ;;  %v3862_v48 = vsub.f32 %v9498_v15, %v3842_v1  ;;  %6950 = vmatprep.subr.bf16.mxu1 %v4049_v55  ;;  %v7194_v1 = vld [vmem:[%s10418_s18] sm:$0xff]  }
0x10a0   :  { %6951 = vmatpush3.bf16.msra.mxu1 %v4049_v55  ;;  %7490 = vpow2.f32 %v3895_v59 }
0x10a1   :  { %v3891_v14 = vmul.f32 1.442695, %v3862_v48 }
0x10a2   :  { %v4047_v50 = vpop.permute.xlu0 %4046  ;;  %4403 = vrot.lane.b32.xlu0 %v9368_v22, %s7695_s0  ;;  %v4108_v2 = vpop.permute.xlu1 %4107 }
0x10a3   :  { %6952 = vmatprep.subr.bf16.mxu1 %v4047_v50  ;;  %7492 = vpow2.f32 %v3891_v14 }
0x10a4   :  { %6953 = vmatpush3.bf16.msra.mxu1 %v4047_v50 }
0x10a6   :  { %v4110_v31 = vpop.permute.xlu0 %4109  ;;  %4397 = vrot.lane.b32.xlu0 %v9370_v11, %s7696_s11 }
0x10a7   :  { %6958 = vmatprep.subr.bf16.mxu0 %v4110_v31 }
0x10a8   :  { %v9584_v7 = vpop.eup %7486 }
0x10a9   :  { %v3939_v15 = vsel %vm786_vm4, %v9584_v7, 0.0 }
0x10aa   :  { %3940 = vadd.xlane.f32.xlu1 %v3939_v15  ;;  %4399 = vrot.lane.b32.xlu0 %v9368_v22, %s7696_s11 }
0x10ac   :  { %v9590_v0 = vpop.eup %7488 }
0x10ad   :  { %v3933_v30 = vsel %vm786_vm4, %v9590_v0, 0.0  ;;  %v9594_v51 = vpop.eup %7490 }
0x10ae   :  { %3934 = vadd.xlane.f32.xlu1 %v3933_v30  ;;  %4541 = vrot.lane.b32.xlu0 %v9386_v57, %s7695_s0  ;;  %v3942_v40 = vsel %vm786_vm4, %v9594_v51, 0.0 }
0x10b0   :  { %v9600_v62 = vpop.eup %7492 }
0x10b1   :  { %v3936_v17 = vsel %vm786_vm4, %v9600_v62, 0.0 }
0x10b2   :  { %3943 = vadd.xlane.f32.xlu1 %v3942_v40  ;;  %4468 = vrot.lane.b32.xlu0 %v9378_v24, %s7696_s11 }
0x10b6   :  { %3937 = vadd.xlane.f32.xlu1 %v3936_v17  ;;  %4610 = vrot.lane.b32.xlu0 %v9396_v10, %s7695_s0 }
0x10ba   :  { %4537 = vrot.lane.b32.xlu0 %v9386_v57, %s7696_s11 }
0x10be   :  { %4604 = vrot.lane.b32.xlu0 %v9398_v29, %s7696_s11 }
0x10c7   :  { %4168 = vrot.lane.b32.xlu1 %v9398_v29, %s7694_s8 }
0x10cb   :  { %4401 = vrot.lane.b32.xlu1 %v9370_v11, %s7695_s0 }
0x10cf   :  { %4472 = vrot.lane.b32.xlu1 %v9378_v24, %s7695_s0 }
0x10d3   :  { %4470 = vrot.lane.b32.xlu1 %v9382_v43, %s7695_s0 }
0x10d7   :  { %v3905_v42 = vpop.xlane.xlu0 %3904  ;;  %4466 = vrot.lane.b32.xlu1 %v9382_v43, %s7696_s11  ;;  %v3908_v35 = vpop.xlane.xlu1 %3907 }
0x10d8   :  { %7494 = vrcp.f32 %v3905_v42 }
0x10d9   :  { %7496 = vrcp.f32 %v3908_v35 }
0x10db   :  { %v3899_v18 = vpop.xlane.xlu0 %3898  ;;  %4539 = vrot.lane.b32.xlu1 %v9388_v34, %s7695_s0  ;;  %v3902_v58 = vpop.xlane.xlu1 %3901 }
0x10dc   :  { %7498 = vrcp.f32 %v3899_v18 }
0x10dd   :  { %7500 = vrcp.f32 %v3902_v58 }
0x10df   :  { %4535 = vrot.lane.b32.xlu1 %v9388_v34, %s7696_s11 }
0x10e3   :  { %4608 = vrot.lane.b32.xlu1 %v9398_v29, %s7695_s0 }
0x10e5   :  { %v7495_v25 = vpop.eup %7494 }
0x10e6   :  { %v7497_v19 = vpop.eup %7496  ;;  %v3963_v63 = vmul.f32 %v7495_v25, %v9518_v5 }
0x10e7   :  { %4606 = vrot.lane.b32.xlu1 %v9396_v10, %s7696_s11  ;;  %v3964_v21 = vmul.f32 %v7497_v19, %v9520_v61 }
0x10e9   :  { %v7499_v45 = vpop.eup %7498  ;;  %v3978_v55 = vpack.c.bf16 %v3964_v21, %v3963_v63 }
0x10ea   :  { %v7501_v47 = vpop.eup %7500  ;;  %v3961_v44 = vmul.f32 %v7499_v45, %v9524_v8 }
0x10eb   :  { %v3962_v56 = vmul.f32 %v7501_v47, %v9528_v39 }
0x10ed   :  { %v3977_v59 = vpack.c.bf16 %v3962_v56, %v3961_v44 }
0x10ef   :  { %6946 = vmatprep.mubr.msk.bf16.mxu0 %vm786_vm4, %v3977_v59 }
0x10f0   :  { %6947 = vmatmul.mubr.msk.bf16.vlgmr.msra.gmra.mxu0 %vm786_vm4, %v3978_v55 }
0x10f1   :  { %6959 = vmatpush3.bf16.msra.mxu0 %v4110_v31 }
0x10f2   :  { %6960 = vmatprep.subr.bf16.mxu0 %v4108_v2 }
0x10f5   :  { %6961 = vmatpush3.bf16.msra.mxu0 %v4108_v2 }
0x10f6   :  { %6974 = vmatprep.subr.bf16.mxu0 %v7194_v1 }
0x1105   :  { %v3917_v8 = vpop.xlane.xlu0 %3916 }
0x1109   :  { %v3911_v5 = vpop.xlane.xlu0 %3910 }
0x110a   :  { %v3920_v48 = vpop.xlane.xlu1 %3919 }
0x110b   :  { %7502 = vrcp.f32 %v3920_v48 }
0x110c   :  { %7504 = vrcp.f32 %v3911_v5 }
0x110d   :  { %v3929_v61 = vpop.xlane.xlu0 %3928  ;;  %7506 = vrcp.f32 %v3917_v8 }
0x110e   :  { %v3914_v39 = vpop.xlane.xlu1 %3913 }
0x110f   :  { %7508 = vrcp.f32 %v3914_v39 }
0x1111   :  { %v3923_v14 = vpop.xlane.xlu0 %3922 }
0x1112   :  { %v3932_v50 = vpop.xlane.xlu1 %3931 }
0x1113   :  { %7510 = vrcp.f32 %v3932_v50 }
0x1114   :  { %7512 = vrcp.f32 %v3923_v14 }
0x1115   :  { %v4171_v31 = vpop.permute.xlu0 %4170  ;;  %7514 = vrcp.f32 %v3929_v61 }
0x1116   :  { %v3926_v15 = vpop.xlane.xlu1 %3925  ;;  %6966 = vmatprep.subr.bf16.mxu1 %v4171_v31 }
0x1117   :  { %7516 = vrcp.f32 %v3926_v15 }
0x1118   :  { %v7503_v30 = vpop.eup %7502 }
0x1119   :  { %v4404_v40 = vpop.permute.xlu0 %4403  ;;  %v7505_v17 = vpop.eup %7504  ;;  %v3968_v35 = vmul.f32 %v7503_v30, %v9548_v3 }
0x111a   :  { %v7507_v2 = vpop.eup %7506  ;;  %v3965_v18 = vmul.f32 %v7505_v17, %v9546_v26 }
0x111b   :  { %v3967_v25 = vmul.f32 %v7507_v2, %v9542_v60 }
0x111c   :  { %v7509_v42 = vpop.eup %7508 }
0x111d   :  { %v3966_v58 = vmul.f32 %v7509_v42, %v9556_v46  ;;  %v4398_v19 = vpop.permute.xlu0 %4397  ;;  %v3980_v47 = vpack.c.bf16 %v3968_v35, %v3967_v25  ;;  %v4415_v35 = vsel %vm523_vm3, %v4404_v40, 0 }
0x111f   :  { %v3979_v45 = vpack.c.bf16 %v3966_v58, %v3965_v18 }
0x1120   :  { %v7511_v44 = vpop.eup %7510 }
0x1121   :  { %6954 = vmatprep.mubr.msk.bf16.mxu1 %vm786_vm4, %v3979_v45  ;;  %v7513_v63 = vpop.eup %7512  ;;  %v3972_v3 = vmul.f32 %v7511_v44, %v9564_v38  ;;  %v4400_v59 = vpop.permute.xlu0 %4399 }
0x1122   :  { %6955 = vmatmul.mubr.msk.bf16.vlgmr.msra.gmra.mxu1 %vm786_vm4, %v3980_v47  ;;  %v7515_v21 = vpop.eup %7514  ;;  %v3969_v26 = vmul.f32 %v7513_v63, %v9562_v41 }
0x1123   :  { %6967 = vmatpush3.bf16.msra.mxu1 %v4171_v31  ;;  %v3971_v60 = vmul.f32 %v7515_v21, %v9554_v52 }
0x1124   :  { %v7517_v56 = vpop.eup %7516 }
0x1125   :  { %v3970_v46 = vmul.f32 %v7517_v56, %v9570_v12  ;;  %v3982_v8 = vpack.c.bf16 %v3972_v3, %v3971_v60  ;;  %v9651_v5 = vpop.permute.xlu0 %4541 }
0x1127   :  { %v3981_v55 = vpack.c.bf16 %v3970_v46, %v3969_v26 }
0x1129   :  { %6962 = vmatprep.mubr.msk.bf16.mxu0 %vm786_vm4, %v3981_v55 }
0x112a   :  { %6963 = vmatmul.mubr.msk.bf16.vlgmr.msra.gmra.mxu0 %vm786_vm4, %v3982_v8 }
0x112b   :  { %6975 = vmatpush3.bf16.msra.mxu0 %v7194_v1 }
0x112c   :  { %7167 = vmatprep.subr.msk.bf16.mxu0 %vm523_vm3, %v9651_v5 }
0x1133   :  { %v3941_v38 = vpop.xlane.xlu1 %3940 }
0x1137   :  { %v3935_v48 = vpop.xlane.xlu1 %3934 }
0x113b   :  { %v3944_v61 = vpop.xlane.xlu1 %3943 }
0x113c   :  { %7518 = vrcp.f32 %v3944_v61 }
0x113d   :  { %7520 = vrcp.f32 %v3935_v48 }
0x113e   :  { %7522 = vrcp.f32 %v3941_v38  ;;  %v4553_v38 = vsel %vm523_vm3, %v9651_v5, 0 }
0x113f   :  { %v3938_v41 = vpop.xlane.xlu1 %3937 }
0x1140   :  { %7524 = vrcp.f32 %v3938_v41 }
0x1143   :  { %v4169_v52 = vpop.permute.xlu1 %4168 }
0x1144   :  { %6968 = vmatprep.subr.bf16.mxu1 %v4169_v52 }
0x1145   :  { %6969 = vmatpush3.bf16.msra.mxu1 %v4169_v52 }
0x1146   :  { %7163 = vmatprep.subr.msk.bf16.mxu1 %vm523_vm3, %v4404_v40 }
0x1147   :  { %v4402_v17 = vpop.permute.xlu1 %4401 }
0x1149   :  { %v7519_v12 = vpop.eup %7518 }
0x114a   :  { %v7521_v39 = vpop.eup %7520  ;;  %v3976_v50 = vmul.f32 %v7519_v12, %v9594_v51 }
0x114b   :  { %v7523_v14 = vpop.eup %7522  ;;  %v3973_v31 = vmul.f32 %v7521_v39, %v9590_v0  ;;  %v4473_v51 = vpop.permute.xlu1 %4472  ;;  %v4412_v0 = vsel %vm523_vm3, %v4402_v17, 0 }
0x114c   :  { %v3975_v30 = vmul.f32 %v7523_v14, %v9584_v7  ;;  %v4469_v7 = vpop.permute.xlu0 %4468  ;;  %v4484_v58 = vsel %vm523_vm3, %v4473_v51, 0 }
0x114d   :  { %v7525_v1 = vpop.eup %7524 }
0x114e   :  { %v3974_v15 = vmul.f32 %v7525_v1, %v9600_v62  ;;  %v3984_v42 = vpack.c.bf16 %v3976_v50, %v3975_v30 }
0x114f   :  { %v4471_v62 = vpop.permute.xlu1 %4470 }
0x1150   :  { %v3983_v2 = vpack.c.bf16 %v3974_v15, %v3973_v31  ;;  %v4611_v40 = vpop.permute.xlu0 %4610 }
0x1151   :  { %v4622_v44 = vsel %vm523_vm3, %v4611_v40, 0 }
0x1152   :  { %6970 = vmatprep.mubr.msk.bf16.mxu1 %vm786_vm4, %v3983_v2 }
0x1153   :  { %6971 = vmatmul.mubr.msk.bf16.vlgmr.msra.gmra.mxu1 %vm786_vm4, %v3984_v42  ;;  %v4467_v18 = vpop.permute.xlu1 %4466 }
0x1154   :  { %6993 = vmatpush3.bf16.xpose.msra.mxu1 %v4415_v35  ;;  %6996 = vmatprep.mubr.msk.bf16.mxu1 %vm523_vm3, %v4398_v19  ;;  %v4481_v19 = vsel %vm523_vm3, %v4471_v62, 0  ;;  %v4538_v45 = vpop.permute.xlu0 %4537 }
0x1155   :  { %7164 = vmatprep.subr.msk.bf16.mxu1 %vm523_vm3, %v4402_v17 }
0x1157   :  { %v4540_v25 = vpop.permute.xlu1 %4539 }
0x1158   :  { %v4605_v63 = vpop.permute.xlu0 %4604  ;;  %v4550_v48 = vsel %vm523_vm3, %v4540_v25, 0 }
0x115b   :  { %v4536_v47 = vpop.permute.xlu1 %4535 }
0x115c   :  { %6995 = vmatpush3.bf16.xpose.msra.mxu1 %v4412_v0 }
0x115d   :  { %7165 = vmatprep.subr.msk.bf16.mxu1 %vm523_vm3, %v4473_v51 }
0x115f   :  { %v4609_v21 = vpop.permute.xlu1 %4608 }
0x1160   :  { %v4619_v56 = vsel %vm523_vm3, %v4609_v21, 0 }
0x1163   :  { %6997 = vmatmul.mubr.msk.bf16.vlgmr.msra.gmra.mxu1 %vm523_vm3, %v4400_v59  ;;  %v4607_v3 = vpop.permute.xlu1 %4606 }
0x1164   :  { %7001 = vmatpush3.bf16.xpose.msra.mxu1 %v4484_v58  ;;  %7004 = vmatprep.mubr.msk.bf16.mxu1 %vm523_vm3, %v4467_v18 }
0x1165   :  { %7166 = vmatprep.subr.msk.bf16.mxu1 %vm523_vm3, %v4471_v62  ;;  %v6388_v62 = vld [vmem:[%s10417_s17 + $0x18] sm:$0xff]  }
0x1166   :  { %v9698_v18 = vunpack.c.l.bf16 %v6388_v62 }
0x116c   :  { %7003 = vmatpush3.bf16.xpose.msra.mxu1 %v4481_v19 }
0x116d   :  { %7169 = vmatprep.subr.msk.bf16.mxu1 %vm523_vm3, %v4611_v40 }
0x1173   :  { %7005 = vmatmul.mubr.msk.bf16.vlgmr.msra.gmra.mxu1 %vm523_vm3, %v4469_v7  ;;  %v6387_v7 = vld [vmem:[%s10417_s17 + $0x10] sm:$0xff]  }
0x1174   :  { %7017 = vmatpush3.bf16.xpose.msra.mxu1 %v4622_v44  ;;  %7020 = vmatprep.mubr.msk.bf16.mxu1 %vm523_vm3, %v4605_v63  ;;  %v9700_v58 = vunpack.c.l.bf16 %v6387_v7  ;;  %v9711_v63 = vunpack.c.h.bf16 %v6388_v62 }
0x1175   :  { %7170 = vmatprep.subr.msk.bf16.mxu1 %vm523_vm3, %v4609_v21  ;;  %v9713_v21 = vunpack.c.h.bf16 %v6387_v7 }
0x117c   :  { %7019 = vmatpush3.bf16.xpose.msra.mxu1 %v4619_v56 }
0x1183   :  { %7021 = vmatmul.mubr.msk.bf16.vlgmr.msra.gmra.mxu1 %vm523_vm3, %v4607_v3 }
0x11b0   :  { %v6948_v59 = vpop.f32.mrf.mxu0 }
0x11b2   :  { %v4031_v26 = vpop.f32.mrf.mxu0 }
0x11b4   :  { %v6949_v46 = vpop.f32.mrf.mxu0 }
0x11b5   :  { %v4230_v8 = vpack.c.bf16 %v6949_v46, %v6948_v59 }
0x11b6   :  { %v4034_v60 = vpop.f32.mrf.mxu0 }
0x11b7   :  { %v4229_v55 = vpack.c.bf16 %v4034_v60, %v4031_v26 }
0x11b9   :  { %6976 = vmatprep.mubr.msk.bf16.mxu0 %vm523_vm3, %v4229_v55 }
0x11ba   :  { %6977 = vmatmul.mubr.msk.bf16.vlgmr.msra.gmra.mxu0 %vm523_vm3, %v4230_v8 }
0x11bb   :  { %7009 = vmatpush3.bf16.xpose.msra.mxu0 %v4553_v38 }
0x11bc   :  { %7168 = vmatprep.subr.msk.bf16.mxu0 %vm523_vm3, %v4540_v25 }
0x11c3   :  { %7011 = vmatpush3.bf16.xpose.msra.mxu0 %v4550_v48 }
0x11e2   :  { %v6956_v61 = vpop.f32.mrf.mxu1 }
0x11e4   :  { %v4092_v41 = vpop.f32.mrf.mxu1 }
0x11e6   :  { %v6957_v52 = vpop.f32.mrf.mxu1 }
0x11e7   :  { %v4232_v14 = vpack.c.bf16 %v6957_v52, %v6956_v61 }
0x11e8   :  { %v4095_v12 = vpop.f32.mrf.mxu1 }
0x11e9   :  { %v4231_v39 = vpack.c.bf16 %v4095_v12, %v4092_v41 }
0x11ea   :  { %v6964_v1 = vpop.f32.mrf.mxu0 }
0x11eb   :  { %6980 = vmatprep.mubr.msk.bf16.mxu0 %vm523_vm3, %v4231_v39 }
0x11ec   :  { %v4153_v50 = vpop.f32.mrf.mxu0  ;;  %6981 = vmatmul.mubr.msk.bf16.gmra.mxu0 %vm523_vm3, %v4232_v14 }
0x11ee   :  { %v6965_v5 = vpop.f32.mrf.mxu0 }
0x11ef   :  { %v4234_v30 = vpack.c.bf16 %v6965_v5, %v6964_v1 }
0x11f0   :  { %v4156_v31 = vpop.f32.mrf.mxu0 }
0x11f1   :  { %v4233_v15 = vpack.c.bf16 %v4156_v31, %v4153_v50 }
0x11f3   :  { %6984 = vmatprep.mubr.msk.bf16.mxu0 %vm523_vm3, %v4233_v15 }
0x11f4   :  { %6985 = vmatmul.mubr.msk.bf16.gmra.mxu0 %vm523_vm3, %v4234_v30 }
0x1213   :  { %v6972_v17 = vpop.f32.mrf.mxu1 }
0x1215   :  { %v4214_v2 = vpop.f32.mrf.mxu1 }
0x1217   :  { %v6973_v42 = vpop.f32.mrf.mxu1 }
0x1218   :  { %v4236_v0 = vpack.c.bf16 %v6973_v42, %v6972_v17 }
0x1219   :  { %v4217_v35 = vpop.f32.mrf.mxu1 }
0x121a   :  { %v4235_v51 = vpack.c.bf16 %v4217_v35, %v4214_v2 }
0x121c   :  { %6988 = vmatprep.mubr.msk.bf16.mxu0 %vm523_vm3, %v4235_v51 }
0x121d   :  { %6989 = vmatmul.mubr.msk.bf16.gmra.mxu0 %vm523_vm3, %v4236_v0 }
0x121e   :  { %7012 = vmatprep.mubr.msk.bf16.mxu0 %vm523_vm3, %v4536_v47 }
0x1223   :  { %v6998_v40 = vpop.f32.mrf.mxu1 }
0x1224   :  { %v9703_v25 = vadd.f32 %v6998_v40, %v9698_v18 }
0x1225   :  { %v4451_v19 = vpop.f32.mrf.mxu1  ;;  %7013 = vmatmul.mubr.msk.bf16.vlgmr.msra.gmra.mxu0 %vm523_vm3, %v4538_v45 }
0x1226   :  { %v9707_v44 = vadd.f32 %v9700_v58, %v4451_v19  ;;  %v4679_v47 = vsel %vm786_vm4, %v9703_v25, -inf }
0x1227   :  { %4680 = vmax.xlane.f32.xlu0 %v4679_v47  ;;  %v6999_v56 = vpop.f32.mrf.mxu1 }
0x1228   :  { %v9716_v59 = vadd.f32 %v6999_v56, %v9711_v63  ;;  %v4673_v45 = vsel %vm786_vm4, %v9707_v44, -inf }
0x1229   :  { %v4454_v3 = vpop.f32.mrf.mxu1 }
0x122a   :  { %v4455_v26 = vadd.f32 %v9713_v21, %v4454_v3  ;;  %v4682_v60 = vsel %vm786_vm4, %v9716_v59, -inf }
0x122b   :  { %4674 = vmax.xlane.f32.xlu0 %v4673_v45 }
0x122c   :  { %v4676_v46 = vsel %vm786_vm4, %v4455_v26, -inf }
0x122d   :  { %4677 = vmax.xlane.f32.xlu1 %v4676_v46 }
0x122f   :  { %4683 = vmax.xlane.f32.xlu0 %v4682_v60 }
0x1233   :  { %v7006_v55 = vpop.f32.mrf.mxu1 }
0x1234   :  { %v9725_v8 = vadd.f32 %v7006_v55, %v9698_v18 }
0x1235   :  { %v4520_v38 = vpop.f32.mrf.mxu1 }
0x1236   :  { %v9728_v48 = vadd.f32 %v9700_v58, %v4520_v38  ;;  %v4691_v61 = vsel %vm786_vm4, %v9725_v8, -inf }
0x1237   :  { %4692 = vmax.xlane.f32.xlu0 %v4691_v61  ;;  %v7007_v41 = vpop.f32.mrf.mxu1 }
0x1238   :  { %v9733_v52 = vadd.f32 %v7007_v41, %v9711_v63  ;;  %v4685_v1 = vsel %vm786_vm4, %v9728_v48, -inf }
0x1239   :  { %v4523_v12 = vpop.f32.mrf.mxu1 }
0x123a   :  { %v4524_v39 = vadd.f32 %v9713_v21, %v4523_v12  ;;  %v4694_v14 = vsel %vm786_vm4, %v9733_v52, -inf }
0x123b   :  { %4695 = vmax.xlane.f32.xlu1 %v4694_v14  ;;  %4686 = vmax.xlane.f32.xlu0 %v4685_v1 }
0x123c   :  { %v4688_v50 = vsel %vm786_vm4, %v4524_v39, -inf }
0x123f   :  { %4689 = vmax.xlane.f32.xlu1 %v4688_v50 }
0x1243   :  { %v9741_v5 = vpop.f32.mrf.mxu1 }
0x1245   :  { %v4658_v31 = vpop.f32.mrf.mxu1 }
0x1246   :  { %v9744_v15 = vadd.f32 %v9700_v58, %v4658_v31 }
0x1247   :  { %v7023_v30 = vpop.f32.mrf.mxu1 }
0x1248   :  { %v4709_v17 = vsel %vm786_vm4, %v9744_v15, -inf  ;;  %v9752_v35 = vadd.f32 %v7023_v30, %v9711_v63 }
0x1249   :  { %v4661_v2 = vpop.f32.mrf.mxu1  ;;  %4710 = vmax.xlane.f32.xlu0 %v4709_v17 }
0x124a   :  { %v9749_v42 = vadd.f32 %v9713_v21, %v4661_v2  ;;  %v4718_v0 = vsel %vm786_vm4, %v9752_v35, -inf }
0x124c   :  { %v4712_v51 = vsel %vm786_vm4, %v9749_v42, -inf }
0x124d   :  { %4713 = vmax.xlane.f32.xlu1 %v4712_v51 }
0x1251   :  { %4719 = vmax.xlane.f32.xlu1 %v4718_v0 }
0x127a   :  { %v9758_v62 = vpop.f32.mrf.mxu0 }
0x127c   :  { %v9760_v7 = vpop.f32.mrf.mxu0 }
0x127e   :  { %v9762_v47 = vpop.f32.mrf.mxu0 }
0x1280   :  { %v9764_v3 = vpop.f32.mrf.mxu0 }
0x12ac   :  { %v9766_v45 = vpop.f32.mrf.mxu0 }
0x12ae   :  { %v9768_v46 = vpop.f32.mrf.mxu0 }
0x12b0   :  { %v9770_v60 = vpop.f32.mrf.mxu0  ;;  %v4681_v38 = vpop.xlane.xlu0 %4680 }
0x12b4   :  { %v4675_v12 = vpop.xlane.xlu0 %4674 }
0x12b5   :  { %v4721_v17 = vsub.f32 %v9707_v44, %v4675_v12 }
0x12b6   :  { %v4678_v40 = vpop.xlane.xlu1 %4677 }
0x12b7   :  { %v4722_v19 = vsub.f32 %v4455_v26, %v4678_v40  ;;  %v9776_v26 = vpop.f32.mrf.mxu0 }
0x12b8   :  { %v4684_v1 = vpop.xlane.xlu0 %4683 }
0x12b9   :  { %v4739_v56 = vmul.f32 1.442695, %v4722_v19  ;;  %v9778_v41 = vpop.f32.mrf.mxu0  ;;  %v4724_v51 = vsub.f32 %v9716_v59, %v4684_v1  ;;  %v4723_v19 = vsub.f32 %v9703_v25, %v4681_v38 }
0x12bb   :  { %7526 = vpow2.f32 %v4739_v56  ;;  %v9780_v14 = vpop.f32.mrf.mxu0  ;;  %v4737_v56 = vmul.f32 1.442695, %v4721_v17  ;;  %v4743_v53 = vmul.f32 1.442695, %v4724_v51  ;;  %v4741_v44 = vmul.f32 1.442695, %v4723_v19 }
0x12bd   :  { %v9782_v50 = vpop.f32.mrf.mxu0  ;;  %7528 = vpow2.f32 %v4737_v56 }
0x12be   :  { %7530 = vpow2.f32 %v4743_v53 }
0x12bf   :  { %v9785_v2 = vpop.f32.mrf.mxu0  ;;  %7532 = vpow2.f32 %v4741_v44 }
0x12c0   :  { %v4693_v30 = vpop.xlane.xlu0 %4692 }
0x12c4   :  { %v4696_v31 = vpop.xlane.xlu1 %4695 }
0x12c5   :  { %v4728_v12 = vsub.f32 %v9733_v52, %v4696_v31 }
0x12c7   :  { %v4751_v51 = vmul.f32 1.442695, %v4728_v12 }
0x12c8   :  { %v9772_v55 = vpop.eup %7526  ;;  %v4690_v0 = vpop.xlane.xlu1 %4689 }
0x12c9   :  { %v4772_v61 = vsel %vm786_vm4, %v9772_v55, 0.0  ;;  %v4726_v16 = vsub.f32 %v4524_v39, %v4690_v0  ;;  %v4727_v39 = vsub.f32 %v9725_v8, %v4693_v30  ;;  %v9814_v8 = vadd.f32 %v9741_v5, %v9698_v18 }
0x12ca   :  { %4773 = vadd.xlane.f32.xlu1 %v4772_v61  ;;  %v4687_v61 = vpop.xlane.xlu0 %4686 }
0x12cb   :  { %v4725_v6 = vsub.f32 %v9728_v48, %v4687_v61  ;;  %v4747_v1 = vmul.f32 1.442695, %v4726_v16  ;;  %v4715_v61 = vsel %vm786_vm4, %v9814_v8, -inf }
0x12cd   :  { %v4745_v38 = vmul.f32 1.442695, %v4725_v6  ;;  %7534 = vpow2.f32 %v4747_v1 }
0x12cf   :  { %7536 = vpow2.f32 %v4745_v38 }
0x12d0   :  { %7538 = vpow2.f32 %v4751_v51 }
0x12d2   :  { %v4711_v32 = vpop.xlane.xlu0 %4710 }
0x12d3   :  { %v4733_v48 = vsub.f32 %v9744_v15, %v4711_v32  ;;  %v4749_v32 = vmul.f32 1.442695, %v4727_v39 }
0x12d5   :  { %v4761_v15 = vmul.f32 1.442695, %v4733_v48  ;;  %7540 = vpow2.f32 %v4749_v32 }
0x12d6   :  { %v4714_v53 = vpop.xlane.xlu1 %4713 }
0x12d7   :  { %7542 = vpow2.f32 %v4761_v15 }
0x12dd   :  { %v9788_v40 = vpop.f32.mrf.mxu0 }
0x12df   :  { %v9791_v33 = vpop.f32.mrf.mxu0 }
0x12e1   :  { %v9793_v54 = vpop.f32.mrf.mxu0 }
0x12e3   :  { %v9797_v59 = vpop.f32.mrf.mxu0 }
0x12e5   :  { %v7014_v25 = vpop.f32.mrf.mxu0 }
0x12e6   :  { %v9800_v17 = vadd.f32 %v7014_v25, %v9698_v18  ;;  %v9824_v18 = vpop.eup %7528 }
0x12e7   :  { %v4589_v0 = vpop.f32.mrf.mxu0  ;;  %v4769_v12 = vsel %vm786_vm4, %v9824_v18, 0.0 }
0x12e8   :  { %v9805_v52 = vadd.f32 %v9700_v58, %v4589_v0  ;;  %v4703_v16 = vsel %vm786_vm4, %v9800_v17, -inf  ;;  %v4734_v58 = vsub.f32 %v9749_v42, %v4714_v53  ;;  %v9830_v42 = vpop.eup %7530 }
0x12e9   :  { %v7015_v31 = vpop.f32.mrf.mxu0  ;;  %4704 = vmax.xlane.f32.xlu0 %v4703_v16  ;;  %v9832_v44 = vpop.eup %7532  ;;  %v4778_v1 = vsel %vm786_vm4, %v9830_v42, 0.0 }
0x12ea   :  { %v9810_v6 = vadd.f32 %v7015_v31, %v9711_v63  ;;  %v4697_v56 = vsel %vm786_vm4, %v9805_v52, -inf  ;;  %v4763_v5 = vmul.f32 1.442695, %v4734_v58  ;;  %v9838_v25 = vpop.eup %7534  ;;  %v4775_v51 = vsel %vm786_vm4, %v9832_v44, 0.0 }
0x12eb   :  { %v4592_v30 = vpop.f32.mrf.mxu0  ;;  %v9840_v38 = vpop.eup %7536  ;;  %v4784_v48 = vsel %vm786_vm4, %v9838_v25, 0.0 }
0x12ec   :  { %v9818_v19 = vadd.f32 %v9713_v21, %v4592_v30  ;;  %v4706_v63 = vsel %vm786_vm4, %v9810_v6, -inf  ;;  %7544 = vpow2.f32 %v4763_v5  ;;  %v9842_v39 = vpop.eup %7538  ;;  %v4781_v16 = vsel %vm786_vm4, %v9840_v38, 0.0  ;;  %v4720_v5 = vpop.xlane.xlu1 %4719 }
0x12ed   :  { %4698 = vmax.xlane.f32.xlu0 %v4697_v56  ;;  %4707 = vmax.xlane.f32.xlu1 %v4706_v63  ;;  %v9848_v0 = vpop.eup %7540  ;;  %v4790_v53 = vsel %vm786_vm4, %v9842_v39, 0.0 }
0x12ee   :  { %v4700_v21 = vsel %vm786_vm4, %v9818_v19, -inf  ;;  %v9854_v31 = vpop.eup %7542  ;;  %v4787_v32 = vsel %vm786_vm4, %v9848_v0, 0.0 }
0x12ef   :  { %v4805_v15 = vsel %vm786_vm4, %v9854_v31, 0.0 }
0x12f1   :  { %4716 = vmax.xlane.f32.xlu0 %v4715_v61  ;;  %4701 = vmax.xlane.f32.xlu1 %v4700_v21 }
0x12f5   :  { %4770 = vadd.xlane.f32.xlu0 %v4769_v12  ;;  %4779 = vadd.xlane.f32.xlu1 %v4778_v1 }
0x12f9   :  { %4776 = vadd.xlane.f32.xlu0 %v4775_v51  ;;  %4785 = vadd.xlane.f32.xlu1 %v4784_v48  ;;  %v9860_v30 = vpop.eup %7544 }
0x12fa   :  { %v4808_v58 = vsel %vm786_vm4, %v9860_v30, 0.0 }
0x12fd   :  { %4782 = vadd.xlane.f32.xlu0 %v4781_v16  ;;  %4791 = vadd.xlane.f32.xlu1 %v4790_v53 }
0x1301   :  { %4788 = vadd.xlane.f32.xlu0 %v4787_v32  ;;  %4806 = vadd.xlane.f32.xlu1 %v4805_v15 }
0x1305   :  { %4809 = vadd.xlane.f32.xlu1 %v4808_v58 }
0x1317   :  { %4859 = vrot.lane.b32.xlu0 %v9368_v22, %s7697_s29  ;;  %v4736_v22 = vsub.f32 %v9752_v35, %v4720_v5 }
0x1319   :  { %v4767_v48 = vmul.f32 1.442695, %v4736_v22 }
0x131b   :  { %4920 = vrot.lane.b32.xlu0 %v9378_v24, %s7697_s29 }
0x131f   :  { %4918 = vrot.lane.b32.xlu0 %v9382_v43, %s7697_s29 }
0x1323   :  { %4981 = vrot.lane.b32.xlu0 %v9386_v57, %s7697_s29 }
0x1353   :  { %v4774_v24 = vpop.xlane.xlu1 %4773 }
0x1372   :  { %v4705_v56 = vpop.xlane.xlu0 %4704 }
0x1373   :  { %v4731_v63 = vsub.f32 %v9800_v17, %v4705_v56 }
0x1375   :  { %v4757_v61 = vmul.f32 1.442695, %v4731_v63 }
0x1376   :  { %v4699_v21 = vpop.xlane.xlu0 %4698 }
0x1377   :  { %7546 = vpow2.f32 %v4757_v61  ;;  %v4729_v12 = vsub.f32 %v9805_v52, %v4699_v21 }
0x1379   :  { %v4753_v1 = vmul.f32 1.442695, %v4729_v12 }
0x137a   :  { %v4717_v51 = vpop.xlane.xlu0 %4716 }
0x137b   :  { %7548 = vpow2.f32 %v4753_v1  ;;  %v4735_v43 = vsub.f32 %v9814_v8, %v4717_v51 }
0x137c   :  { %7550 = vrcp.f32 %v4774_v24 }
0x137d   :  { %v4765_v16 = vmul.f32 1.442695, %v4735_v43 }
0x137e   :  { %v4771_v57 = vpop.xlane.xlu0 %4770 }
0x137f   :  { %7552 = vpow2.f32 %v4765_v16 }
0x1380   :  { %7554 = vpow2.f32 %v4767_v48 }
0x1381   :  { %7556 = vrcp.f32 %v4771_v57 }
0x1382   :  { %v4777_v17 = vpop.xlane.xlu0 %4776 }
0x1384   :  { %v9876_v53 = vpop.eup %7546 }
0x1385   :  { %v4799_v52 = vsel %vm786_vm4, %v9876_v53, 0.0 }
0x1386   :  { %4800 = vadd.xlane.f32.xlu0 %v4799_v52  ;;  %v4783_v35 = vpop.xlane.xlu0 %4782 }
0x1388   :  { %v9880_v32 = vpop.eup %7548 }
0x1389   :  { %v4793_v8 = vsel %vm786_vm4, %v9880_v32, 0.0  ;;  %v7551_v58 = vpop.eup %7550 }
0x138a   :  { %4794 = vadd.xlane.f32.xlu0 %v4793_v8  ;;  %v4789_v15 = vpop.xlane.xlu0 %4788  ;;  %v4834_v22 = vmul.f32 %v7551_v58, %v9772_v55  ;;  %v4708_v55 = vpop.xlane.xlu1 %4707 }
0x138c   :  { %v9884_v56 = vpop.eup %7552 }
0x138d   :  { %v9886_v63 = vpop.eup %7554  ;;  %v4811_v5 = vsel %vm786_vm4, %v9884_v56, 0.0 }
0x138e   :  { %v7557_v61 = vpop.eup %7556  ;;  %v4860_v21 = vpop.permute.xlu0 %4859  ;;  %4812 = vadd.xlane.f32.xlu1 %v4811_v5  ;;  %v4814_v51 = vsel %vm786_vm4, %v9886_v63, 0.0 }
0x138f   :  { %7024 = vmatprep.subr.bf16.mxu0 %v4860_v21  ;;  %v4833_v12 = vmul.f32 %v7557_v61, %v9824_v18  ;;  %v4732_v18 = vsub.f32 %v9810_v6, %v4708_v55  ;;  %v4702_v16 = vpop.xlane.xlu1 %4701 }
0x1390   :  { %7025 = vmatpush3.bf16.msra.mxu0 %v4860_v21  ;;  %v4730_v52 = vsub.f32 %v9818_v19, %v4702_v16 }
0x1391   :  { %v4849_v1 = vpack.c.bf16 %v4834_v22, %v4833_v12  ;;  %v4759_v57 = vmul.f32 1.442695, %v4732_v18 }
0x1392   :  { %v4921_v24 = vpop.permute.xlu0 %4920  ;;  %4815 = vadd.xlane.f32.xlu1 %v4814_v51  ;;  %v4755_v8 = vmul.f32 1.442695, %v4730_v52 }
0x1393   :  { %7028 = vmatprep.mubr.msk.bf16.mxu0 %vm786_vm4, %v4849_v1  ;;  %7558 = vpow2.f32 %v4759_v57 }
0x1394   :  { %7560 = vpow2.f32 %v4755_v8 }
0x1395   :  { %7562 = vrcp.f32 %v4777_v17 }
0x1396   :  { %v9895_v43 = vpop.permute.xlu0 %4918  ;;  %7564 = vrcp.f32 %v4783_v35 }
0x139a   :  { %v4982_v48 = vpop.permute.xlu0 %4981 }
0x139b   :  { %7040 = vmatprep.subr.bf16.mxu1 %v4982_v48 }
0x139c   :  { %7041 = vmatpush3.bf16.msra.mxu1 %v4982_v48 }
0x13a0   :  { %5042 = vrot.lane.b32.xlu0 %v9396_v10, %s7697_s29  ;;  %v9905_v58 = vpop.eup %7558 }
0x13a1   :  { %v4802_v10 = vsel %vm786_vm4, %v9905_v58, 0.0  ;;  %v9909_v5 = vpop.eup %7560 }
0x13a2   :  { %v7563_v22 = vpop.eup %7562 }
0x13a3   :  { %4857 = vrot.lane.b32.xlu1 %v9370_v11, %s7697_s29  ;;  %v4796_v11 = vsel %vm786_vm4, %v9909_v5, 0.0  ;;  %v7565_v51 = vpop.eup %7564  ;;  %v4835_v18 = vmul.f32 %v7563_v22, %v9832_v44 }
0x13a4   :  { %v4837_v17 = vmul.f32 %v7565_v51, %v9840_v38 }
0x13a7   :  { %4979 = vrot.lane.b32.xlu1 %v9388_v34, %s7697_s29  ;;  %v4780_v34 = vpop.xlane.xlu1 %4779 }
0x13a8   :  { %7566 = vrcp.f32 %v4780_v34 }
0x13ab   :  { %v4786_v6 = vpop.xlane.xlu1 %4785 }
0x13ac   :  { %7568 = vrcp.f32 %v4786_v6 }
0x13ad   :  { %7570 = vrcp.f32 %v4789_v15 }
0x13af   :  { %v4792_v19 = vpop.xlane.xlu1 %4791 }
0x13b3   :  { %v4807_v61 = vpop.xlane.xlu1 %4806 }
0x13b5   :  { %v7567_v48 = vpop.eup %7566 }
0x13b6   :  { %v4836_v35 = vmul.f32 %v7567_v48, %v9830_v42 }
0x13b7   :  { %v4810_v21 = vpop.xlane.xlu1 %4809 }
0x13b8   :  { %7572 = vrcp.f32 %v4810_v21  ;;  %v4850_v57 = vpack.c.bf16 %v4836_v35, %v4835_v18 }
0x13b9   :  { %7574 = vrcp.f32 %v4792_v19 }
0x13ba   :  { %7576 = vrcp.f32 %v4807_v61 }
0x13cb   :  { %4803 = vadd.xlane.f32.xlu1 %v4802_v10 }
0x13cf   :  { %4797 = vadd.xlane.f32.xlu1 %v4796_v11 }
0x13e0   :  { %5040 = vrot.lane.b32.xlu1 %v9398_v29, %s7697_s29  ;;  %v7569_v29 = vpop.eup %7568 }
0x13e1   :  { %v4838_v15 = vmul.f32 %v7569_v29, %v9838_v25  ;;  %v7571_v52 = vpop.eup %7570 }
0x13e2   :  { %v7573_v34 = vpop.eup %7572  ;;  %v4839_v42 = vmul.f32 %v7571_v52, %v9848_v0 }
0x13e3   :  { %v4851_v11 = vpack.c.bf16 %v4838_v15, %v4837_v17  ;;  %v7575_v44 = vpop.eup %7574  ;;  %v4846_v25 = vmul.f32 %v7573_v34, %v9860_v30 }
0x13e4   :  { %v7577_v38 = vpop.eup %7576  ;;  %v4840_v6 = vmul.f32 %v7575_v44, %v9842_v39 }
0x13e5   :  { %v4845_v61 = vmul.f32 %v7577_v38, %v9854_v31 }
0x13e6   :  { %v4852_v21 = vpack.c.bf16 %v4840_v6, %v4839_v42 }
0x140f   :  { %v4801_v55 = vpop.xlane.xlu0 %4800 }
0x1413   :  { %v4795_v8 = vpop.xlane.xlu0 %4794 }
0x1417   :  { %v4813_v12 = vpop.xlane.xlu1 %4812  ;;  %v5043_v19 = vpop.permute.xlu0 %5042 }
0x141b   :  { %v4816_v1 = vpop.xlane.xlu1 %4815 }
0x141c   :  { %7578 = vrcp.f32 %v4816_v1 }
0x141d   :  { %7580 = vrcp.f32 %v4813_v12 }
0x141f   :  { %v4858_v16 = vpop.permute.xlu1 %4857 }
0x1420   :  { %7026 = vmatprep.subr.bf16.mxu0 %v4858_v16 }
0x1421   :  { %7027 = vmatpush3.bf16.msra.mxu0 %v4858_v16 }
0x1422   :  { %7032 = vmatprep.subr.bf16.mxu0 %v4921_v24 }
0x1423   :  { %v4980_v10 = vpop.permute.xlu1 %4979 }
0x1424   :  { %7029 = vmatmul.mubr.msk.bf16.vlgmr.msra.gmra.mxu0 %vm786_vm4, %v4850_v57  ;;  %7042 = vmatprep.subr.bf16.mxu1 %v4980_v10 }
0x1425   :  { %7033 = vmatpush3.bf16.msra.mxu0 %v4921_v24  ;;  %7036 = vmatprep.mubr.msk.bf16.mxu0 %vm786_vm4, %v4851_v11  ;;  %v4855_v24 = vpack.c.bf16 %v4846_v25, %v4845_v61 }
0x1426   :  { %7043 = vmatpush3.bf16.msra.mxu1 %v4980_v10  ;;  %7034 = vmatprep.subr.bf16.mxu0 %v9895_v43 }
0x1429   :  { %7035 = vmatpush3.bf16.msra.mxu0 %v9895_v43  ;;  %v7579_v30 = vpop.eup %7578 }
0x142a   :  { %7048 = vmatprep.subr.bf16.mxu0 %v5043_v19  ;;  %v7581_v43 = vpop.eup %7580  ;;  %v4848_v31 = vmul.f32 %v7579_v30, %v9886_v63 }
0x142b   :  { %v4847_v51 = vmul.f32 %v7581_v43, %v9884_v56  ;;  %v7195_v56 = vld [vmem:[%s10418_s18 + $0x8] sm:$0xff]  }
0x142c   :  { %7037 = vmatmul.mubr.msk.bf16.vlgmr.msra.gmra.mxu0 %vm786_vm4, %v4852_v21  ;;  %7056 = vmatprep.subr.bf16.mxu1 %v7195_v56 }
0x142d   :  { %7049 = vmatpush3.bf16.msra.mxu0 %v5043_v19  ;;  %7052 = vmatprep.mubr.msk.bf16.mxu0 %vm786_vm4, %v4855_v24  ;;  %v4856_v48 = vpack.c.bf16 %v4848_v31, %v4847_v51 }
0x1454   :  { %v4804_v0 = vpop.xlane.xlu1 %4803 }
0x1455   :  { %7582 = vrcp.f32 %v4804_v0 }
0x1456   :  { %7584 = vrcp.f32 %v4795_v8 }
0x1457   :  { %7586 = vrcp.f32 %v4801_v55 }
0x1458   :  { %v4798_v39 = vpop.xlane.xlu1 %4797 }
0x1459   :  { %7588 = vrcp.f32 %v4798_v39 }
0x145c   :  { %v5041_v22 = vpop.permute.xlu1 %5040 }
0x145d   :  { %7050 = vmatprep.subr.bf16.mxu0 %v5041_v22 }
0x145e   :  { %7051 = vmatpush3.bf16.msra.mxu0 %v5041_v22  ;;  %v9952_v22 = vld [vmem:[%s10419_s19] ss:$0 sm:$0xff] }
0x1461   :  { %7053 = vmatmul.mubr.msk.bf16.vlgmr.msra.gmra.mxu0 %vm786_vm4, %v4856_v48  ;;  %v4374_v48 = vadd.f32 %v9758_v62, %v9952_v22 }
0x1462   :  { %v7583_v1 = vpop.eup %7582 }
0x1463   :  { %v7585_v12 = vpop.eup %7584  ;;  %v4844_v16 = vmul.f32 %v7583_v1, %v9905_v58  ;;  %v4372_v1 = vadd.f32 %v9952_v22, %v9760_v7 }
0x1464   :  { %v7587_v29 = vpop.eup %7586  ;;  %v4841_v55 = vmul.f32 %v7585_v12, %v9880_v32 }
0x1465   :  { %v4843_v63 = vmul.f32 %v7587_v29, %v9876_v53 }
0x1466   :  { %v7589_v18 = vpop.eup %7588 }
0x1467   :  { %v4842_v17 = vmul.f32 %v7589_v18, %v9909_v5  ;;  %v4854_v15 = vpack.c.bf16 %v4844_v16, %v4843_v63 }
0x1469   :  { %v4853_v35 = vpack.c.bf16 %v4842_v17, %v4841_v55  ;;  %v4375_v55 = vadd.f32 %v9762_v47, %v9952_v22  ;;  %v4373_v17 = vadd.f32 %v9952_v22, %v9764_v3  ;;  %v4376_v47 = vadd.f32 %v9952_v22, %v9768_v46 }
0x146b   :  { %7044 = vmatprep.mubr.msk.bf16.mxu1 %vm786_vm4, %v4853_v35 }
0x146c   :  { %7045 = vmatmul.mubr.msk.bf16.vlgmr.msra.gmra.mxu1 %vm786_vm4, %v4854_v15 }
0x146d   :  { %7057 = vmatpush3.bf16.msra.mxu1 %v7195_v56 }
0x14e4   :  { %v7030_v57 = vpop.f32.mrf.mxu0 }
0x14e6   :  { %v4903_v58 = vpop.f32.mrf.mxu0 }
0x14e8   :  { %v7031_v52 = vpop.f32.mrf.mxu0 }
0x14e9   :  { %v5102_v5 = vpack.c.bf16 %v7031_v52, %v7030_v57 }
0x14ea   :  { %v4906_v32 = vpop.f32.mrf.mxu0 }
0x14eb   :  { %v5101_v8 = vpack.c.bf16 %v4906_v32, %v4903_v58 }
0x14ec   :  { %v7038_v10 = vpop.f32.mrf.mxu0 }
0x14ed   :  { %7058 = vmatprep.mubr.msk.bf16.mxu1 %vm523_vm3, %v5101_v8  ;;  %v4378_v8 = vadd.f32 %v9766_v45, %v9952_v22 }
0x14ee   :  { %v4964_v53 = vpop.f32.mrf.mxu0  ;;  %7059 = vmatmul.mubr.msk.bf16.vlgmr.msra.gmra.mxu1 %vm523_vm3, %v5102_v5 }
0x14f0   :  { %v7039_v11 = vpop.f32.mrf.mxu0 }
0x14f1   :  { %v5104_v38 = vpack.c.bf16 %v7039_v11, %v7038_v10 }
0x14f2   :  { %v4967_v34 = vpop.f32.mrf.mxu0 }
0x14f3   :  { %v5103_v44 = vpack.c.bf16 %v4967_v34, %v4964_v53 }
0x14f5   :  { %7062 = vmatprep.mubr.msk.bf16.mxu1 %vm523_vm3, %v5103_v44 }
0x14f6   :  { %7063 = vmatmul.mubr.msk.bf16.gmra.mxu1 %vm523_vm3, %v5104_v38 }
0x1521   :  { %v7054_v42 = vpop.f32.mrf.mxu0 }
0x1523   :  { %v5086_v25 = vpop.f32.mrf.mxu0 }
0x1525   :  { %v7055_v19 = vpop.f32.mrf.mxu0 }
0x1526   :  { %v5108_v31 = vpack.c.bf16 %v7055_v19, %v7054_v42 }
0x1527   :  { %v5089_v24 = vpop.f32.mrf.mxu0 }
0x1528   :  { %v5107_v43 = vpack.c.bf16 %v5089_v24, %v5086_v25  ;;  %v4380_v25 = vadd.f32 %v9952_v22, %v9780_v14 }
0x152c   :  { %v7046_v6 = vpop.f32.mrf.mxu1 }
0x152e   :  { %v5025_v61 = vpop.f32.mrf.mxu1 }
0x1530   :  { %v7047_v21 = vpop.f32.mrf.mxu1 }
0x1531   :  { %v5106_v39 = vpack.c.bf16 %v7047_v21, %v7046_v6  ;;  %v4383_v21 = vadd.f32 %v9782_v50, %v9952_v22  ;;  %v4386_v50 = vadd.f32 %v9788_v40, %v9952_v22 }
0x1532   :  { %v5028_v0 = vpop.f32.mrf.mxu1 }
0x1533   :  { %v5105_v30 = vpack.c.bf16 %v5028_v0, %v5025_v61  ;;  %v4381_v0 = vadd.f32 %v9952_v22, %v9785_v2  ;;  %v4384_v2 = vadd.f32 %v9952_v22, %v9791_v33  ;;  %v4387_v33 = vadd.f32 %v9793_v54, %v9952_v22  ;;  %v10476_v54 = vld [vmem:[#allocation9_spill] sm:$0xff] }
0x1535   :  { %7066 = vmatprep.mubr.msk.bf16.mxu1 %vm523_vm3, %v5105_v30 }
0x1536   :  { %7067 = vmatmul.mubr.msk.bf16.gmra.mxu1 %vm523_vm3, %v5106_v39 }
0x1537   :  { %7070 = vmatprep.mubr.msk.bf16.mxu1 %vm523_vm3, %v5107_v43 }
0x153e   :  { %7071 = vmatmul.mubr.msk.bf16.gmra.mxu1 %vm523_vm3, %v5108_v31 }
0x15ae   :  { %v7060_v51 = vpop.f32.mrf.mxu1 }
0x15af   :  { %v5241_v29 = vadd.f32 %v7060_v51, %v4374_v48  ;;  %v10472_v48 = vld [vmem:[#allocation5_spill] sm:$0xff] }
0x15b0   :  { %v5176_v12 = vpop.f32.mrf.mxu1 }
0x15b1   :  { %v5239_v18 = vadd.f32 %v5176_v12, %v4372_v1  ;;  %v9966_v15 = vadd.f32 %v5241_v29, %v9110_v4  ;;  %v10473_v1 = vld [vmem:[#allocation6_spill] sm:$0xff] }
0x15b2   :  { %v7061_v16 = vpop.f32.mrf.mxu1 }
0x15b3   :  { %v9963_v63 = vadd.f32 %v5239_v18, %v9107_v27  ;;  %v5242_v62 = vadd.f32 %v7061_v16, %v4375_v55  ;;  %v5279_v4 = vsel %vm786_vm4, %v9966_v15, 0.0 }
0x15b4   :  { %v5179_v35 = vpop.f32.mrf.mxu1 }
0x15b5   :  { %v5240_v56 = vadd.f32 %v5179_v35, %v4373_v17  ;;  %v5273_v7 = vsel %vm786_vm4, %v9963_v63, 0.0  ;;  %v9976_v27 = vadd.f32 %v5242_v62, %v9120_v23  ;;  %v4377_v23 = vadd.f32 %v9952_v22, %v9776_v26  ;;  %v10474_v35 = vld [vmem:[#allocation7_spill] sm:$0xff] }
0x15b6   :  { %5274 = vadd.xlane.f32.xlu0 %v5273_v7  ;;  %v7064_v57 = vpop.f32.mrf.mxu1  ;;  %v4385_v17 = vadd.f32 %v9952_v22, %v9797_v59  ;;  %v10477_v59 = vld [vmem:[#allocation10_spill] sm:$0xff] }
0x15b7   :  { %v9973_v58 = vadd.f32 %v5240_v56, %v9117_v49  ;;  %v4379_v49 = vadd.f32 %v9770_v60, %v9952_v22  ;;  %v5245_v5 = vadd.f32 %v7064_v57, %v4378_v8  ;;  %v5282_v44 = vsel %vm786_vm4, %v9976_v27, 0.0  ;;  %v10475_v57 = vld [vmem:[#allocation8_spill] sm:$0xff] }
0x15b8   :  { %v5192_v3 = vpop.f32.mrf.mxu1 }
0x15b9   :  { %v5243_v52 = vadd.f32 %v5192_v3, %v4376_v47  ;;  %v5276_v32 = vsel %vm786_vm4, %v9973_v58, 0.0  ;;  %v9997_v38 = vadd.f32 %v5245_v5, %v9135_v28 }
0x15ba   :  { %5280 = vadd.xlane.f32.xlu0 %v5279_v4  ;;  %5277 = vadd.xlane.f32.xlu1 %v5276_v32  ;;  %v7065_v46 = vpop.f32.mrf.mxu1 }
0x15bb   :  { %v9989_v53 = vadd.f32 %v5243_v52, %v9131_v36  ;;  %v5246_v11 = vadd.f32 %v7065_v46, %v4379_v49  ;;  %v5291_v42 = vsel %vm786_vm4, %v9997_v38, 0.0 }
0x15bc   :  { %v5195_v10 = vpop.f32.mrf.mxu1 }
0x15bd   :  { %v5244_v34 = vadd.f32 %v5195_v10, %v4377_v23  ;;  %v10000_v60 = vadd.f32 %v5246_v11, %v9144_v20  ;;  %v5285_v26 = vsel %vm786_vm4, %v9989_v53, 0.0  ;;  %v4382_v20 = vadd.f32 %v9778_v41, %v9952_v22 }
0x15be   :  { %5283 = vadd.xlane.f32.xlu0 %v5282_v44 }
0x15bf   :  { %v9994_v45 = vadd.f32 %v5244_v34, %v9141_v13  ;;  %v5294_v13 = vsel %vm786_vm4, %v10000_v60, 0.0 }
0x15c1   :  { %v5288_v36 = vsel %vm786_vm4, %v9994_v45, 0.0 }
0x15c2   :  { %5286 = vadd.xlane.f32.xlu0 %v5285_v26  ;;  %5289 = vadd.xlane.f32.xlu1 %v5288_v36 }
0x15c6   :  { %5292 = vadd.xlane.f32.xlu0 %v5291_v42  ;;  %5295 = vadd.xlane.f32.xlu1 %v5294_v13 }
0x15f6   :  { %v7068_v28 = vpop.f32.mrf.mxu1 }
0x15f7   :  { %v5249_v19 = vadd.f32 %v7068_v28, %v4382_v20 }
0x15f8   :  { %v5208_v6 = vpop.f32.mrf.mxu1 }
0x15f9   :  { %v5247_v61 = vadd.f32 %v5208_v6, %v4380_v25  ;;  %v10022_v41 = vadd.f32 %v5249_v19, %v9158_v37 }
0x15fa   :  { %v7069_v24 = vpop.f32.mrf.mxu1 }
0x15fb   :  { %v10019_v30 = vadd.f32 %v5247_v61, %v9153_v9  ;;  %v5250_v39 = vadd.f32 %v7069_v24, %v4383_v21  ;;  %v5303_v16 = vsel %vm786_vm4, %v10022_v41, 0.0 }
0x15fc   :  { %v5211_v43 = vpop.f32.mrf.mxu1 }
0x15fd   :  { %v5248_v31 = vadd.f32 %v5211_v43, %v4381_v0  ;;  %v5297_v14 = vsel %vm786_vm4, %v10019_v30, 0.0  ;;  %v10034_v12 = vadd.f32 %v5250_v39, %v10473_v1 }
0x15fe   :  { %5298 = vadd.xlane.f32.xlu0 %v5297_v14  ;;  %v7072_v51 = vpop.f32.mrf.mxu1 }
0x15ff   :  { %v10031_v9 = vadd.f32 %v5248_v31, %v10472_v48  ;;  %v5253_v29 = vadd.f32 %v7072_v51, %v4386_v50  ;;  %v5306_v7 = vsel %vm786_vm4, %v10034_v12, 0.0 }
0x1600   :  { %v5224_v37 = vpop.f32.mrf.mxu1 }
0x1601   :  { %v5251_v18 = vadd.f32 %v5224_v37, %v4384_v2  ;;  %v5300_v55 = vsel %vm786_vm4, %v10031_v9, 0.0  ;;  %v10050_v47 = vadd.f32 %v5253_v29, %v10475_v57 }
0x1602   :  { %5304 = vadd.xlane.f32.xlu0 %v5303_v16  ;;  %5301 = vadd.xlane.f32.xlu1 %v5300_v55  ;;  %v7073_v40 = vpop.f32.mrf.mxu1 }
0x1603   :  { %v10045_v62 = vadd.f32 %v5251_v18, %v10474_v35  ;;  %v5254_v3 = vadd.f32 %v7073_v40, %v4387_v33  ;;  %v5315_v8 = vsel %vm786_vm4, %v10050_v47, 0.0 }
0x1604   :  { %v5227_v56 = vpop.f32.mrf.mxu1 }
0x1605   :  { %v5252_v52 = vadd.f32 %v5227_v56, %v4385_v17  ;;  %v5309_v4 = vsel %vm786_vm4, %v10045_v62, 0.0  ;;  %v10058_v22 = vadd.f32 %v5254_v3, %v10477_v59  ;;  %v7196_v3 = vld [vmem:[%s10422_s22 + $0x8] sm:$0xff]  }
0x1606   :  { %5307 = vadd.xlane.f32.xlu1 %v5306_v7  ;;  %5310 = vadd.xlane.f32.xlu0 %v5309_v4 }
0x1607   :  { %v10055_v32 = vadd.f32 %v5252_v52, %v10476_v54  ;;  %v5318_v49 = vsel %vm786_vm4, %v10058_v22, 0.0  ;;  %7074 = vmatprep.subr.bf16.mxu0 %v7196_v3  ;;  %v7197_v52 = vld [vmem:[%s10422_s22] sm:$0xff]  }
0x1608   :  { %7075 = vmatpush3.bf16.msra.mxu0 %v7196_v3 }
0x1609   :  { %v5312_v46 = vsel %vm786_vm4, %v10055_v32, 0.0  ;;  %7076 = vmatprep.subr.bf16.mxu0 %v7197_v52 }
0x160a   :  { %5316 = vadd.xlane.f32.xlu0 %v5315_v8  ;;  %5313 = vadd.xlane.f32.xlu1 %v5312_v46 }
0x160c   :  { %7077 = vmatpush3.bf16.msra.mxu0 %v7197_v52 }
0x160e   :  { %5319 = vadd.xlane.f32.xlu1 %v5318_v49 }
0x163f   :  { %v5275_v23 = vpop.xlane.xlu0 %5274 }
0x1640   :  { %v5321_v5 = vmul.f32 0.03125, %v5275_v23 }
0x1642   :  { %v10067_v10 = vsub.f32 %v9963_v63, %v5321_v5 }
0x1643   :  { %v5281_v11 = vpop.xlane.xlu0 %5280  ;;  %v5278_v34 = vpop.xlane.xlu1 %5277 }
0x1644   :  { %v5323_v44 = vmul.f32 0.03125, %v5281_v11  ;;  %v5322_v26 = vmul.f32 0.03125, %v5278_v34  ;;  %v5353_v36 = vmul.f32 %v10067_v10, %v10067_v10 }
0x1646   :  { %v10072_v42 = vsub.f32 %v9966_v15, %v5323_v44  ;;  %v10075_v13 = vsub.f32 %v9973_v58, %v5322_v26  ;;  %v5369_v28 = vsel %vm786_vm4, %v5353_v36, 0.0 }
0x1647   :  { %v5284_v20 = vpop.xlane.xlu0 %5283  ;;  %5370 = vadd.xlane.f32.xlu0 %v5369_v28 }
0x1648   :  { %v5324_v25 = vmul.f32 0.03125, %v5284_v20  ;;  %v5355_v6 = vmul.f32 %v10072_v42, %v10072_v42  ;;  %v5354_v19 = vmul.f32 %v10075_v13, %v10075_v13 }
0x164a   :  { %v10083_v61 = vsub.f32 %v9976_v27, %v5324_v25  ;;  %v5375_v21 = vsel %vm786_vm4, %v5355_v6, 0.0  ;;  %v5372_v24 = vsel %vm786_vm4, %v5354_v19, 0.0 }
0x164b   :  { %v5287_v0 = vpop.xlane.xlu0 %5286  ;;  %5376 = vadd.xlane.f32.xlu0 %v5375_v21  ;;  %5373 = vadd.xlane.f32.xlu1 %v5372_v24  ;;  %v5290_v39 = vpop.xlane.xlu1 %5289 }
0x164c   :  { %v5325_v43 = vmul.f32 0.03125, %v5287_v0  ;;  %v5326_v31 = vmul.f32 0.03125, %v5290_v39  ;;  %v5356_v14 = vmul.f32 %v10083_v61, %v10083_v61 }
0x164e   :  { %v10090_v51 = vsub.f32 %v9989_v53, %v5325_v43  ;;  %v10093_v50 = vsub.f32 %v9994_v45, %v5326_v31  ;;  %v5378_v2 = vsel %vm786_vm4, %v5356_v14, 0.0 }
0x164f   :  { %v5293_v48 = vpop.xlane.xlu0 %5292  ;;  %5379 = vadd.xlane.f32.xlu1 %v5378_v2  ;;  %v5296_v1 = vpop.xlane.xlu1 %5295 }
0x1650   :  { %v5327_v37 = vmul.f32 0.03125, %v5293_v48  ;;  %v5328_v29 = vmul.f32 0.03125, %v5296_v1  ;;  %v5357_v18 = vmul.f32 %v10090_v51, %v10090_v51  ;;  %v5358_v16 = vmul.f32 %v10093_v50, %v10093_v50 }
0x1652   :  { %v10101_v55 = vsub.f32 %v9997_v38, %v5327_v37  ;;  %v10104_v40 = vsub.f32 %v10000_v60, %v5328_v29  ;;  %v5381_v33 = vsel %vm786_vm4, %v5357_v18, 0.0  ;;  %v5384_v17 = vsel %vm786_vm4, %v5358_v16, 0.0 }
0x1653   :  { %5382 = vadd.xlane.f32.xlu0 %v5381_v33  ;;  %5385 = vadd.xlane.f32.xlu1 %v5384_v17 }
0x1654   :  { %v5359_v35 = vmul.f32 %v10101_v55, %v10101_v55  ;;  %v5360_v56 = vmul.f32 %v10104_v40, %v10104_v40 }
0x1656   :  { %v5387_v7 = vsel %vm786_vm4, %v5359_v35, 0.0  ;;  %v5390_v57 = vsel %vm786_vm4, %v5360_v56, 0.0 }
0x1657   :  { %5388 = vadd.xlane.f32.xlu0 %v5387_v7  ;;  %5391 = vadd.xlane.f32.xlu1 %v5390_v57 }
0x1687   :  { %v5299_v4 = vpop.xlane.xlu0 %5298 }
0x1688   :  { %v5329_v54 = vmul.f32 0.03125, %v5299_v4 }
0x168a   :  { %v10121_v59 = vsub.f32 %v10019_v30, %v5329_v54 }
0x168b   :  { %v5305_v8 = vpop.xlane.xlu0 %5304  ;;  %v5302_v46 = vpop.xlane.xlu1 %5301 }
0x168c   :  { %v5331_v49 = vmul.f32 0.03125, %v5305_v8  ;;  %v5330_v23 = vmul.f32 0.03125, %v5302_v46  ;;  %v5361_v5 = vmul.f32 %v10121_v59, %v10121_v59 }
0x168e   :  { %v10126_v11 = vsub.f32 %v10022_v41, %v5331_v49  ;;  %v10129_v34 = vsub.f32 %v10031_v9, %v5330_v23  ;;  %v5393_v44 = vsel %vm786_vm4, %v5361_v5, 0.0 }
0x168f   :  { %5394 = vadd.xlane.f32.xlu0 %v5393_v44  ;;  %v5311_v26 = vpop.xlane.xlu0 %5310  ;;  %v5308_v36 = vpop.xlane.xlu1 %5307 }
0x1690   :  { %v5333_v28 = vmul.f32 0.03125, %v5311_v26  ;;  %v5332_v20 = vmul.f32 0.03125, %v5308_v36  ;;  %v5363_v25 = vmul.f32 %v10126_v11, %v10126_v11  ;;  %v5362_v6 = vmul.f32 %v10129_v34, %v10129_v34 }
0x1692   :  { %v10137_v19 = vsub.f32 %v10045_v62, %v5333_v28  ;;  %v10140_v21 = vsub.f32 %v10034_v12, %v5332_v20  ;;  %v5399_v24 = vsel %vm786_vm4, %v5363_v25, 0.0  ;;  %v5396_v0 = vsel %vm786_vm4, %v5362_v6, 0.0 }
0x1693   :  { %5400 = vadd.xlane.f32.xlu0 %v5399_v24  ;;  %v5317_v39 = vpop.xlane.xlu0 %5316  ;;  %5397 = vadd.xlane.f32.xlu1 %v5396_v0  ;;  %v5314_v43 = vpop.xlane.xlu1 %5313 }
0x1694   :  { %v5335_v31 = vmul.f32 0.03125, %v5317_v39  ;;  %v5334_v14 = vmul.f32 0.03125, %v5314_v43  ;;  %v5365_v2 = vmul.f32 %v10137_v19, %v10137_v19  ;;  %v5364_v48 = vmul.f32 %v10140_v21, %v10140_v21 }
0x1696   :  { %v10149_v1 = vsub.f32 %v10050_v47, %v5335_v31  ;;  %v10152_v37 = vsub.f32 %v10055_v32, %v5334_v14  ;;  %v5405_v29 = vsel %vm786_vm4, %v5365_v2, 0.0  ;;  %v5402_v18 = vsel %vm786_vm4, %v5364_v48, 0.0 }
0x1697   :  { %5406 = vadd.xlane.f32.xlu0 %v5405_v29  ;;  %5403 = vadd.xlane.f32.xlu1 %v5402_v18  ;;  %v5320_v16 = vpop.xlane.xlu1 %5319 }
0x1698   :  { %v5336_v33 = vmul.f32 0.03125, %v5320_v16  ;;  %v5367_v17 = vmul.f32 %v10149_v1, %v10149_v1  ;;  %v5366_v35 = vmul.f32 %v10152_v37, %v10152_v37 }
0x169a   :  { %v10161_v56 = vsub.f32 %v10058_v22, %v5336_v33  ;;  %v5411_v7 = vsel %vm786_vm4, %v5367_v17, 0.0  ;;  %v5408_v57 = vsel %vm786_vm4, %v5366_v35, 0.0  ;;  %v10172_v17 = vld [vmem:[%s10420_s20] ss:$0 sm:$0xff] }
0x169b   :  { %5412 = vadd.xlane.f32.xlu0 %v5411_v7  ;;  %5409 = vadd.xlane.f32.xlu1 %v5408_v57 }
0x169c   :  { %v5368_v3 = vmul.f32 %v10161_v56, %v10161_v56 }
0x169e   :  { %v5414_v52 = vsel %vm786_vm4, %v5368_v3, 0.0 }
0x169f   :  { %5415 = vadd.xlane.f32.xlu1 %v5414_v52 }
0x16d0   :  { %v5371_v4 = vpop.xlane.xlu0 %5370 }
0x16d1   :  { %v5417_v54 = vmul.f32 0.03125, %v5371_v4  ;;  %v10180_v4 = vld [vmem:[%s10421_s21] ss:$0 sm:$0xff]  ;;  %s7700_s21 = smov [#allocation2]  }
0x16d2   :  { %s6153_s2 = sshll.u32 %s7700_s21, 4  ;;  %s6154_s2 = int_to_ptr.vmem [resolvable:$true] %s6153_s2 }
0x16d3   :  { %v5433_v8 = vadd.f32 1e-05, %v5417_v54  ;;  %s7670_s14 = scalar_lea.vmem %s6154_s2, 32  ;;  %p7675_p1 = scmp.lt.s32.totalorder %s6154_s2, %s6154_s2 }
0x16d4   :  { %v5377_v46 = vpop.xlane.xlu0 %5376  ;;  %v5374_v49 = vpop.xlane.xlu1 %5373  ;;  %p7671_p0 = scmp.ne.s32.totalorder %s6154_s2, %s7670_s14  ;;  %p7676_p2 = scmp.lt.s32.totalorder %s7670_s14, %s7670_s14 }
0x16d5   :  { %7590 = vrsqrt.f32 %v5433_v8  ;;  %v5419_v23 = vmul.f32 0.03125, %v5377_v46  ;;  %v5418_v5 = vmul.f32 0.03125, %v5374_v49 }
0x16d6   :  { %p7677_p3 = por %p7676_p2, %p7675_p1 }
0x16d7   :  { %v5435_v44 = vadd.f32 1e-05, %v5419_v23  ;;  %v5434_v26 = vadd.f32 1e-05, %v5418_v5 }
0x16d8   :  { %v5380_v36 = vpop.xlane.xlu1 %5379  ;;  %p7678_p4 = pnand %p7677_p3, %p7671_p0 }
0x16d9   :  { %7592 = vrsqrt.f32 %v5435_v44  ;;  %v5420_v28 = vmul.f32 0.03125, %v5380_v36 }
0x16da   :  { %7594 = vrsqrt.f32 %v5434_v26 }
0x16db   :  { %v5436_v20 = vadd.f32 1e-05, %v5420_v28 }
0x16dc   :  { %v5383_v25 = vpop.xlane.xlu0 %5382  ;;  %v5386_v6 = vpop.xlane.xlu1 %5385 }
0x16dd   :  { %7596 = vrsqrt.f32 %v5436_v20  ;;  %v5421_v24 = vmul.f32 0.03125, %v5383_v25  ;;  %v5422_v0 = vmul.f32 0.03125, %v5386_v6 }
0x16df   :  { %v5437_v39 = vadd.f32 1e-05, %v5421_v24  ;;  %v5438_v43 = vadd.f32 1e-05, %v5422_v0 }
0x16e0   :  { %v5389_v31 = vpop.xlane.xlu0 %5388  ;;  %v5392_v14 = vpop.xlane.xlu1 %5391 }
0x16e1   :  { %7598 = vrsqrt.f32 %v5437_v39  ;;  %v5423_v2 = vmul.f32 0.03125, %v5389_v31  ;;  %v5424_v48 = vmul.f32 0.03125, %v5392_v14 }
0x16e2   :  { %v7591_v29 = vpop.eup %7590  ;;  %7600 = vrsqrt.f32 %v5438_v43 }
0x16e3   :  { %v5439_v18 = vadd.f32 1e-05, %v5423_v2  ;;  %v5440_v16 = vadd.f32 1e-05, %v5424_v48  ;;  %v5465_v33 = vmul.f32 %v7591_v29, %v10067_v10 }
0x16e5   :  { %7602 = vrsqrt.f32 %v5439_v18  ;;  %v5487_v52 = vmul.f32 %v10172_v17, %v5465_v33 }
0x16e6   :  { %v7593_v35 = vpop.eup %7592  ;;  %7604 = vrsqrt.f32 %v5440_v16 }
0x16e7   :  { %v7595_v7 = vpop.eup %7594  ;;  %v5467_v57 = vmul.f32 %v7593_v35, %v10072_v42  ;;  %v5509_v49 = vadd.f32 %v10180_v4, %v5487_v52 }
0x16e8   :  { %v5466_v3 = vmul.f32 %v7595_v7, %v10075_v13 }
0x16e9   :  { %v5489_v8 = vmul.f32 %v10172_v17, %v5467_v57 }
0x16ea   :  { %v7597_v10 = vpop.eup %7596  ;;  %v5488_v54 = vmul.f32 %v10172_v17, %v5466_v3 }
0x16eb   :  { %v5468_v46 = vmul.f32 %v7597_v10, %v10083_v61  ;;  %v5511_v26 = vadd.f32 %v10180_v4, %v5489_v8 }
0x16ec   :  { %v5510_v42 = vadd.f32 %v10180_v4, %v5488_v54 }
0x16ed   :  { %v5490_v13 = vmul.f32 %v10172_v17, %v5468_v46 }
0x16ee   :  { %v7599_v23 = vpop.eup %7598  ;;  %v5525_v5 = vpack.c.bf16 %v5510_v42, %v5509_v49 }
0x16ef   :  { %v7601_v44 = vpop.eup %7600  ;;  %v5512_v36 = vadd.f32 %v10180_v4, %v5490_v13  ;;  %v5469_v28 = vmul.f32 %v7599_v23, %v10090_v51 }
0x16f0   :  { %7078 = vmatprep.mubr.msk.bf16.mxu0 %vm786_vm4, %v5525_v5  ;;  %v5470_v20 = vmul.f32 %v7601_v44, %v10093_v50 }
0x16f1   :  { %v5526_v61 = vpack.c.bf16 %v5512_v36, %v5511_v26  ;;  %v5491_v25 = vmul.f32 %v10172_v17, %v5469_v28 }
0x16f2   :  { %v7603_v6 = vpop.eup %7602  ;;  %v5492_v24 = vmul.f32 %v10172_v17, %v5470_v20 }
0x16f3   :  { %v7605_v0 = vpop.eup %7604  ;;  %v5471_v39 = vmul.f32 %v7603_v6, %v10101_v55  ;;  %7079 = vmatmul.mubr.msk.bf16.vlgmr.msra.gmra.mxu0 %vm786_vm4, %v5526_v61  ;;  %v5513_v43 = vadd.f32 %v10180_v4, %v5491_v25 }
0x16f4   :  { %v5472_v31 = vmul.f32 %v7605_v0, %v10104_v40  ;;  %v5514_v51 = vadd.f32 %v10180_v4, %v5492_v24 }
0x16f5   :  { %v5493_v14 = vmul.f32 %v10172_v17, %v5471_v39 }
0x16f6   :  { %v5527_v50 = vpack.c.bf16 %v5514_v51, %v5513_v43  ;;  %v5494_v2 = vmul.f32 %v10172_v17, %v5472_v31 }
0x16f7   :  { %v5515_v48 = vadd.f32 %v10180_v4, %v5493_v14 }
0x16f8   :  { %7082 = vmatprep.mubr.msk.bf16.mxu0 %vm786_vm4, %v5527_v50  ;;  %v5516_v29 = vadd.f32 %v10180_v4, %v5494_v2 }
0x16fa   :  { %v5528_v55 = vpack.c.bf16 %v5516_v29, %v5515_v48 }
0x16fc   :  { %7083 = vmatmul.mubr.msk.bf16.gmra.mxu0 %vm786_vm4, %v5528_v55 }
0x1718   :  { %v5395_v18 = vpop.xlane.xlu0 %5394 }
0x1719   :  { %v5425_v16 = vmul.f32 0.03125, %v5395_v18 }
0x171b   :  { %v5441_v33 = vadd.f32 1e-05, %v5425_v16 }
0x171c   :  { %v5401_v40 = vpop.xlane.xlu0 %5400  ;;  %v5398_v35 = vpop.xlane.xlu1 %5397 }
0x171d   :  { %7606 = vrsqrt.f32 %v5441_v33  ;;  %v5427_v7 = vmul.f32 0.03125, %v5401_v40  ;;  %v5426_v57 = vmul.f32 0.03125, %v5398_v35 }
0x171f   :  { %v5443_v3 = vadd.f32 1e-05, %v5427_v7  ;;  %v5442_v52 = vadd.f32 1e-05, %v5426_v57 }
0x1720   :  { %v5407_v10 = vpop.xlane.xlu0 %5406  ;;  %v5404_v54 = vpop.xlane.xlu1 %5403 }
0x1721   :  { %7608 = vrsqrt.f32 %v5443_v3  ;;  %v5429_v8 = vmul.f32 0.03125, %v5407_v10  ;;  %v5428_v46 = vmul.f32 0.03125, %v5404_v54 }
0x1722   :  { %7610 = vrsqrt.f32 %v5442_v52 }
0x1723   :  { %v5445_v49 = vadd.f32 1e-05, %v5429_v8  ;;  %v5444_v42 = vadd.f32 1e-05, %v5428_v46 }
0x1724   :  { %v5413_v13 = vpop.xlane.xlu0 %5412  ;;  %v5410_v23 = vpop.xlane.xlu1 %5409 }
0x1725   :  { %7612 = vrsqrt.f32 %v5445_v49  ;;  %v5431_v5 = vmul.f32 0.03125, %v5413_v13  ;;  %v5430_v44 = vmul.f32 0.03125, %v5410_v23  ;;  %v7199_v13 = vld [vmem:[%s10424_s24 + $0x30] sm:$0xff]   ;;  %v7202_v23 = vld [vmem:[%s10424_s24 + $0x18] sm:$0xff]  }
0x1726   :  { %7614 = vrsqrt.f32 %v5444_v42  ;;  %v7198_v42 = vld [vmem:[%s10424_s24 + $0x38] sm:$0xff]  }
0x1727   :  { %v5447_v26 = vadd.f32 1e-05, %v5431_v5  ;;  %v5446_v36 = vadd.f32 1e-05, %v5430_v44  ;;  %7094 = vmatprep.subr.bf16.mxu1 %v7198_v42  ;;  %v7203_v5 = vld [vmem:[%s10424_s24 + $0x10] sm:$0xff]   ;;  %v7204_v44 = vld [vmem:[%s10424_s24 + $0x8] sm:$0xff]  }
0x1728   :  { %v5416_v28 = vpop.xlane.xlu1 %5415  ;;  %7095 = vmatpush3.bf16.msra.mxu1 %v7198_v42 }
0x1729   :  { %7616 = vrsqrt.f32 %v5447_v26  ;;  %v5432_v20 = vmul.f32 0.03125, %v5416_v28  ;;  %7096 = vmatprep.subr.bf16.mxu1 %v7199_v13  ;;  %v7205_v26 = vld [vmem:[%s10424_s24] sm:$0xff]  }
0x172a   :  { %v7607_v61 = vpop.eup %7606  ;;  %7618 = vrsqrt.f32 %v5446_v36  ;;  %v10261_v36 = vld [vmem:[%s10423_s23] ss:$0 sm:$0xff] }
0x172b   :  { %v5448_v25 = vadd.f32 1e-05, %v5432_v20  ;;  %v5473_v6 = vmul.f32 %v7607_v61, %v10121_v59 }
0x172c   :  { %7097 = vmatpush3.bf16.msra.mxu1 %v7199_v13 }
0x172d   :  { %7620 = vrsqrt.f32 %v5448_v25  ;;  %v5495_v39 = vmul.f32 %v10172_v17, %v5473_v6 }
0x172e   :  { %v7609_v24 = vpop.eup %7608 }
0x172f   :  { %v7611_v0 = vpop.eup %7610  ;;  %v5475_v43 = vmul.f32 %v7609_v24, %v10126_v11  ;;  %v5517_v2 = vadd.f32 %v10180_v4, %v5495_v39 }
0x1730   :  { %v5474_v31 = vmul.f32 %v7611_v0, %v10129_v34 }
0x1731   :  { %v5497_v59 = vmul.f32 %v10172_v17, %v5475_v43 }
0x1732   :  { %v7613_v51 = vpop.eup %7612  ;;  %v5496_v14 = vmul.f32 %v10172_v17, %v5474_v31 }
0x1733   :  { %v7615_v50 = vpop.eup %7614  ;;  %v5477_v55 = vmul.f32 %v7613_v51, %v10137_v19  ;;  %v5519_v40 = vadd.f32 %v10180_v4, %v5497_v59 }
0x1734   :  { %v5476_v48 = vmul.f32 %v7615_v50, %v10140_v21  ;;  %v5518_v29 = vadd.f32 %v10180_v4, %v5496_v14 }
0x1735   :  { %v5499_v7 = vmul.f32 %v10172_v17, %v5477_v55 }
0x1736   :  { %v7617_v18 = vpop.eup %7616  ;;  %v5529_v16 = vpack.c.bf16 %v5518_v29, %v5517_v2  ;;  %v5498_v11 = vmul.f32 %v10172_v17, %v5476_v48 }
0x1737   :  { %v7619_v33 = vpop.eup %7618  ;;  %v5479_v34 = vmul.f32 %v7617_v18, %v10149_v1  ;;  %v5521_v1 = vadd.f32 %v10180_v4, %v5499_v7 }
0x1738   :  { %7086 = vmatprep.mubr.msk.bf16.mxu0 %vm786_vm4, %v5529_v16  ;;  %v5520_v35 = vadd.f32 %v10180_v4, %v5498_v11  ;;  %v5478_v21 = vmul.f32 %v7619_v33, %v10152_v37 }
0x1739   :  { %v5501_v10 = vmul.f32 %v10172_v17, %v5479_v34 }
0x173a   :  { %v7621_v57 = vpop.eup %7620  ;;  %v5530_v3 = vpack.c.bf16 %v5520_v35, %v5519_v40  ;;  %v5500_v19 = vmul.f32 %v10172_v17, %v5478_v21 }
0x173b   :  { %v5480_v52 = vmul.f32 %v7621_v57, %v10161_v56  ;;  %v5523_v37 = vadd.f32 %v10180_v4, %v5501_v10 }
0x173c   :  { %7087 = vmatmul.mubr.msk.bf16.gmra.mxu0 %vm786_vm4, %v5530_v3  ;;  %v5522_v54 = vadd.f32 %v10180_v4, %v5500_v19 }
0x173d   :  { %v5502_v8 = vmul.f32 %v10172_v17, %v5480_v52  ;;  %v7200_v17 = vld [vmem:[%s10424_s24 + $0x28] sm:$0xff]  }
0x173e   :  { %v5531_v46 = vpack.c.bf16 %v5522_v54, %v5521_v1  ;;  %7098 = vmatprep.subr.bf16.mxu1 %v7200_v17 }
0x173f   :  { %v5524_v49 = vadd.f32 %v10180_v4, %v5502_v8  ;;  %7099 = vmatpush3.bf16.msra.mxu1 %v7200_v17  ;;  %v7201_v4 = vld [vmem:[%s10424_s24 + $0x20] sm:$0xff]  }
0x1740   :  { %7090 = vmatprep.mubr.msk.bf16.mxu0 %vm786_vm4, %v5531_v46  ;;  %7100 = vmatprep.subr.bf16.mxu1 %v7201_v4 }
0x1741   :  { %v5532_v56 = vpack.c.bf16 %v5524_v49, %v5523_v37 }
0x1743   :  { %7101 = vmatpush3.bf16.msra.mxu1 %v7201_v4 }
0x1744   :  { %7091 = vmatmul.mubr.msk.bf16.gmra.mxu0 %vm786_vm4, %v5532_v56  ;;  %7102 = vmatprep.subr.bf16.mxu1 %v7202_v23 }
0x1747   :  { %7103 = vmatpush3.bf16.msra.mxu1 %v7202_v23 }
0x1748   :  { %7104 = vmatprep.subr.bf16.mxu1 %v7203_v5 }
0x174b   :  { %7105 = vmatpush3.bf16.msra.mxu1 %v7203_v5 }
0x174c   :  { %7106 = vmatprep.subr.bf16.mxu1 %v7204_v44 }
0x174f   :  { %7107 = vmatpush3.bf16.msra.mxu1 %v7204_v44 }
0x1750   :  { %7108 = vmatprep.subr.bf16.mxu1 %v7205_v26 }
0x1753   :  { %7109 = vmatpush3.bf16.msra.mxu1 %v7205_v26 }
0x17b3   :  { %v7080_v28 = vpop.f32.mrf.mxu0 }
0x17b4   :  { %v10264_v20 = vadd.f32 %v7080_v28, %v10261_v36 }
0x17b5   :  { %v5614_v61 = vpop.f32.mrf.mxu0 }
0x17b6   :  { %v5695_v25 = vmul.f32 0.044715, %v10264_v20  ;;  %v10268_v6 = vadd.f32 %v10261_v36, %v5614_v61 }
0x17b7   :  { %v7081_v24 = vpop.f32.mrf.mxu0 }
0x17b8   :  { %v5711_v0 = vmul.f32 %v5695_v25, %v10264_v20  ;;  %v5693_v39 = vmul.f32 0.044715, %v10268_v6  ;;  %v5626_v43 = vadd.f32 %v7081_v24, %v10261_v36 }
0x17b9   :  { %v5617_v31 = vpop.f32.mrf.mxu0 }
0x17ba   :  { %v5727_v51 = vmul.f32 %v5711_v0, %v10264_v20  ;;  %v5709_v14 = vmul.f32 %v5693_v39, %v10268_v6  ;;  %v5696_v50 = vmul.f32 0.044715, %v5626_v43  ;;  %v5618_v2 = vadd.f32 %v10261_v36, %v5617_v31 }
0x17bc   :  { %v5743_v48 = vadd.f32 %v5727_v51, %v10264_v20  ;;  %v5725_v29 = vmul.f32 %v5709_v14, %v10268_v6  ;;  %v5712_v59 = vmul.f32 %v5696_v50, %v5626_v43  ;;  %v7084_v55 = vpop.f32.mrf.mxu0  ;;  %v5694_v18 = vmul.f32 0.044715, %v5618_v2 }
0x17bd   :  { %v10279_v16 = vadd.f32 %v7084_v55, %v10261_v36 }
0x17be   :  { %v5759_v11 = vmul.f32 0.7978846, %v5743_v48  ;;  %v5728_v33 = vmul.f32 %v5712_v59, %v5626_v43  ;;  %v5630_v34 = vpop.f32.mrf.mxu0  ;;  %v5741_v40 = vadd.f32 %v5725_v29, %v10268_v6  ;;  %v5710_v35 = vmul.f32 %v5694_v18, %v5618_v2 }
0x17bf   :  { %v5699_v21 = vmul.f32 0.044715, %v10279_v16  ;;  %v5631_v7 = vadd.f32 %v10261_v36, %v5630_v34  ;;  %v5677_v34 = vmul.f32 0.5, %v10268_v6 }
0x17c0   :  { %7622 = vtanh.f32 %v5759_v11  ;;  %v5744_v57 = vadd.f32 %v5728_v33, %v5626_v43  ;;  %v7085_v3 = vpop.f32.mrf.mxu0  ;;  %v5757_v19 = vmul.f32 0.7978846, %v5741_v40  ;;  %v5726_v52 = vmul.f32 %v5710_v35, %v5618_v2 }
0x17c1   :  { %v5715_v10 = vmul.f32 %v5699_v21, %v10279_v16  ;;  %v5697_v1 = vmul.f32 0.044715, %v5631_v7  ;;  %v5642_v54 = vadd.f32 %v7085_v3, %v10261_v36  ;;  %v5680_v33 = vmul.f32 0.5, %v5626_v43 }
0x17c2   :  { %v5760_v8 = vmul.f32 0.7978846, %v5744_v57  ;;  %v5633_v46 = vpop.f32.mrf.mxu0  ;;  %7624 = vtanh.f32 %v5757_v19  ;;  %v5742_v13 = vadd.f32 %v5726_v52, %v5618_v2  ;;  %v5678_v40 = vmul.f32 0.5, %v5618_v2 }
0x17c3   :  { %v5731_v37 = vmul.f32 %v5715_v10, %v10279_v16  ;;  %v5713_v49 = vmul.f32 %v5697_v1, %v5631_v7  ;;  %v5700_v42 = vmul.f32 0.044715, %v5642_v54  ;;  %v5634_v56 = vadd.f32 %v10261_v36, %v5633_v46 }
0x17c4   :  { %7626 = vtanh.f32 %v5760_v8  ;;  %v5758_v44 = vmul.f32 0.7978846, %v5742_v13  ;;  %v5679_v21 = vmul.f32 0.5, %v10264_v20  ;;  %v5681_v43 = vmul.f32 0.5, %v5631_v7 }
0x17c5   :  { %v5747_v17 = vadd.f32 %v5731_v37, %v10279_v16  ;;  %v5729_v4 = vmul.f32 %v5713_v49, %v5631_v7  ;;  %v5716_v23 = vmul.f32 %v5700_v42, %v5642_v54  ;;  %v5698_v5 = vmul.f32 0.044715, %v5634_v56 }
0x17c6   :  { %7628 = vtanh.f32 %v5758_v44  ;;  %v5682_v6 = vmul.f32 0.5, %v5634_v56 }
0x17c7   :  { %v5732_v26 = vmul.f32 %v5716_v23, %v5642_v54  ;;  %v5714_v28 = vmul.f32 %v5698_v5, %v5634_v56  ;;  %v5745_v61 = vadd.f32 %v5729_v4, %v5631_v7  ;;  %v5763_v25 = vmul.f32 0.7978846, %v5747_v17 }
0x17c8   :  { %v5684_v17 = vmul.f32 0.5, %v5642_v54  ;;  %v5683_v5 = vmul.f32 0.5, %v10279_v16 }
0x17c9   :  { %v5748_v24 = vadd.f32 %v5732_v26, %v5642_v54  ;;  %v5730_v0 = vmul.f32 %v5714_v28, %v5634_v56  ;;  %v5761_v39 = vmul.f32 0.7978846, %v5745_v61 }
0x17cb   :  { %v5764_v31 = vmul.f32 0.7978846, %v5748_v24  ;;  %v5746_v51 = vadd.f32 %v5730_v0, %v5634_v56  ;;  %7630 = vtanh.f32 %v5761_v39 }
0x17cc   :  { %7632 = vtanh.f32 %v5763_v25 }
0x17cd   :  { %v7623_v14 = vpop.eup %7622  ;;  %7634 = vtanh.f32 %v5764_v31  ;;  %v5762_v50 = vmul.f32 0.7978846, %v5746_v51 }
0x17ce   :  { %v5791_v11 = vadd.f32 1.0, %v7623_v14 }
0x17cf   :  { %v7625_v48 = vpop.eup %7624  ;;  %7636 = vtanh.f32 %v5762_v50 }
0x17d0   :  { %v5789_v55 = vadd.f32 1.0, %v7625_v48  ;;  %v5807_v1 = vmul.f32 %v5791_v11, %v5679_v21 }
0x17d1   :  { %v7627_v29 = vpop.eup %7626 }
0x17d2   :  { %v5792_v59 = vadd.f32 1.0, %v7627_v29  ;;  %v5805_v19 = vmul.f32 %v5789_v55, %v5677_v34 }
0x17d3   :  { %v7629_v18 = vpop.eup %7628 }
0x17d4   :  { %v5790_v35 = vadd.f32 1.0, %v7629_v18  ;;  %v5808_v57 = vmul.f32 %v5792_v59, %v5680_v33 }
0x17d6   :  { %v5806_v52 = vmul.f32 %v5790_v35, %v5678_v40  ;;  %v5822_v37 = vpack.c.bf16 %v5808_v57, %v5807_v1 }
0x17d8   :  { %v7631_v3 = vpop.eup %7630  ;;  %v5821_v46 = vpack.c.bf16 %v5806_v52, %v5805_v19 }
0x17d9   :  { %v7633_v10 = vpop.eup %7632  ;;  %v5793_v49 = vadd.f32 1.0, %v7631_v3 }
0x17da   :  { %v7635_v8 = vpop.eup %7634  ;;  %7110 = vmatprep.mubr.bf16.mxu1 %v5821_v46  ;;  %v5795_v4 = vadd.f32 1.0, %v7633_v10 }
0x17db   :  { %v5796_v42 = vadd.f32 1.0, %v7635_v8  ;;  %7111 = vmatmul.mubr.bf16.vlgmr.msra.gmra.mxu1 %v5822_v37  ;;  %v5809_v20 = vmul.f32 %v5793_v49, %v5681_v43 }
0x17dc   :  { %v7637_v13 = vpop.eup %7636  ;;  %v5811_v28 = vmul.f32 %v5795_v4, %v5683_v5 }
0x17dd   :  { %v5794_v2 = vadd.f32 1.0, %v7637_v13  ;;  %v5812_v44 = vmul.f32 %v5796_v42, %v5684_v17 }
0x17df   :  { %v5810_v23 = vmul.f32 %v5794_v2, %v5682_v6  ;;  %v5824_v61 = vpack.c.bf16 %v5812_v44, %v5811_v28 }
0x17e1   :  { %v5823_v26 = vpack.c.bf16 %v5810_v23, %v5809_v20 }
0x17e3   :  { %7114 = vmatprep.mubr.bf16.mxu1 %v5823_v26 }
0x17e4   :  { %7115 = vmatmul.mubr.bf16.gmra.mxu1 %v5824_v61 }
0x17fc   :  { %v7088_v25 = vpop.f32.mrf.mxu0 }
0x17fd   :  { %v10293_v24 = vadd.f32 %v7088_v25, %v10261_v36 }
0x17fe   :  { %v5646_v7 = vpop.f32.mrf.mxu0 }
0x17ff   :  { %v5703_v56 = vmul.f32 0.044715, %v10293_v24  ;;  %v10297_v54 = vadd.f32 %v10261_v36, %v5646_v7 }
0x1800   :  { %v7089_v0 = vpop.f32.mrf.mxu0 }
0x1801   :  { %v5719_v39 = vmul.f32 %v5703_v56, %v10293_v24  ;;  %v5701_v16 = vmul.f32 0.044715, %v10297_v54  ;;  %v5658_v31 = vadd.f32 %v7089_v0, %v10261_v36 }
0x1802   :  { %v5649_v51 = vpop.f32.mrf.mxu0 }
0x1803   :  { %v5735_v14 = vmul.f32 %v5719_v39, %v10293_v24  ;;  %v5717_v50 = vmul.f32 %v5701_v16, %v10297_v54  ;;  %v5704_v48 = vmul.f32 0.044715, %v5658_v31  ;;  %v5650_v29 = vadd.f32 %v10261_v36, %v5649_v51 }
0x1804   :  { %v7092_v59 = vpop.f32.mrf.mxu0 }
0x1805   :  { %v5751_v55 = vadd.f32 %v5735_v14, %v10293_v24  ;;  %v5733_v18 = vmul.f32 %v5717_v50, %v10297_v54  ;;  %v5720_v11 = vmul.f32 %v5704_v48, %v5658_v31  ;;  %v5702_v33 = vmul.f32 0.044715, %v5650_v29 }
0x1806   :  { %v10308_v34 = vadd.f32 %v7092_v59, %v10261_v36  ;;  %v5662_v40 = vpop.f32.mrf.mxu0 }
0x1807   :  { %v5767_v35 = vmul.f32 0.7978846, %v5751_v55  ;;  %v5736_v21 = vmul.f32 %v5720_v11, %v5658_v31  ;;  %v5718_v57 = vmul.f32 %v5702_v33, %v5650_v29  ;;  %v10311_v3 = vadd.f32 %v10261_v36, %v5662_v40 }
0x1808   :  { %v5707_v19 = vmul.f32 0.044715, %v10308_v34  ;;  %v7093_v52 = vpop.f32.mrf.mxu0  ;;  %v5749_v10 = vadd.f32 %v5733_v18, %v10297_v54  ;;  %v5688_v33 = vmul.f32 0.5, %v5658_v31 }
0x1809   :  { %v5752_v1 = vadd.f32 %v5736_v21, %v5658_v31  ;;  %v5734_v8 = vmul.f32 %v5718_v57, %v5650_v29  ;;  %v5705_v46 = vmul.f32 0.044715, %v10311_v3  ;;  %7638 = vtanh.f32 %v5767_v35 }
0x180a   :  { %v5723_v37 = vmul.f32 %v5707_v19, %v10308_v34  ;;  %v5674_v49 = vadd.f32 %v7093_v52, %v10261_v36  ;;  %v5665_v42 = vpop.f32.mrf.mxu0  ;;  %v5765_v13 = vmul.f32 0.7978846, %v5749_v10  ;;  %v5685_v35 = vmul.f32 0.5, %v10297_v54 }
0x180b   :  { %v5768_v43 = vmul.f32 0.7978846, %v5752_v1  ;;  %v5721_v6 = vmul.f32 %v5705_v46, %v10311_v3  ;;  %v5666_v2 = vadd.f32 %v10261_v36, %v5665_v42  ;;  %v5750_v17 = vadd.f32 %v5734_v8, %v5650_v29 }
0x180c   :  { %v5739_v4 = vmul.f32 %v5723_v37, %v10308_v34  ;;  %v5708_v20 = vmul.f32 0.044715, %v5674_v49  ;;  %7640 = vtanh.f32 %v5765_v13  ;;  %v5686_v21 = vmul.f32 0.5, %v5650_v29 }
0x180d   :  { %7642 = vtanh.f32 %v5768_v43  ;;  %v5737_v23 = vmul.f32 %v5721_v6, %v10311_v3  ;;  %v5706_v5 = vmul.f32 0.044715, %v5666_v2  ;;  %v5766_v44 = vmul.f32 0.7978846, %v5750_v17 }
0x180e   :  { %v5755_v26 = vadd.f32 %v5739_v4, %v10308_v34  ;;  %v5724_v28 = vmul.f32 %v5708_v20, %v5674_v49  ;;  %v5687_v19 = vmul.f32 0.5, %v10293_v24  ;;  %v5692_v31 = vmul.f32 0.5, %v5674_v49 }
0x180f   :  { %v5722_v61 = vmul.f32 %v5706_v5, %v5666_v2  ;;  %7644 = vtanh.f32 %v5766_v44  ;;  %v5753_v25 = vadd.f32 %v5737_v23, %v10311_v3  ;;  %v5689_v29 = vmul.f32 0.5, %v10311_v3  ;;  %v6060_v3 = vld [vmem:[%s10426_s26 + $0x10] sm:$0xff] }
0x1810   :  { %v5771_v7 = vmul.f32 0.7978846, %v5755_v26  ;;  %v5740_v56 = vmul.f32 %v5724_v28, %v5674_v49  ;;  %v5690_v20 = vmul.f32 0.5, %v5666_v2  ;;  %v5691_v23 = vmul.f32 0.5, %v10308_v34  ;;  %v6059_v34 = vld [vmem:[%s10426_s26 + $0x8] sm:$0xff] }
0x1811   :  { %v5738_v36 = vmul.f32 %v5722_v61, %v5666_v2  ;;  %v5769_v0 = vmul.f32 0.7978846, %v5753_v25 }
0x1812   :  { %v5756_v39 = vadd.f32 %v5740_v56, %v5674_v49  ;;  %v6061_v49 = vld [vmem:[%s10426_s26 + $0x18] sm:$0xff] }
0x1813   :  { %v5754_v16 = vadd.f32 %v5738_v36, %v5666_v2  ;;  %7646 = vtanh.f32 %v5769_v0  ;;  %v6058_v2 = vld [vmem:[%s10426_s26] sm:$0xff] }
0x1814   :  { %7648 = vtanh.f32 %v5771_v7  ;;  %v5772_v51 = vmul.f32 0.7978846, %v5756_v39  ;;  %v7698_v7 = vmov 0.0  }
0x1815   :  { %v5770_v14 = vmul.f32 0.7978846, %v5754_v16  ;;  %7126 = vmatprep.subr.mxu0 %v7698_v7  ;;  %7134 = vmatprep.mubr.msk.f32.mxu0 %vm7699_vm5, %v7698_v7  ;;  %v10343_v16 = vld [vmem:[%s10425_s25] ss:$0 sm:$0xff] }
0x1816   :  { %7650 = vtanh.f32 %v5772_v51  ;;  %v7639_v50 = vpop.eup %7638  ;;  %7127 = vmatpush3.msra.mxu0 %v6061_v49 }
0x1817   :  { %7652 = vtanh.f32 %v5770_v14  ;;  %v5799_v40 = vadd.f32 1.0, %v7639_v50  ;;  %7128 = vmatprep.subr.mxu0 %v7698_v7 }
0x1818   :  { %7129 = vmatpush3.msra.mxu0 %v6060_v3 }
0x1819   :  { %v7641_v48 = vpop.eup %7640  ;;  %v5815_v46 = vmul.f32 %v5799_v40, %v5687_v19  ;;  %7130 = vmatprep.subr.mxu0 %v7698_v7 }
0x181a   :  { %v7643_v59 = vpop.eup %7642  ;;  %v5797_v55 = vadd.f32 1.0, %v7641_v48  ;;  %7131 = vmatpush3.msra.mxu0 %v6059_v34 }
0x181b   :  { %v5800_v18 = vadd.f32 1.0, %v7643_v59  ;;  %7132 = vmatprep.subr.mxu0 %v7698_v7 }
0x181c   :  { %v7645_v11 = vpop.eup %7644  ;;  %v5813_v10 = vmul.f32 %v5797_v55, %v5685_v35  ;;  %7133 = vmatpush3.msra.mxu0 %v6058_v2 }
0x181d   :  { %v5798_v57 = vadd.f32 1.0, %v7645_v11  ;;  %v5816_v52 = vmul.f32 %v5800_v18, %v5688_v33 }
0x181f   :  { %v5814_v1 = vmul.f32 %v5798_v57, %v5686_v21  ;;  %v5826_v13 = vpack.c.bf16 %v5816_v52, %v5815_v46 }
0x1820   :  { %v7647_v8 = vpop.eup %7646 }
0x1821   :  { %v7649_v37 = vpop.eup %7648  ;;  %v5825_v42 = vpack.c.bf16 %v5814_v1, %v5813_v10  ;;  %v5801_v6 = vadd.f32 1.0, %v7647_v8 }
0x1822   :  { %v5803_v4 = vadd.f32 1.0, %v7649_v37 }
0x1823   :  { %v7651_v43 = vpop.eup %7650  ;;  %7118 = vmatprep.mubr.bf16.mxu1 %v5825_v42  ;;  %v5817_v44 = vmul.f32 %v5801_v6, %v5689_v29 }
0x1824   :  { %v7653_v17 = vpop.eup %7652  ;;  %7119 = vmatmul.mubr.bf16.gmra.mxu1 %v5826_v13  ;;  %v5804_v54 = vadd.f32 1.0, %v7651_v43  ;;  %v5819_v28 = vmul.f32 %v5803_v4, %v5691_v23 }
0x1825   :  { %v5802_v24 = vadd.f32 1.0, %v7653_v17 }
0x1826   :  { %v5820_v5 = vmul.f32 %v5804_v54, %v5692_v31 }
0x1827   :  { %v5818_v26 = vmul.f32 %v5802_v24, %v5690_v20 }
0x1828   :  { %v5828_v25 = vpack.c.bf16 %v5820_v5, %v5819_v28 }
0x1829   :  { %v5827_v61 = vpack.c.bf16 %v5818_v26, %v5817_v44 }
0x182b   :  { %7122 = vmatprep.mubr.bf16.mxu1 %v5827_v61 }
0x182c   :  { %7123 = vmatmul.mubr.bf16.gmra.mxu1 %v5828_v25 }
0x189b   :  { %v7112_v56 = vpop.f32.mrf.mxu1 }
0x189c   :  { %v5943_v55 = vadd.f32 %v7112_v56, %v10343_v16 }
0x189d   :  { %v5934_v36 = vpop.f32.mrf.mxu1 }
0x189e   :  { %v5935_v50 = vadd.f32 %v10343_v16, %v5934_v36  ;;  %v5999_v40 = vadd.f32 %v5943_v55, %v9966_v15 }
0x189f   :  { %v7113_v0 = vpop.f32.mrf.mxu1 }
0x18a0   :  { %v5997_v18 = vadd.f32 %v5935_v50, %v9963_v63  ;;  %v5946_v21 = vadd.f32 %v7113_v0, %v10343_v16  ;;  %v6016_v52 = vsel %vm786_vm4, %v5999_v40, 0.0 }
0x18a1   :  { %v5937_v39 = vpop.f32.mrf.mxu1 }
0x18a2   :  { %v5938_v51 = vadd.f32 %v10343_v16, %v5937_v39  ;;  %v6013_v35 = vsel %vm786_vm4, %v5997_v18, 0.0 }
0x18a4   :  { %v7116_v14 = vpop.f32.mrf.mxu1  ;;  %v5998_v48 = vadd.f32 %v5938_v51, %v9973_v58  ;;  %v6000_v58 = vadd.f32 %v5946_v21, %v9976_v27 }
0x18a5   :  { %v5959_v42 = vadd.f32 %v7116_v14, %v10343_v16 }
0x18a6   :  { %v5950_v59 = vpop.f32.mrf.mxu1  ;;  %v6014_v11 = vsel %vm786_vm4, %v5998_v48, 0.0  ;;  %v6018_v8 = vsel %vm786_vm4, %v6000_v58, 0.0 }
0x18a7   :  { %v6015_v57 = vadd.f32 %v6014_v11, %v6013_v35  ;;  %v5951_v10 = vadd.f32 %v10343_v16, %v5950_v59  ;;  %v6003_v17 = vadd.f32 %v5959_v42, %v9997_v38 }
0x18a8   :  { %v7117_v33 = vpop.f32.mrf.mxu1 }
0x18a9   :  { %v6017_v1 = vadd.f32 %v6016_v52, %v6015_v57  ;;  %v6001_v46 = vadd.f32 %v5951_v10, %v9989_v53  ;;  %v5962_v31 = vadd.f32 %v7117_v33, %v10343_v16  ;;  %v6024_v20 = vsel %vm786_vm4, %v6003_v17, 0.0 }
0x18aa   :  { %v5953_v19 = vpop.f32.mrf.mxu1 }
0x18ab   :  { %v5954_v63 = vadd.f32 %v10343_v16, %v5953_v19  ;;  %v6019_v15 = vadd.f32 %v6018_v8, %v6017_v1  ;;  %v6020_v13 = vsel %vm786_vm4, %v6001_v46, 0.0 }
0x18ad   :  { %v6002_v37 = vadd.f32 %v5954_v63, %v9994_v45  ;;  %v6021_v43 = vadd.f32 %v6020_v13, %v6019_v15  ;;  %v6004_v45 = vadd.f32 %v5962_v31, %v10000_v60 }
0x18af   :  { %v6022_v6 = vsel %vm786_vm4, %v6002_v37, 0.0  ;;  %v6026_v61 = vsel %vm786_vm4, %v6004_v45, 0.0 }
0x18b0   :  { %v6023_v4 = vadd.f32 %v6022_v6, %v6021_v43  ;;  %v6349_v43 = vld [vmem:[%s10427_s27] ss:$0 sm:$0xff] }
0x18b2   :  { %v6025_v23 = vadd.f32 %v6024_v20, %v6023_v4 }
0x18b4   :  { %v6027_v49 = vadd.f32 %v6026_v61, %v6025_v23 }
0x18b6   :  { %v6028_v51 = vrot.slane %v6027_v49, 4 }
0x18b8   :  { %v6029_v33 = vadd.f32 %v6028_v51, %v6027_v49 }
0x18ba   :  { %v6030_v19 = vrot.slane %v6029_v33, 2 }
0x18bc   :  { %v6031_v10 = vadd.f32 %v6030_v19, %v6029_v33 }
0x18be   :  { %v6032_v63 = vrot.slane %v6031_v10, 1 }
0x18c0   :  { %v6033_v46 = vadd.f32 %v6032_v63, %v6031_v10 }
0x18e4   :  { %v7120_v27 = vpop.f32.mrf.mxu1 }
0x18e5   :  { %v5975_v24 = vadd.f32 %v7120_v27, %v10343_v16 }
0x18e6   :  { %v5966_v54 = vpop.f32.mrf.mxu1 }
0x18e7   :  { %v5967_v29 = vadd.f32 %v10343_v16, %v5966_v54  ;;  %v6007_v25 = vadd.f32 %v5975_v24, %v10022_v41 }
0x18e8   :  { %v7121_v53 = vpop.f32.mrf.mxu1 }
0x18e9   :  { %v6005_v44 = vadd.f32 %v5967_v29, %v10019_v30  ;;  %v5978_v26 = vadd.f32 %v7121_v53, %v10343_v16  ;;  %v6037_v0 = vsel %vm786_vm4, %v6007_v25, 0.0 }
0x18ea   :  { %v5969_v5 = vpop.f32.mrf.mxu1 }
0x18eb   :  { %v5970_v38 = vadd.f32 %v10343_v16, %v5969_v5  ;;  %v6034_v60 = vsel %vm786_vm4, %v6005_v44, 0.0  ;;  %v6008_v34 = vadd.f32 %v5978_v26, %v10034_v12 }
0x18ec   :  { %v7124_v28 = vpop.f32.mrf.mxu1 }
0x18ed   :  { %v6006_v7 = vadd.f32 %v5970_v38, %v10031_v9  ;;  %v5991_v39 = vadd.f32 %v7124_v28, %v10343_v16  ;;  %v6039_v50 = vsel %vm786_vm4, %v6008_v34, 0.0 }
0x18ee   :  { %v5982_v3 = vpop.f32.mrf.mxu1 }
0x18ef   :  { %v6035_v2 = vsel %vm786_vm4, %v6006_v7, 0.0  ;;  %v5983_v30 = vadd.f32 %v10343_v16, %v5982_v3  ;;  %v6011_v55 = vadd.f32 %v5991_v39, %v10050_v47 }
0x18f0   :  { %v6036_v56 = vadd.f32 %v6035_v2, %v6034_v60  ;;  %v7125_v36 = vpop.f32.mrf.mxu1 }
0x18f1   :  { %v6009_v41 = vadd.f32 %v5983_v30, %v10045_v62  ;;  %v5994_v48 = vadd.f32 %v7125_v36, %v10343_v16  ;;  %v6045_v57 = vsel %vm786_vm4, %v6011_v55, 0.0 }
0x18f2   :  { %v6038_v9 = vadd.f32 %v6037_v0, %v6036_v56  ;;  %v5985_v14 = vpop.f32.mrf.mxu1 }
0x18f3   :  { %v5986_v12 = vadd.f32 %v10343_v16, %v5985_v14  ;;  %v6041_v18 = vsel %vm786_vm4, %v6009_v41, 0.0  ;;  %v6012_v62 = vadd.f32 %v5994_v48, %v10058_v22  ;;  %v6056_v22 = vmul.f32 0.015625, %v6033_v46 }
0x18f4   :  { %v6040_v59 = vadd.f32 %v6039_v50, %v6038_v9 }
0x18f5   :  { %v6010_v11 = vadd.f32 %v5986_v12, %v10055_v32  ;;  %v6047_v16 = vsel %vm786_vm4, %v6012_v62, 0.0 }
0x18f6   :  { %v6042_v40 = vadd.f32 %v6041_v18, %v6040_v59 }
0x18f7   :  { %v6043_v35 = vsel %vm786_vm4, %v6010_v11, 0.0 }
0x18f8   :  { %v6044_v21 = vadd.f32 %v6043_v35, %v6042_v40 }
0x18fa   :  { %v6046_v52 = vadd.f32 %v6045_v57, %v6044_v21 }
0x18fc   :  { %v6048_v58 = vadd.f32 %v6047_v16, %v6046_v52 }
0x18fe   :  { %v6049_v47 = vrot.slane %v6048_v58, 4 }
0x1900   :  { %v6050_v1 = vadd.f32 %v6049_v47, %v6048_v58 }
0x1902   :  { %v6051_v8 = vrot.slane %v6050_v1, 2 }
0x1904   :  { %v6052_v32 = vadd.f32 %v6051_v8, %v6050_v1 }
0x1906   :  { %v6053_v15 = vrot.slane %v6052_v32, 1 }
0x1908   :  { %v6054_v37 = vadd.f32 %v6053_v15, %v6052_v32 }
0x190a   :  { %v6057_v42 = vmul.f32 0.015625, %v6054_v37 }
0x190c   :  { %v6072_v13 = vsel %vm6071_vm6, %v6057_v42, %v6056_v22 }
0x190d   :  { %7135 = vmatmul.mubr.msk.f32.vlgmr.msra.gmra.mxu0 %vm786_vm4, %v6072_v13 }
0x19cd   :  { %v6141_v6 = vpop.f32.mrf.mxu0 }
0x19ce   :  { %v6142_v27 = vadd.f32 %v6349_v43, %v6141_v6 }
0x19cf   :  { %v7136_v17 = vpop.f32.mrf.mxu0 }
0x19d0   :  { %6146 = vst.msk [vmem:[#allocation2] sm:$0x3] %vm6145_vm7, %v6142_v27 }
0x19d1   :  { %7681 = shalt.err (!%p7678_p4)
}
0x19d2   :  { %6156 = dma.vmem_to_hbm [thread:$0]  %s6154_s2, 32, %s10428_s28, [#allocation3]  }
0x19d3   :  { %7690 = dma.done.wait [#allocation3], 32  }
0x19d4   :  { %7691 = vsyncadd [#allocation3], 4294967264 }
0x19d5   :  { %6160 = vsyncpa [#allocation3], 1 }

</bundles_post_ra>
